<compile_context>
chip_gen: v7x
topology: tpu7x:2x2x1
jax: 0.10.0
libtpu: 0.0.40
codegen_flags: <defaults>
</compile_context>

<pallas_src>
import jax
import jax.numpy as jnp
from jax.experimental import pallas as pl
from jax.experimental.pallas import tpu as pltpu

EPS = 1e-5


# ----------------------------- Pallas kernel -------------------------------
def _build_head_kernel(num_layers, H, W, b_tile, compute_dtype, approx_silu):
    """Fused 1x1-proj + num_layers 3x3 conv head; all layers VMEM-resident."""
    HW = H * W
    BHW = b_tile * HW

    def silu(v):  # v: f32
        if approx_silu:
            # exp -> EUP slot; approx reciprocal also rides the EUP slot.
            return v * pl.reciprocal(1.0 + jnp.exp(-v), approx=True)
        return v * (1.0 / (1.0 + jnp.exp(-v)))

    def kernel(x_ref, *rest):
        o_ref = rest[-1]
        if num_layers:
            masks_ref = rest[0]
            w0_ref, b0_ref = rest[1], rest[2]
            lrefs = rest[3:-1]             # (w_l, b_l) pairs, w_l is (Cout, 9*Cout)
        else:
            w0_ref, b0_ref = rest[0], rest[1]
            lrefs = ()

        # ---- fold the batch tile into the lane axis: (Cin, B_tile*HW) ------
        # Column b*HW + h*W + w holds image b, pixel (h, w).
        x = jnp.concatenate([x_ref[b] for b in range(b_tile)], axis=1)
        x = x.astype(compute_dtype)

        # ---- 1x1 input_proj (+ folded BN) + SiLU: one channel matmul -------
        acc = jnp.dot(w0_ref[...], x, preferred_element_type=jnp.float32)
        feat = silu(acc + b0_ref[...])                     # f32 (Cout, BHW)

        if num_layers:
            masks = masks_ref[...]                          # (9, BHW), 0/1

        # ---- 3x3 conv (+ folded BN) + SiLU layers: ONE K=9*Cout dot each ---
        for l in range(num_layers):
            w_ref = lrefs[2 * l]            # (Cout, 9*Cout) compute_dtype
            b_ref = lrefs[2 * l + 1]        # (Cout, 1) f32
            feat_c = feat.astype(compute_dtype)   # single cast per layer
            pieces = []
            for kh in range(3):
                for kw in range(3):
                    dh, dw = kh - 1, kw - 1
                    if dh == 0 and dw == 0:
                        pieces.append(feat_c)
                    else:
                        shift = (-(dh * W + dw)) % BHW      # static
                        t = kh * 3 + kw
                        pieces.append(
                            pltpu.roll(feat_c, shift, axis=1) * masks[t:t + 1, :])
            stacked = jnp.concatenate(pieces, axis=0)       # (9*Cout, BHW)
            acc = jnp.dot(w_ref[...], stacked, preferred_element_type=jnp.float32)
            feat = silu(acc + b_ref[...])

        # Lane-dense stores, one (Cout, HW) slab per image in the tile.
        for b in range(b_tile):
            o_ref[b] = feat[:, b * HW:(b + 1) * HW].astype(o_ref.dtype)

    return kernel


# ------------------------------- glue (JAX) --------------------------------
def fold_bn(w_oihw, gamma, beta, mean, var, eps=EPS):
    """Fold eval-mode BatchNorm into conv weight (OIHW) and produce a bias."""
    scale = gamma / jnp.sqrt(var + eps)
    w_f = w_oihw * scale[:, None, None, None]
    b_f = beta - mean * scale
    return w_f, b_f


def prepare_params(raw, compute_dtype=jnp.bfloat16):
    """Fold BN; lay weights out channel-major / K-concatenated for single dots."""
    out = {}
    w, g, b, m, v = raw["proj"]
    w_f, b_f = fold_bn(w, g, b, m, v)                       # (Cout, Cin, 1, 1)
    out["proj"] = (w_f[:, :, 0, 0].astype(compute_dtype),   # (Cout, Cin)
                   b_f.reshape(-1, 1).astype(jnp.float32))  # (Cout, 1)
    out["feat"] = []
    for (w, g, b, m, v) in raw["feat"]:
        w_f, b_f = fold_bn(w, g, b, m, v)                   # (Cout, Cin, 3, 3)
        Cout, Cin = w_f.shape[0], w_f.shape[1]
        # Column index = (kh*3+kw)*Cin + ci, matching the stacked activations.
        w_cat = jnp.transpose(w_f, (0, 2, 3, 1)).reshape(Cout, 9 * Cin)
        out["feat"].append((w_cat.astype(compute_dtype),
                            b_f.reshape(-1, 1).astype(jnp.float32)))
    return out


def _build_tap_masks(H, W, b_tile, dtype):
    """0/1 border masks for the 9 taps, tiled over the batch-in-lanes layout."""
    HW = H * W
    p = jnp.arange(HW, dtype=jnp.int32)
    hh = p // W
    ww = p - hh * W
    rows = []
    for kh in range(3):
        for kw in range(3):
            dh, dw = kh - 1, kw - 1
            ok = ((hh + dh >= 0) & (hh + dh < H) &
                  (ww + dw >= 0) & (ww + dw < W))
            rows.append(ok.astype(dtype))
    m = jnp.stack(rows, axis=0)                 # (9, HW); center row all ones
    return jnp.tile(m, (1, b_tile))             # (9, b_tile*HW)


def coupled_head_forward(x_nchw, params, *, approx_silu=True,
                         out_dtype=jnp.float32, b_tile=None):
    """Pallas-backed forward. Returns (feat, feat) in NCHW like the module."""
    N, Cin, H, W = x_nchw.shape
    HW = H * W
    w0, b0 = params["proj"]
    Cout = w0.shape[0]
    feat_params = params["feat"]
    num_layers = len(feat_params)
    compute_dtype = w0.dtype

    # Amortize per-grid-step overhead over a few images (shared weights/masks).
    if b_tile is None:
        b_tile = min(N, 4)
    n_pad = -N % b_tile

    # (N, Cin, H, W) -> (N, Cin, H*W): contiguous NCHW view, no data movement.
    x = x_nchw.reshape(N, Cin, HW)
    if n_pad:
        x = jnp.concatenate([x, jnp.zeros((n_pad, Cin, HW), x.dtype)], axis=0)
    Np = N + n_pad
    BHW = b_tile * HW

    kernel = _build_head_kernel(num_layers, H, W, b_tile, compute_dtype,
                                approx_silu)

    in_specs = [pl.BlockSpec((b_tile, Cin, HW), lambda n: (n, 0, 0))]
    args = [x]
    if num_layers:
        masks = _build_tap_masks(H, W, b_tile, compute_dtype)   # (9, BHW)
        in_specs.append(pl.BlockSpec((9, BHW), lambda n: (0, 0)))  # resident
        args.append(masks)
    in_specs += [pl.BlockSpec((Cout, Cin), lambda n: (0, 0)),   # proj weight
                 pl.BlockSpec((Cout, 1), lambda n: (0, 0))]     # proj bias
    args += [w0, b0]
    for (w_l, b_l) in feat_params:
        in_specs.append(pl.BlockSpec((Cout, 9 * Cout), lambda n: (0, 0)))
        in_specs.append(pl.BlockSpec((Cout, 1), lambda n: (0, 0)))
        args.extend([w_l, b_l])

    flops = 2 * N * HW * Cout * (Cin + num_layers * 9 * Cout)
    transcendentals = N * HW * Cout * (1 + num_layers)
    # Weights/masks have constant index_maps -> DMA'd once (no N* factor).
    weight_bytes = sum(int(a.size) * a.dtype.itemsize for a in args[1:])
    bytes_accessed = (int(x.size) * x.dtype.itemsize
                      + Np * Cout * HW * jnp.dtype(out_dtype).itemsize
                      + weight_bytes)

    # TODO(synk): depthwise variant (cfg['head_dw']=True) not implemented.
    # TODO(synk): spatial-row tiling with a 1-row halo per 3x3 layer for feature
    #             maps too large for VMEM; re-derive vmem_limit_bytes per TPU
    #             generation (v7x physical VMEM is 64 MiB).
    # TODO(synk): for N==1 inference on v7x, add a second "parallel" grid axis
    #             (split Cout or H) so both TensorCores are fed.
    out = pl.pallas_call(
        kernel,
        out_shape=jax.ShapeDtypeStruct((Np, Cout, HW), out_dtype),
        grid=(Np // b_tile,),
        in_specs=in_specs,
        out_specs=pl.BlockSpec((b_tile, Cout, HW), lambda n: (n, 0, 0)),
        compiler_params=pltpu.CompilerParams(
            dimension_semantics=("parallel",),
            vmem_limit_bytes=48 * 1024 * 1024),
        cost_estimate=pl.CostEstimate(flops=int(flops),
                                      transcendentals=int(transcendentals),
                                      bytes_accessed=int(bytes_accessed)),
    )(*args)

    feat_nchw = out[:N].reshape(N, Cout, H, W)   # layout is already NCHW
    return feat_nchw, feat_nchw


# --------------------------- pure-JAX reference -----------------------------
def ref_forward(x_nchw, raw, eps=EPS):
    def conv_bn_silu(x, w, g, b, m, v, pad):
        y = jax.lax.conv_general_dilated(
            x, w, (1, 1), [(pad, pad), (pad, pad)],
            dimension_numbers=("NCHW", "OIHW", "NCHW"),
            precision=jax.lax.Precision.HIGHEST)
        scale = g / jnp.sqrt(v + eps)
        y = y * scale[None, :, None, None] + (b - m * scale)[None, :, None, None]
        return y * jax.nn.sigmoid(y)

    w, g, b, m, v = raw["proj"]
    feat = conv_bn_silu(x_nchw, w, g, b, m, v, pad=0)
    for (w, g, b, m, v) in raw["feat"]:
        feat = conv_bn_silu(feat, w, g, b, m, v, pad=1)
    return feat, feat


# ---------------------------------- main ------------------------------------
if __name__ == "__main__":
    cfg = dict(head_act="silu", head_norm="BN", head_k=3, head_dw=False,
               num_head_layers=2)
    # Small, forward-consistent shapes; H*W = 256 keeps the output lane-dense.
    batch, in_dim, out_dim, H, W = 2, 64, 32, 16, 16

    key = jax.random.PRNGKey(0)

    def bn_params(k, c):
        k1, k2, k3, k4 = jax.random.split(k, 4)
        gamma = 1.0 + 0.1 * jax.random.normal(k1, (c,), jnp.float32)
        beta = 0.1 * jax.random.normal(k2, (c,), jnp.float32)
        mean = 0.1 * jax.random.normal(k3, (c,), jnp.float32)
        var = jax.random.uniform(k4, (c,), jnp.float32, 0.5, 1.5)
        return gamma, beta, mean, var

    keys = jax.random.split(key, 2 + cfg["num_head_layers"] * 2 + 1)
    raw = {}
    w_proj = 0.05 * jax.random.normal(keys[0], (out_dim, in_dim, 1, 1), jnp.float32)
    raw["proj"] = (w_proj,) + bn_params(keys[1], out_dim)
    raw["feat"] = []
    for l in range(cfg["num_head_layers"]):
        w_l = 0.05 * jax.random.normal(
            keys[2 + 2 * l], (out_dim, out_dim, cfg["head_k"], cfg["head_k"]),
            jnp.float32)
        raw["feat"].append((w_l,) + bn_params(keys[3 + 2 * l], out_dim))

    x = jax.random.normal(keys[-1], (batch, in_dim, H, W), jnp.float32)

    ref_a, _ = ref_forward(x, raw)

    # 1) Exact path: f32 MXU operands + exact SiLU + f32 output -> tight check.
    params_f32 = prepare_params(raw, compute_dtype=jnp.float32)
    out_a, out_b = coupled_head_forward(x, params_f32, approx_silu=False,
                                        out_dtype=jnp.float32)
    jax.block_until_ready(out_a)
    assert out_a.shape == (batch, out_dim, H, W)
    assert jnp.allclose(out_a, ref_a, atol=1e-4, rtol=1e-4), "f32 path mismatch"
    assert jnp.array_equal(out_a, out_b)

    # 2) Perf path: bf16 MXU operands, approx EUP-reciprocal SiLU (f32 accum),
    #    bf16 writeback.
    params_bf16 = prepare_params(raw, compute_dtype=jnp.bfloat16)
    fast_a, _ = coupled_head_forward(x, params_bf16, approx_silu=True,
                                     out_dtype=jnp.bfloat16)
    jax.block_until_ready(fast_a)
    assert jnp.allclose(fast_a.astype(jnp.float32), ref_a,
                        atol=5e-2, rtol=5e-2), "bf16 path mismatch"

    print("KERNEL_OK")
</pallas_src>

<mosaic_0001>
module attributes {stable_mosaic.version = 11 : i64} {
  func.func @kernel(%arg0: i32, %arg1: memref<2x64x256xf32, #tpu.memory_space<vmem>>, %arg2: memref<9x512xf32, #tpu.memory_space<vmem>>, %arg3: memref<32x64xf32, #tpu.memory_space<vmem>>, %arg4: memref<32x1xf32, #tpu.memory_space<vmem>>, %arg5: memref<32x288xf32, #tpu.memory_space<vmem>>, %arg6: memref<32x1xf32, #tpu.memory_space<vmem>>, %arg7: memref<32x288xf32, #tpu.memory_space<vmem>>, %arg8: memref<32x1xf32, #tpu.memory_space<vmem>>, %arg9: memref<2x32x256xf32, #tpu.memory_space<vmem>>) attributes {dimension_semantics = [#tpu.dimension_semantics<parallel>], iteration_bounds = array<i64: 1>, scalar_prefetch = 0 : i64, scratch_operands = 0 : i64, tpu.core_type = #tpu.core_type<tc>, window_params = [{transform_indices = @transform_0, window_bounds = array<i64: 2, 64, 256>}, {pipeline_mode = #tpu.pipeline_mode<synchronous>, transform_indices = @transform_1, window_bounds = array<i64: 9, 512>}, {pipeline_mode = #tpu.pipeline_mode<synchronous>, transform_indices = @transform_2, window_bounds = array<i64: 32, 64>}, {pipeline_mode = #tpu.pipeline_mode<synchronous>, transform_indices = @transform_3, window_bounds = array<i64: 32, 1>}, {pipeline_mode = #tpu.pipeline_mode<synchronous>, transform_indices = @transform_4, window_bounds = array<i64: 32, 288>}, {pipeline_mode = #tpu.pipeline_mode<synchronous>, transform_indices = @transform_5, window_bounds = array<i64: 32, 1>}, {pipeline_mode = #tpu.pipeline_mode<synchronous>, transform_indices = @transform_6, window_bounds = array<i64: 32, 288>}, {pipeline_mode = #tpu.pipeline_mode<synchronous>, transform_indices = @transform_7, window_bounds = array<i64: 32, 1>}, {transform_indices = @transform_8, window_bounds = array<i64: 2, 32, 256>}]} {
    %c0 = arith.constant 0 : index
    %c0_0 = arith.constant 0 : index
    %c0_1 = arith.constant 0 : index
    %0 = vector.load %arg1[%c0, %c0_0, %c0_1] : memref<2x64x256xf32, #tpu.memory_space<vmem>>, vector<1x64x256xf32>
    %1 = vector.shape_cast %0 : vector<1x64x256xf32> to vector<64x256xf32>
    %c1 = arith.constant 1 : index
    %c0_2 = arith.constant 0 : index
    %c0_3 = arith.constant 0 : index
    %2 = vector.load %arg1[%c1, %c0_2, %c0_3] : memref<2x64x256xf32, #tpu.memory_space<vmem>>, vector<1x64x256xf32>
    %3 = vector.shape_cast %2 : vector<1x64x256xf32> to vector<64x256xf32>
    %4 = tpu.concatenate %1, %3 in 1 : vector<64x256xf32>, vector<64x256xf32> -> vector<64x512xf32>
    %c0_4 = arith.constant 0 : index
    %c0_5 = arith.constant 0 : index
    %5 = vector.load %arg3[%c0_4, %c0_5] : memref<32x64xf32, #tpu.memory_space<vmem>>, vector<32x64xf32>
    %cst = arith.constant dense<0.000000e+00> : vector<32x512xf32>
    %6 = tpu.matmul %5, %4, %cst {dimension_numbers = #tpu.dot_dimension_numbers<[1], [0], [0], [1], [0, 0, 1, 1], [], []>} : vector<32x64xf32>, vector<64x512xf32>, vector<32x512xf32> -> vector<32x512xf32>
    %c0_6 = arith.constant 0 : index
    %c0_7 = arith.constant 0 : index
    %7 = vector.load %arg4[%c0_6, %c0_7] : memref<32x1xf32, #tpu.memory_space<vmem>>, vector<32x1xf32>
    %8 = vector.broadcast %7 : vector<32x1xf32> to vector<32x512xf32>
    %9 = arith.addf %6, %8 : vector<32x512xf32>
    %cst_8 = arith.constant 0.000000e+00 : f32
    %10 = vector.broadcast %cst_8 : f32 to vector<32x512xf32>
    %11 = arith.subf %10, %9 : vector<32x512xf32>
    %12 = math.exp %11 : vector<32x512xf32>
    %cst_9 = arith.constant 1.000000e+00 : f32
    %13 = vector.broadcast %cst_9 : f32 to vector<32x512xf32>
    %14 = arith.addf %13, %12 : vector<32x512xf32>
    %cst_10 = arith.constant 1.000000e+00 : f32
    %15 = vector.broadcast %cst_10 : f32 to vector<32x512xf32>
    %16 = arith.divf %15, %14 : vector<32x512xf32>
    %17 = arith.mulf %9, %16 : vector<32x512xf32>
    %c0_11 = arith.constant 0 : index
    %c0_12 = arith.constant 0 : index
    %18 = vector.load %arg2[%c0_11, %c0_12] : memref<9x512xf32, #tpu.memory_space<vmem>>, vector<9x512xf32>
    %c17_i32 = arith.constant 17 : i32
    %19 = tpu.dynamic_rotate %17 by %c17_i32 dim 1 : vector<32x512xf32>, i32 -> vector<32x512xf32>
    %20 = vector.extract_strided_slice %18 {offsets = [0, 0], sizes = [1, 512], strides = [1, 1]} : vector<9x512xf32> to vector<1x512xf32>
    %21 = vector.broadcast %20 : vector<1x512xf32> to vector<32x512xf32>
    %22 = arith.mulf %19, %21 : vector<32x512xf32>
    %c16_i32 = arith.constant 16 : i32
    %23 = tpu.dynamic_rotate %17 by %c16_i32 dim 1 : vector<32x512xf32>, i32 -> vector<32x512xf32>
    %24 = vector.extract_strided_slice %18 {offsets = [1, 0], sizes = [1, 512], strides = [1, 1]} : vector<9x512xf32> to vector<1x512xf32>
    %25 = vector.broadcast %24 : vector<1x512xf32> to vector<32x512xf32>
    %26 = arith.mulf %23, %25 : vector<32x512xf32>
    %c15_i32 = arith.constant 15 : i32
    %27 = tpu.dynamic_rotate %17 by %c15_i32 dim 1 : vector<32x512xf32>, i32 -> vector<32x512xf32>
    %28 = vector.extract_strided_slice %18 {offsets = [2, 0], sizes = [1, 512], strides = [1, 1]} : vector<9x512xf32> to vector<1x512xf32>
    %29 = vector.broadcast %28 : vector<1x512xf32> to vector<32x512xf32>
    %30 = arith.mulf %27, %29 : vector<32x512xf32>
    %c1_i32 = arith.constant 1 : i32
    %31 = tpu.dynamic_rotate %17 by %c1_i32 dim 1 : vector<32x512xf32>, i32 -> vector<32x512xf32>
    %32 = vector.extract_strided_slice %18 {offsets = [3, 0], sizes = [1, 512], strides = [1, 1]} : vector<9x512xf32> to vector<1x512xf32>
    %33 = vector.broadcast %32 : vector<1x512xf32> to vector<32x512xf32>
    %34 = arith.mulf %31, %33 : vector<32x512xf32>
    %c511_i32 = arith.constant 511 : i32
    %35 = tpu.dynamic_rotate %17 by %c511_i32 dim 1 : vector<32x512xf32>, i32 -> vector<32x512xf32>
    %36 = vector.extract_strided_slice %18 {offsets = [5, 0], sizes = [1, 512], strides = [1, 1]} : vector<9x512xf32> to vector<1x512xf32>
    %37 = vector.broadcast %36 : vector<1x512xf32> to vector<32x512xf32>
    %38 = arith.mulf %35, %37 : vector<32x512xf32>
    %c497_i32 = arith.constant 497 : i32
    %39 = tpu.dynamic_rotate %17 by %c497_i32 dim 1 : vector<32x512xf32>, i32 -> vector<32x512xf32>
    %40 = vector.extract_strided_slice %18 {offsets = [6, 0], sizes = [1, 512], strides = [1, 1]} : vector<9x512xf32> to vector<1x512xf32>
    %41 = vector.broadcast %40 : vector<1x512xf32> to vector<32x512xf32>
    %42 = arith.mulf %39, %41 : vector<32x512xf32>
    %c496_i32 = arith.constant 496 : i32
    %43 = tpu.dynamic_rotate %17 by %c496_i32 dim 1 : vector<32x512xf32>, i32 -> vector<32x512xf32>
    %44 = vector.extract_strided_slice %18 {offsets = [7, 0], sizes = [1, 512], strides = [1, 1]} : vector<9x512xf32> to vector<1x512xf32>
    %45 = vector.broadcast %44 : vector<1x512xf32> to vector<32x512xf32>
    %46 = arith.mulf %43, %45 : vector<32x512xf32>
    %c495_i32 = arith.constant 495 : i32
    %47 = tpu.dynamic_rotate %17 by %c495_i32 dim 1 : vector<32x512xf32>, i32 -> vector<32x512xf32>
    %48 = vector.extract_strided_slice %18 {offsets = [8, 0], sizes = [1, 512], strides = [1, 1]} : vector<9x512xf32> to vector<1x512xf32>
    %49 = vector.broadcast %48 : vector<1x512xf32> to vector<32x512xf32>
    %50 = arith.mulf %47, %49 : vector<32x512xf32>
    %51 = tpu.concatenate %22, %26, %30, %34, %17, %38, %42, %46, %50 in 0 : vector<32x512xf32>, vector<32x512xf32>, vector<32x512xf32>, vector<32x512xf32>, vector<32x512xf32>, vector<32x512xf32>, vector<32x512xf32>, vector<32x512xf32>, vector<32x512xf32> -> vector<288x512xf32>
    %c0_13 = arith.constant 0 : index
    %c0_14 = arith.constant 0 : index
    %52 = vector.load %arg5[%c0_13, %c0_14] : memref<32x288xf32, #tpu.memory_space<vmem>>, vector<32x288xf32>
    %cst_15 = arith.constant dense<0.000000e+00> : vector<32x512xf32>
    %53 = tpu.matmul %52, %51, %cst_15 {dimension_numbers = #tpu.dot_dimension_numbers<[1], [0], [0], [1], [0, 0, 1, 1], [], []>} : vector<32x288xf32>, vector<288x512xf32>, vector<32x512xf32> -> vector<32x512xf32>
    %c0_16 = arith.constant 0 : index
    %c0_17 = arith.constant 0 : index
    %54 = vector.load %arg6[%c0_16, %c0_17] : memref<32x1xf32, #tpu.memory_space<vmem>>, vector<32x1xf32>
    %55 = vector.broadcast %54 : vector<32x1xf32> to vector<32x512xf32>
    %56 = arith.addf %53, %55 : vector<32x512xf32>
    %cst_18 = arith.constant 0.000000e+00 : f32
    %57 = vector.broadcast %cst_18 : f32 to vector<32x512xf32>
    %58 = arith.subf %57, %56 : vector<32x512xf32>
    %59 = math.exp %58 : vector<32x512xf32>
    %cst_19 = arith.constant 1.000000e+00 : f32
    %60 = vector.broadcast %cst_19 : f32 to vector<32x512xf32>
    %61 = arith.addf %60, %59 : vector<32x512xf32>
    %cst_20 = arith.constant 1.000000e+00 : f32
    %62 = vector.broadcast %cst_20 : f32 to vector<32x512xf32>
    %63 = arith.divf %62, %61 : vector<32x512xf32>
    %64 = arith.mulf %56, %63 : vector<32x512xf32>
    %c17_i32_21 = arith.constant 17 : i32
    %65 = tpu.dynamic_rotate %64 by %c17_i32_21 dim 1 : vector<32x512xf32>, i32 -> vector<32x512xf32>
    %66 = vector.extract_strided_slice %18 {offsets = [0, 0], sizes = [1, 512], strides = [1, 1]} : vector<9x512xf32> to vector<1x512xf32>
    %67 = vector.broadcast %66 : vector<1x512xf32> to vector<32x512xf32>
    %68 = arith.mulf %65, %67 : vector<32x512xf32>
    %c16_i32_22 = arith.constant 16 : i32
    %69 = tpu.dynamic_rotate %64 by %c16_i32_22 dim 1 : vector<32x512xf32>, i32 -> vector<32x512xf32>
    %70 = vector.extract_strided_slice %18 {offsets = [1, 0], sizes = [1, 512], strides = [1, 1]} : vector<9x512xf32> to vector<1x512xf32>
    %71 = vector.broadcast %70 : vector<1x512xf32> to vector<32x512xf32>
    %72 = arith.mulf %69, %71 : vector<32x512xf32>
    %c15_i32_23 = arith.constant 15 : i32
    %73 = tpu.dynamic_rotate %64 by %c15_i32_23 dim 1 : vector<32x512xf32>, i32 -> vector<32x512xf32>
    %74 = vector.extract_strided_slice %18 {offsets = [2, 0], sizes = [1, 512], strides = [1, 1]} : vector<9x512xf32> to vector<1x512xf32>
    %75 = vector.broadcast %74 : vector<1x512xf32> to vector<32x512xf32>
    %76 = arith.mulf %73, %75 : vector<32x512xf32>
    %c1_i32_24 = arith.constant 1 : i32
    %77 = tpu.dynamic_rotate %64 by %c1_i32_24 dim 1 : vector<32x512xf32>, i32 -> vector<32x512xf32>
    %78 = vector.extract_strided_slice %18 {offsets = [3, 0], sizes = [1, 512], strides = [1, 1]} : vector<9x512xf32> to vector<1x512xf32>
    %79 = vector.broadcast %78 : vector<1x512xf32> to vector<32x512xf32>
    %80 = arith.mulf %77, %79 : vector<32x512xf32>
    %c511_i32_25 = arith.constant 511 : i32
    %81 = tpu.dynamic_rotate %64 by %c511_i32_25 dim 1 : vector<32x512xf32>, i32 -> vector<32x512xf32>
    %82 = vector.extract_strided_slice %18 {offsets = [5, 0], sizes = [1, 512], strides = [1, 1]} : vector<9x512xf32> to vector<1x512xf32>
    %83 = vector.broadcast %82 : vector<1x512xf32> to vector<32x512xf32>
    %84 = arith.mulf %81, %83 : vector<32x512xf32>
    %c497_i32_26 = arith.constant 497 : i32
    %85 = tpu.dynamic_rotate %64 by %c497_i32_26 dim 1 : vector<32x512xf32>, i32 -> vector<32x512xf32>
    %86 = vector.extract_strided_slice %18 {offsets = [6, 0], sizes = [1, 512], strides = [1, 1]} : vector<9x512xf32> to vector<1x512xf32>
    %87 = vector.broadcast %86 : vector<1x512xf32> to vector<32x512xf32>
    %88 = arith.mulf %85, %87 : vector<32x512xf32>
    %c496_i32_27 = arith.constant 496 : i32
    %89 = tpu.dynamic_rotate %64 by %c496_i32_27 dim 1 : vector<32x512xf32>, i32 -> vector<32x512xf32>
    %90 = vector.extract_strided_slice %18 {offsets = [7, 0], sizes = [1, 512], strides = [1, 1]} : vector<9x512xf32> to vector<1x512xf32>
    %91 = vector.broadcast %90 : vector<1x512xf32> to vector<32x512xf32>
    %92 = arith.mulf %89, %91 : vector<32x512xf32>
    %c495_i32_28 = arith.constant 495 : i32
    %93 = tpu.dynamic_rotate %64 by %c495_i32_28 dim 1 : vector<32x512xf32>, i32 -> vector<32x512xf32>
    %94 = vector.extract_strided_slice %18 {offsets = [8, 0], sizes = [1, 512], strides = [1, 1]} : vector<9x512xf32> to vector<1x512xf32>
    %95 = vector.broadcast %94 : vector<1x512xf32> to vector<32x512xf32>
    %96 = arith.mulf %93, %95 : vector<32x512xf32>
    %97 = tpu.concatenate %68, %72, %76, %80, %64, %84, %88, %92, %96 in 0 : vector<32x512xf32>, vector<32x512xf32>, vector<32x512xf32>, vector<32x512xf32>, vector<32x512xf32>, vector<32x512xf32>, vector<32x512xf32>, vector<32x512xf32>, vector<32x512xf32> -> vector<288x512xf32>
    %c0_29 = arith.constant 0 : index
    %c0_30 = arith.constant 0 : index
    %98 = vector.load %arg7[%c0_29, %c0_30] : memref<32x288xf32, #tpu.memory_space<vmem>>, vector<32x288xf32>
    %cst_31 = arith.constant dense<0.000000e+00> : vector<32x512xf32>
    %99 = tpu.matmul %98, %97, %cst_31 {dimension_numbers = #tpu.dot_dimension_numbers<[1], [0], [0], [1], [0, 0, 1, 1], [], []>} : vector<32x288xf32>, vector<288x512xf32>, vector<32x512xf32> -> vector<32x512xf32>
    %c0_32 = arith.constant 0 : index
    %c0_33 = arith.constant 0 : index
    %100 = vector.load %arg8[%c0_32, %c0_33] : memref<32x1xf32, #tpu.memory_space<vmem>>, vector<32x1xf32>
    %101 = vector.broadcast %100 : vector<32x1xf32> to vector<32x512xf32>
    %102 = arith.addf %99, %101 : vector<32x512xf32>
    %cst_34 = arith.constant 0.000000e+00 : f32
    %103 = vector.broadcast %cst_34 : f32 to vector<32x512xf32>
    %104 = arith.subf %103, %102 : vector<32x512xf32>
    %105 = math.exp %104 : vector<32x512xf32>
    %cst_35 = arith.constant 1.000000e+00 : f32
    %106 = vector.broadcast %cst_35 : f32 to vector<32x512xf32>
    %107 = arith.addf %106, %105 : vector<32x512xf32>
    %cst_36 = arith.constant 1.000000e+00 : f32
    %108 = vector.broadcast %cst_36 : f32 to vector<32x512xf32>
    %109 = arith.divf %108, %107 : vector<32x512xf32>
    %110 = arith.mulf %102, %109 : vector<32x512xf32>
    %111 = vector.extract_strided_slice %110 {offsets = [0, 0], sizes = [32, 256], strides = [1, 1]} : vector<32x512xf32> to vector<32x256xf32>
    %c0_37 = arith.constant 0 : index
    %c0_38 = arith.constant 0 : index
    %c0_39 = arith.constant 0 : index
    %112 = vector.load %arg9[%c0_37, %c0_38, %c0_39] : memref<2x32x256xf32, #tpu.memory_space<vmem>>, vector<1x32x256xf32>
    %113 = vector.shape_cast %112 : vector<1x32x256xf32> to vector<32x256xf32>
    %114 = vector.shape_cast %111 : vector<32x256xf32> to vector<1x32x256xf32>
    tpu.vector_store %arg9[%c0_37, %c0_38, %c0_39], %114 {strides = array<i32>} : memref<2x32x256xf32, #tpu.memory_space<vmem>>, vector<1x32x256xf32>,
    %115 = vector.extract_strided_slice %110 {offsets = [0, 256], sizes = [32, 256], strides = [1, 1]} : vector<32x512xf32> to vector<32x256xf32>
    %c1_40 = arith.constant 1 : index
    %c0_41 = arith.constant 0 : index
    %c0_42 = arith.constant 0 : index
    %116 = vector.load %arg9[%c1_40, %c0_41, %c0_42] : memref<2x32x256xf32, #tpu.memory_space<vmem>>, vector<1x32x256xf32>
    %117 = vector.shape_cast %116 : vector<1x32x256xf32> to vector<32x256xf32>
    %118 = vector.shape_cast %115 : vector<32x256xf32> to vector<1x32x256xf32>
    tpu.vector_store %arg9[%c1_40, %c0_41, %c0_42], %118 {strides = array<i32>} : memref<2x32x256xf32, #tpu.memory_space<vmem>>, vector<1x32x256xf32>,
    return
  }
  func.func @transform_0(%arg0: i32) -> (i32, i32, i32) {
    %c0_i32 = arith.constant 0 : i32
    %c0_i32_0 = arith.constant 0 : i32
    %c0_i32_1 = arith.constant 0 : i32
    return %arg0, %c0_i32, %c0_i32_0 : i32, i32, i32
  }
  func.func @transform_1(%arg0: i32) -> (i32, i32) {
    %c0_i32 = arith.constant 0 : i32
    %c0_i32_0 = arith.constant 0 : i32
    %c0_i32_1 = arith.constant 0 : i32
    return %c0_i32, %c0_i32_0 : i32, i32
  }
  func.func @transform_2(%arg0: i32) -> (i32, i32) {
    %c0_i32 = arith.constant 0 : i32
    %c0_i32_0 = arith.constant 0 : i32
    %c0_i32_1 = arith.constant 0 : i32
    return %c0_i32, %c0_i32_0 : i32, i32
  }
  func.func @transform_3(%arg0: i32) -> (i32, i32) {
    %c0_i32 = arith.constant 0 : i32
    %c0_i32_0 = arith.constant 0 : i32
    %c0_i32_1 = arith.constant 0 : i32
    return %c0_i32, %c0_i32_0 : i32, i32
  }
  func.func @transform_4(%arg0: i32) -> (i32, i32) {
    %c0_i32 = arith.constant 0 : i32
    %c0_i32_0 = arith.constant 0 : i32
    %c0_i32_1 = arith.constant 0 : i32
    return %c0_i32, %c0_i32_0 : i32, i32
  }
  func.func @transform_5(%arg0: i32) -> (i32, i32) {
    %c0_i32 = arith.constant 0 : i32
    %c0_i32_0 = arith.constant 0 : i32
    %c0_i32_1 = arith.constant 0 : i32
    return %c0_i32, %c0_i32_0 : i32, i32
  }
  func.func @transform_6(%arg0: i32) -> (i32, i32) {
    %c0_i32 = arith.constant 0 : i32
    %c0_i32_0 = arith.constant 0 : i32
    %c0_i32_1 = arith.constant 0 : i32
    return %c0_i32, %c0_i32_0 : i32, i32
  }
  func.func @transform_7(%arg0: i32) -> (i32, i32) {
    %c0_i32 = arith.constant 0 : i32
    %c0_i32_0 = arith.constant 0 : i32
    %c0_i32_1 = arith.constant 0 : i32
    return %c0_i32, %c0_i32_0 : i32, i32
  }
  func.func @transform_8(%arg0: i32) -> (i32, i32, i32) {
    %c0_i32 = arith.constant 0 : i32
    %c0_i32_0 = arith.constant 0 : i32
    %c0_i32_1 = arith.constant 0 : i32
    return %arg0, %c0_i32, %c0_i32_0 : i32, i32, i32
  }
}

</mosaic_0001>

<bundles_post_ra>
// kernel: tpu_custom_call.1
= control target key start
LH: loop header
LB: loop body
LE: loop exit
PB: predicated region body
PF: predicated region fallthrough
CT: control target
= control target key end

     0   :  { %13 = vsyncpa [#allocation3], 0  ;;  %s6340_s0 = inlined_call_operand.hbm [shape: f32[2,64,256], index: 0, kind: input, shape index: {}]   ;;  %s6341_s1 = inlined_call_operand.hbm [shape: f32[9,512], index: 1, kind: input, shape index: {}]   ;;  %s6342_s2 = inlined_call_operand.hbm [shape: f32[32,64], index: 2, kind: input, shape index: {}]   ;;  %s6343_s3 = inlined_call_operand.vmem [shape: f32[32,1], index: 3, kind: input, shape index: {}]   ;;  %s6344_s4 = inlined_call_operand.vmem [shape: f32[32,288], index: 4, kind: input, shape index: {}]   ;;  %s6345_s5 = inlined_call_operand.vmem [shape: f32[32,1], index: 5, kind: input, shape index: {}]   ;;  %s6346_s6 = inlined_call_operand.hbm [shape: f32[32,288], index: 6, kind: input, shape index: {}]   ;;  %s6347_s7 = inlined_call_operand.vmem [shape: f32[32,1], index: 7, kind: input, shape index: {}]   ;;  %s6348_s8 = inlined_call_operand.hbm [shape: f32[2,32,256], index: 8, kind: output, shape index: {}]  }
   0x1   :  { %14 = vsyncpa [#allocation6], 0 }
   0x2   :  { %15 = vsyncpa [#allocation9], 0 }
   0x3   :  { %16 = vsyncpa [#allocation4], 0  ;;  %s3438_s27 = smov [#allocation5]   ;;  %s3320_s9 = scalar_lea.hbm %s6341_s1, 1024 }
   0x4   :  { %s34_s28 = sshll.u32 %s3438_s27, 4  ;;  %p3321_p0 = scmp.ne.s32.totalorder %s6341_s1, %s3320_s9  ;;  %s35_s28 = int_to_ptr.vmem [resolvable:$true] %s34_s28 }
   0x5   :  { %p3324_p1 = scmp.lt.u32.totalorder %s3320_s9, %s6341_s1 }
   0x7   :  { %p3326_p2 = pnand %p3324_p1, %p3321_p0 }
   0x9   :  { %3329 = shalt.err (!%p3326_p2)
}
   0xa   :  { %s3330_s14 = scalar_lea.vmem %s35_s28, 1024  ;;  %p3335_p4 = scmp.lt.s32.totalorder %s35_s28, %s35_s28 }
   0xb   :  { %p3331_p3 = scmp.ne.s32.totalorder %s35_s28, %s3330_s14  ;;  %p3336_p5 = scmp.lt.s32.totalorder %s3330_s14, %s3330_s14 }
   0xd   :  { %p3337_p6 = por %p3336_p5, %p3335_p4 }
   0xf   :  { %p3338_p7 = pnand %p3337_p6, %p3331_p3 }
  0x11   :  { %3341 = shalt.err (!%p3338_p7)
}
  0x12   :  { %s3439_s15 = smov 512   ;;  %s3440_s16 = smov 32  }
  0x13   :  { %40 = dma.hbm_to_vmem [thread:$0]  %s6341_s1, 1024, %s35_s28, [#allocation6], %s3439_s15, %s3439_s15, %s3440_s16  }
  0x14   :  { %s3441_s19 = smov [#allocation2]   ;;  %s3342_s23 = scalar_lea.hbm %s6340_s0, 4096 }
  0x15   :  { %s22_s20 = sshll.u32 %s3441_s19, 4  ;;  %p3343_p8 = scmp.ne.s32.totalorder %s6340_s0, %s3342_s23  ;;  %s23_s20 = int_to_ptr.vmem [resolvable:$true] %s22_s20 }
  0x16   :  { %p3346_p9 = scmp.lt.u32.totalorder %s3342_s23, %s6340_s0 }
  0x18   :  { %p3348_p10 = pnand %p3346_p9, %p3343_p8 }
  0x1a   :  { %3351 = shalt.err (!%p3348_p10)
}
  0x1b   :  { %s3352_s29 = scalar_lea.vmem %s23_s20, 4096  ;;  %p3357_p12 = scmp.lt.s32.totalorder %s23_s20, %s23_s20 }
  0x1c   :  { %p3353_p11 = scmp.ne.s32.totalorder %s23_s20, %s3352_s29  ;;  %p3358_p13 = scmp.lt.s32.totalorder %s3352_s29, %s3352_s29 }
  0x1e   :  { %p3359_p0 = por %p3358_p13, %p3357_p12 }
  0x20   :  { %p3360_p1 = pnand %p3359_p0, %p3353_p11 }
  0x22   :  { %3363 = shalt.err (!%p3360_p1)
}
  0x23   :  { %s3442_s1 = smov 256   ;;  %s3443_s28 = smov 16  }
  0x24   :  { %28 = dma.hbm_to_vmem [thread:$0]  %s6340_s0, 4096, %s23_s20, [#allocation3], %s3442_s1, %s3442_s1, %s3443_s28  }
  0x25   :  { %s3444_s10 = smov [#allocation7]   ;;  %s3364_s14 = scalar_lea.hbm %s6342_s2, 512 }
  0x26   :  { %s46_s11 = sshll.u32 %s3444_s10, 4  ;;  %p3365_p2 = scmp.ne.s32.totalorder %s6342_s2, %s3364_s14  ;;  %s47_s11 = int_to_ptr.vmem [resolvable:$true] %s46_s11 }
  0x27   :  { %p3368_p3 = scmp.lt.u32.totalorder %s3364_s14, %s6342_s2 }
  0x29   :  { %p3370_p4 = pnand %p3368_p3, %p3365_p2 }
  0x2b   :  { %3373 = shalt.err (!%p3370_p4)
}
  0x2c   :  { %s3374_s19 = scalar_lea.vmem %s47_s11, 512  ;;  %p3379_p6 = scmp.lt.s32.totalorder %s47_s11, %s47_s11 }
  0x2d   :  { %p3375_p5 = scmp.ne.s32.totalorder %s47_s11, %s3374_s19  ;;  %p3380_p7 = scmp.lt.s32.totalorder %s3374_s19, %s3374_s19 }
  0x2f   :  { %p3381_p8 = por %p3380_p7, %p3379_p6 }
  0x31   :  { %p3382_p9 = pnand %p3381_p8, %p3375_p5 }
  0x33   :  { %3385 = shalt.err (!%p3382_p9)
}
  0x34   :  { %s3445_s0 = smov 128   ;;  %s3446_s20 = smov 8  }
  0x35   :  { %52 = dma.hbm_to_vmem [thread:$0]  %s6342_s2, 512, %s47_s11, [#allocation6], %s3445_s0, %s3445_s0, %s3446_s20  }
  0x36   :  { %s3447_s23 = smov [#allocation8]   ;;  %s3386_s27 = scalar_lea.hbm %s6346_s6, 1536 }
  0x37   :  { %s64_s24 = sshll.u32 %s3447_s23, 4  ;;  %p3387_p10 = scmp.ne.s32.totalorder %s6346_s6, %s3386_s27  ;;  %s65_s24 = int_to_ptr.vmem [resolvable:$true] %s64_s24 }
  0x38   :  { %p3390_p11 = scmp.lt.u32.totalorder %s3386_s27, %s6346_s6 }
  0x3a   :  { %p3392_p12 = pnand %p3390_p11, %p3387_p10 }
  0x3c   :  { %3395 = shalt.err (!%p3392_p12)
}
  0x3d   :  { %s3396_s12 = scalar_lea.vmem %s65_s24, 1536  ;;  %p3401_p0 = scmp.lt.s32.totalorder %s65_s24, %s65_s24 }
  0x3e   :  { %p3397_p13 = scmp.ne.s32.totalorder %s65_s24, %s3396_s12  ;;  %p3402_p1 = scmp.lt.s32.totalorder %s3396_s12, %s3396_s12 }
  0x40   :  { %p3403_p2 = por %p3402_p1, %p3401_p0 }
  0x42   :  { %p3404_p3 = pnand %p3403_p2, %p3397_p13 }
  0x44   :  { %3407 = shalt.err (!%p3404_p3)
}
  0x45   :  { %s3448_s2 = smov 384   ;;  %s3449_s11 = smov 24  }
  0x46   :  { %70 = dma.hbm_to_vmem [thread:$0]  %s6346_s6, 1536, %s65_s24, [#allocation9], %s3448_s2, %s3448_s2, %s3449_s11  }
  0x47   :  { %3430 = dma.done.wait [#allocation3], 4096  }
  0x48   :  { %3431 = vsyncadd [#allocation3], 4294963200 }
  0x49   :  { %3432 = dma.done.wait [#allocation6], 1536  }
  0x4a   :  { %3433 = vsyncadd [#allocation6], 4294965760 }
  0x4b   :  { %3434 = dma.done.wait [#allocation9], 1536  }
  0x4c   :  { %3435 = vsyncadd [#allocation9], 4294965760  ;;  %v6349_v0 = vmov 0.0   ;;  %v3451_v1 = vmov 0   ;;  %v86_v2 = vld [vmem:[#allocation2 + $0x8] sm:$0xff]  ;;  %v88_v3 = vld [vmem:[#allocation2 + $0x18] sm:$0xff] }
  0x4d   :  { %223 = vmatprep.mubr.f32.mxu0 %v6349_v0  ;;  %312 = vmatprep.mubr.f32.mxu1 %v6349_v0  ;;  %v103_v4 = vld [vmem:[#allocation2 + $0x88] sm:$0xff]  ;;  %v2716_v5 = vpack.c.bf16 %v88_v3, %v86_v2  ;;  %v105_v6 = vld [vmem:[#allocation2 + $0x98] sm:$0xff]  ;;  %v85_v7 = vld [vmem:[#allocation2] sm:$0xff]  ;;  %vm146_vm0 = vcmask 523264   ;;  %s3453_s21 = smov 15   ;;  %s3454_s22 = smov 1  }
  0x4e   :  { %3122 = vset.pattern.permute.xlu0 %v3451_v1  ;;  %3123 = vset.pattern.permute.xlu1 %v3451_v1  ;;  %v87_v8 = vld [vmem:[#allocation2 + $0x10] sm:$0xff]  ;;  %v2732_v9 = vpack.c.bf16 %v105_v6, %v103_v4  ;;  %v102_v11 = vld [vmem:[#allocation2 + $0x80] sm:$0xff]  ;;  %v90_v13 = vld [vmem:[#allocation2 + $0x28] sm:$0xff]  ;;  %s3455_s23 = smov 127   ;;  %s3456_s24 = smov 113   ;;  %vm1143_vm9 = vcmask 261120  }
  0x4f   :  { %v2718_v10 = vpack.c.bf16 %v87_v8, %v85_v7  ;;  %v104_v12 = vld [vmem:[#allocation2 + $0x90] sm:$0xff]  ;;  %2717 = vmatprep.subr.bf16.mxu0 %v2716_v5  ;;  %v92_v15 = vld [vmem:[#allocation2 + $0x38] sm:$0xff]  ;;  %v107_v16 = vld [vmem:[#allocation2 + $0xa8] sm:$0xff]  ;;  %s3457_s25 = smov 112   ;;  %s3458_s26 = smov 111  }
  0x50   :  { %v2734_v14 = vpack.c.bf16 %v104_v12, %v102_v11  ;;  %v109_v17 = vld [vmem:[#allocation2 + $0xb8] sm:$0xff]  ;;  %2733 = vmatprep.subr.bf16.mxu1 %v2732_v9  ;;  %v2720_v18 = vpack.c.bf16 %v92_v15, %v90_v13  ;;  %v89_v20 = vld [vmem:[#allocation2 + $0x20] sm:$0xff]  ;;  %v91_v21 = vld [vmem:[#allocation2 + $0x30] sm:$0xff] }
  0x51   :  { %2719 = vmatpush1.bf16.msra.mxu0 %v2718_v10  ;;  %v2736_v19 = vpack.c.bf16 %v109_v17, %v107_v16  ;;  %v106_v22 = vld [vmem:[#allocation2 + $0xa0] sm:$0xff]  ;;  %v2722_v23 = vpack.c.bf16 %v91_v21, %v89_v20  ;;  %v108_v24 = vld [vmem:[#allocation2 + $0xb0] sm:$0xff]  ;;  %v94_v25 = vld [vmem:[#allocation2 + $0x48] sm:$0xff] }
  0x52   :  { %2735 = vmatpush1.bf16.msra.mxu1 %v2734_v14  ;;  %v96_v26 = vld [vmem:[#allocation2 + $0x58] sm:$0xff]  ;;  %2721 = vmatprep.subr.bf16.mxu0 %v2720_v18  ;;  %v2738_v27 = vpack.c.bf16 %v108_v24, %v106_v22  ;;  %v111_v29 = vld [vmem:[#allocation2 + $0xc8] sm:$0xff]  ;;  %v93_v31 = vld [vmem:[#allocation2 + $0x40] sm:$0xff] }
  0x53   :  { %2737 = vmatprep.subr.bf16.mxu1 %v2736_v19  ;;  %v2724_v28 = vpack.c.bf16 %v96_v26, %v94_v25  ;;  %v113_v30 = vld [vmem:[#allocation2 + $0xd8] sm:$0xff]  ;;  %v95_v33 = vld [vmem:[#allocation2 + $0x50] sm:$0xff]  ;;  %v110_v34 = vld [vmem:[#allocation2 + $0xc0] sm:$0xff] }
  0x54   :  { %v2740_v32 = vpack.c.bf16 %v113_v30, %v111_v29  ;;  %v112_v35 = vld [vmem:[#allocation2 + $0xd0] sm:$0xff]  ;;  %v2726_v36 = vpack.c.bf16 %v95_v33, %v93_v31  ;;  %v98_v37 = vld [vmem:[#allocation2 + $0x68] sm:$0xff]  ;;  %v100_v38 = vld [vmem:[#allocation2 + $0x78] sm:$0xff] }
  0x55   :  { %2723 = vmatpush1.bf16.msra.mxu0 %v2722_v23  ;;  %v115_v39 = vld [vmem:[#allocation2 + $0xe8] sm:$0xff]  ;;  %v2742_v40 = vpack.c.bf16 %v112_v35, %v110_v34  ;;  %v2728_v41 = vpack.c.bf16 %v100_v38, %v98_v37  ;;  %v117_v42 = vld [vmem:[#allocation2 + $0xf8] sm:$0xff]  ;;  %v97_v43 = vld [vmem:[#allocation2 + $0x60] sm:$0xff] }
  0x56   :  { %2739 = vmatpush1.bf16.msra.mxu1 %v2738_v27  ;;  %2725 = vmatprep.subr.bf16.mxu0 %v2724_v28  ;;  %v99_v44 = vld [vmem:[#allocation2 + $0x70] sm:$0xff]  ;;  %v2744_v45 = vpack.c.bf16 %v117_v42, %v115_v39  ;;  %v114_v46 = vld [vmem:[#allocation2 + $0xe0] sm:$0xff]  ;;  %v123_v52 = vld [vmem:[%s6343_s3 + $0x8] sm:$0xff] }
  0x57   :  { %2741 = vmatprep.subr.bf16.mxu1 %v2740_v32  ;;  %v116_v47 = vld [vmem:[#allocation2 + $0xf0] sm:$0xff]  ;;  %v122_v48 = vld [vmem:[%s6343_s3] sm:$0xff]  ;;  %v2730_v49 = vpack.c.bf16 %v99_v44, %v97_v43  ;;  %v125_v53 = vld [vmem:[%s6343_s3 + $0x18] sm:$0xff] }
  0x58   :  { %128 = vperm.xlu0 %3122, %v122_v48   ;;  %v124_v50 = vld [vmem:[%s6343_s3 + $0x10] sm:$0xff]  ;;  %v2746_v51 = vpack.c.bf16 %v116_v47, %v114_v46  ;;  %v118_v54 = vld [vmem:[#allocation7] sm:$0xff]  ;;  %v119_v55 = vld [vmem:[#allocation7 + $0x8] sm:$0xff]  ;;  %s3452_s3 = smov 17  }
  0x59   :  { %2727 = vmatpush1.bf16.msra.mxu0 %v2726_v36  ;;  %138 = vperm.xlu1 %3123, %v124_v50   ;;  %v120_v56 = vld [vmem:[#allocation7 + $0x10] sm:$0xff]  ;;  %v121_v57 = vld [vmem:[#allocation7 + $0x18] sm:$0xff] }
  0x5a   :  { %2743 = vmatpush1.bf16.msra.mxu1 %v2742_v40  ;;  %2729 = vmatprep.subr.bf16.mxu0 %v2728_v41 }
  0x5b   :  { %2745 = vmatprep.subr.bf16.mxu1 %v2744_v45 }
  0x5c   :  { %133 = vperm.xlu0 %3122, %v123_v52  }
  0x5d   :  { %2731 = vmatpush1.bf16.msra.mxu0 %v2730_v49  ;;  %143 = vperm.xlu1 %3123, %v125_v53  }
  0x5e   :  { %2747 = vmatpush1.bf16.msra.mxu1 %v2746_v51 }
  0x60   :  { %2688 = vmatmul.mubr.msk.f32.vlgmr.msra.gmra.mrb[0].mxu0 %vm146_vm0, %v118_v54 }
  0x61   :  { %2692 = vmatmul.mubr.msk.f32.vlgmr.msra.gmra.mrb[0].mxu1 %vm146_vm0, %v118_v54  ;;  %229 = vmatprep.mubr.f32.mxu0 %v6349_v0 }
  0x62   :  { %318 = vmatprep.mubr.f32.mxu1 %v6349_v0 }
  0x64   :  { %2689 = vmatmul.mubr.msk.f32.gmra.mrb[2].mxu0 %vm146_vm0, %v119_v55 }
  0x65   :  { %2693 = vmatmul.mubr.msk.f32.gmra.mrb[2].mxu1 %vm146_vm0, %v119_v55  ;;  %235 = vmatprep.mubr.f32.mxu0 %v6349_v0 }
  0x66   :  { %324 = vmatprep.mubr.f32.mxu1 %v6349_v0 }
  0x68   :  { %2690 = vmatmul.mubr.msk.f32.gmra.mrb[4].mxu0 %vm146_vm0, %v120_v56 }
  0x69   :  { %2694 = vmatmul.mubr.msk.f32.gmra.mrb[4].mxu1 %vm146_vm0, %v120_v56  ;;  %241 = vmatprep.mubr.f32.mxu0 %v6349_v0 }
  0x6a   :  { %330 = vmatprep.mubr.f32.mxu1 %v6349_v0 }
  0x6c   :  { %2691 = vmatmul.mubr.msk.f32.gmra.mrb[6].mxu0 %vm146_vm0, %v121_v57 }
  0x6d   :  { %2695 = vmatmul.mubr.msk.f32.gmra.mrb[6].mxu1 %vm146_vm0, %v121_v57 }
  0xd7   :  { %v3584_v58 = vpop.permute.xlu0 %128 }
  0xdb   :  { %v3588_v3 = vpop.permute.xlu0 %133 }
 0x133   :  { %v225_v59 = vpop.f32.mrb[0].mxu0 }
 0x134   :  { %v226_v60 = vadd.f32 %v225_v59, %v3584_v58  ;;  %v314_v61 = vpop.f32.mrb[0].mxu1  ;;  %v227_v62 = vpop.f32.mrb[1].mxu0 }
 0x135   :  { %v315_v63 = vadd.f32 %v314_v61, %v3584_v58  ;;  %v316_v1 = vpop.f32.mrb[1].mxu1  ;;  %v3633_v42 = vadd.f32 %v227_v62, %v3584_v58  ;;  %v6351_v61 = vlaneseq }
 0x136   :  { %v337_v2 = vsub.f32 0.0, %v226_v60  ;;  %v3640_v43 = vadd.f32 %v316_v1, %v3584_v58 }
 0x137   :  { %v339_v4 = vsub.f32 0.0, %v315_v63  ;;  %v231_v5 = vpop.f32.mrb[2].mxu0  ;;  %v338_v44 = vsub.f32 0.0, %v3633_v42 }
 0x138   :  { %v353_v6 = vmul.f32 1.442695, %v337_v2  ;;  %v232_v7 = vadd.f32 %v231_v5, %v3588_v3  ;;  %v320_v8 = vpop.f32.mrb[2].mxu1  ;;  %v233_v9 = vpop.f32.mrb[3].mxu0  ;;  %v340_v46 = vsub.f32 0.0, %v3640_v43 }
 0x139   :  { %v357_v10 = vmul.f32 1.442695, %v339_v4  ;;  %v321_v11 = vadd.f32 %v320_v8, %v3588_v3  ;;  %v322_v12 = vpop.f32.mrb[3].mxu1  ;;  %v3644_v45 = vadd.f32 %v233_v9, %v3588_v3  ;;  %v355_v47 = vmul.f32 1.442695, %v338_v44  ;;  %v3694_v4 = vld [vmem:[#allocation5 + $0x10] sm:$0xff] }
 0x13a   :  { %3124 = vpow2.f32 %v353_v6  ;;  %v341_v13 = vsub.f32 0.0, %v232_v7  ;;  %v3653_v49 = vadd.f32 %v322_v12, %v3588_v3  ;;  %v359_v50 = vmul.f32 1.442695, %v340_v46  ;;  %v3692_v3 = vld [vmem:[#allocation5 + $0x8] sm:$0xff] }
 0x13b   :  { %3126 = vpow2.f32 %v357_v10  ;;  %v343_v14 = vsub.f32 0.0, %v321_v11  ;;  %v3592_v15 = vpop.f32.mrb[4].mxu0  ;;  %v342_v48 = vsub.f32 0.0, %v3644_v45  ;;  %v3709_v10 = vld [vmem:[#allocation5] sm:$0xff] }
 0x13c   :  { %v361_v16 = vmul.f32 1.442695, %v341_v13  ;;  %v3594_v17 = vpop.f32.mrb[4].mxu1  ;;  %v3596_v18 = vpop.f32.mrb[5].mxu0  ;;  %v344_v52 = vsub.f32 0.0, %v3653_v49 }
 0x13d   :  { %v365_v19 = vmul.f32 1.442695, %v343_v14  ;;  %v3598_v20 = vpop.f32.mrb[5].mxu1  ;;  %v363_v51 = vmul.f32 1.442695, %v342_v48 }
 0x13e   :  { %3128 = vpow2.f32 %v361_v16  ;;  %v367_v53 = vmul.f32 1.442695, %v344_v52 }
 0x13f   :  { %3130 = vpow2.f32 %v365_v19  ;;  %v3600_v21 = vpop.f32.mrb[6].mxu0 }
 0x140   :  { %v3602_v22 = vpop.f32.mrb[6].mxu1  ;;  %v3604_v23 = vpop.f32.mrb[7].mxu0 }
 0x141   :  { %v3606_v24 = vpop.f32.mrb[7].mxu1 }
 0x144   :  { %v3125_v25 = vpop.eup %3124 }
 0x145   :  { %v3127_v26 = vpop.eup %3126  ;;  %v385_v27 = vadd.f32 1.0, %v3125_v25 }
 0x146   :  { %v387_v28 = vadd.f32 1.0, %v3127_v26 }
 0x147   :  { %3132 = vrcp.f32 %v385_v27 }
 0x148   :  { %v3129_v29 = vpop.eup %3128  ;;  %3134 = vrcp.f32 %v387_v28 }
 0x149   :  { %v3131_v30 = vpop.eup %3130  ;;  %v389_v31 = vadd.f32 1.0, %v3129_v29 }
 0x14a   :  { %v391_v32 = vadd.f32 1.0, %v3131_v30 }
 0x14b   :  { %3136 = vrcp.f32 %v389_v31 }
 0x14c   :  { %3138 = vrcp.f32 %v391_v32  ;;  %v3754_v32 = vpop.permute.xlu1 %138 }
 0x14d   :  { %3140 = vpow2.f32 %v355_v47 }
 0x14e   :  { %3142 = vpow2.f32 %v359_v50 }
 0x14f   :  { %3144 = vpow2.f32 %v363_v51 }
 0x150   :  { %3146 = vpow2.f32 %v367_v53 }
 0x151   :  { %v3133_v33 = vpop.eup %3132 }
 0x152   :  { %v3608_v34 = vmul.f32 %v3133_v33, %v226_v60  ;;  %v3135_v35 = vpop.eup %3134 }
 0x153   :  { %v3612_v37 = vmul.f32 %v3135_v35, %v315_v63  ;;  %v3689_v63 = vshrl.u32 %v6351_v61, 7 }
 0x154   :  { %6523 = vst [vmem:[#allocation15_spill] sm:$0xff] %v3608_v34  ;;  %457 = vrot.lane.b32.xlu0 %v3608_v34, %s3452_s3 }
 0x155   :  { %v3137_v36 = vpop.eup %3136  ;;  %v591_v1 = vsub.s32 1, %v3689_v63  ;;  %v672_v19 = vsub.s32 2, %v3689_v63  ;;  %v753_v31 = vsub.s32 3, %v3689_v63  ;;  %v834_v44 = vsub.s32 5, %v3689_v63 }
 0x156   :  { %v3614_v38 = vmul.f32 %v3137_v36, %v232_v7  ;;  %v3139_v39 = vpop.eup %3138  ;;  %v3768_v36 = vadd.f32 %v3592_v15, %v3754_v32  ;;  %v3786_v15 = vadd.f32 %v3594_v17, %v3754_v32  ;;  %v915_v53 = vsub.s32 6, %v3689_v63 }
 0x157   :  { %v3622_v41 = vmul.f32 %v3139_v39, %v321_v11  ;;  %v3141_v54 = vpop.eup %3140  ;;  %v3701_v5 = vrot.slane %v3692_v3, %v591_v1  ;;  %v3704_v6 = vrot.slane %v3694_v4, %v591_v1  ;;  %v3711_v11 = vld [vmem:[#allocation5 + $0x18] sm:$0xff]  ;;  %v3718_v12 = vrot.slane %v3709_v10, %v591_v1 }
 0x158   :  { %6524 = vst [vmem:[#allocation16_spill] sm:$0xff] %v3614_v38  ;;  %459 = vrot.lane.b32.xlu1 %v3614_v38, %s3452_s3  ;;  %473 = vrot.lane.b32.xlu0 %v3612_v37, %s3452_s3  ;;  %v3143_v55 = vpop.eup %3142  ;;  %v386_v56 = vadd.f32 1.0, %v3141_v54  ;;  %v3721_v13 = vrot.slane %v3711_v11, %v591_v1  ;;  %v3735_v26 = vrot.slane %v3692_v3, %v672_v19  ;;  %v347_v17 = vsub.f32 0.0, %v3786_v15 }
 0x159   :  { %v3145_v57 = vpop.eup %3144  ;;  %v388_v58 = vadd.f32 1.0, %v3143_v55  ;;  %v3738_v27 = vrot.slane %v3694_v4, %v672_v19  ;;  %v3748_v29 = vrot.slane %v3709_v10, %v672_v19  ;;  %v3751_v30 = vrot.slane %v3711_v11, %v672_v19 }
 0x15a   :  { %3148 = vrcp.f32 %v386_v56  ;;  %v390_v59 = vadd.f32 1.0, %v3145_v57  ;;  %v3147_v60 = vpop.eup %3146  ;;  %v3761_v33 = vrot.slane %v3692_v3, %v753_v31  ;;  %v3764_v35 = vrot.slane %v3694_v4, %v753_v31 }
 0x15b   :  { %3150 = vrcp.f32 %v388_v58  ;;  %v392_v62 = vadd.f32 1.0, %v3147_v60  ;;  %v3775_v39 = vrot.slane %v3709_v10, %v753_v31  ;;  %v3797_v47 = vrot.slane %v3709_v10, %v834_v44 }
 0x15c   :  { %475 = vrot.lane.b32.xlu1 %v3622_v41, %s3452_s3  ;;  %540 = vrot.lane.b32.xlu0 %v3608_v34, %s3443_s28  ;;  %3152 = vrcp.f32 %v390_v59  ;;  %6525 = vst [vmem:[#allocation17_spill] sm:$0xff] %v3761_v33  ;;  %6526 = vst [vmem:[#allocation18_spill] sm:$0xff] %v3764_v35  ;;  %v3800_v48 = vrot.slane %v3692_v3, %v834_v44  ;;  %v3813_v51 = vrot.slane %v3694_v4, %v834_v44 }
 0x15d   :  { %3154 = vrcp.f32 %v392_v62  ;;  %6527 = vst [vmem:[#allocation19_spill] sm:$0xff] %v3775_v39  ;;  %6529 = vst [vmem:[#allocation21_spill] sm:$0xff] %v3797_v47  ;;  %v3816_v52 = vrot.slane %v3711_v11, %v834_v44  ;;  %v373_v54 = vmul.f32 1.442695, %v347_v17  ;;  %v3825_v56 = vrot.slane %v3709_v10, %v915_v53 }
 0x15e   :  { %6530 = vst [vmem:[#allocation22_spill] sm:$0xff] %v3800_v48  ;;  %6531 = vst [vmem:[#allocation23_spill] sm:$0xff] %v3813_v51  ;;  %v3828_v57 = vrot.slane %v3692_v3, %v915_v53  ;;  %v3835_v59 = vrot.slane %v3694_v4, %v915_v53  ;;  %v3838_v60 = vrot.slane %v3711_v11, %v915_v53  ;;  %v996_v62 = vsub.s32 7, %v3689_v63 }
 0x15f   :  { %6532 = vst [vmem:[#allocation24_spill] sm:$0xff] %v3816_v52  ;;  %6533 = vst [vmem:[#allocation25_spill] sm:$0xff] %v3825_v56 }
 0x160   :  { %542 = vrot.lane.b32.xlu1 %v3614_v38, %s3443_s28  ;;  %556 = vrot.lane.b32.xlu0 %v3612_v37, %s3443_s28  ;;  %6534 = vst [vmem:[#allocation26_spill] sm:$0xff] %v3828_v57  ;;  %6535 = vst [vmem:[#allocation27_spill] sm:$0xff] %v3835_v59  ;;  %v3846_v1 = vrot.slane %v3709_v10, %v996_v62  ;;  %v3859_v19 = vrot.slane %v3711_v11, %v996_v62 }
 0x161   :  { %6536 = vst [vmem:[#allocation28_spill] sm:$0xff] %v3838_v60 }
 0x162   :  { %6537 = vst [vmem:[#allocation29_spill] sm:$0xff] %v3846_v1  ;;  %6540 = vst [vmem:[#allocation32_spill] sm:$0xff] %v3859_v19 }
 0x164   :  { %558 = vrot.lane.b32.xlu1 %v3622_v41, %s3443_s28  ;;  %621 = vrot.lane.b32.xlu0 %v3608_v34, %s3453_s21  ;;  %v3149_v2 = vpop.eup %3148 }
 0x165   :  { %v3151_v7 = vpop.eup %3150  ;;  %v3707_v8 = vmul.f32 %v3149_v2, %v3633_v42  ;;  %v3778_v42 = vrot.slane %v3711_v11, %v753_v31  ;;  %v3849_v2 = vrot.slane %v3692_v3, %v996_v62 }
 0x166   :  { %v3153_v9 = vpop.eup %3152  ;;  %v3724_v14 = vmul.f32 %v3151_v7, %v3640_v43  ;;  %v3780_v43 = vpop.permute.xlu1 %143 }
 0x167   :  { %v3727_v16 = vmul.f32 %v3153_v9, %v3644_v45  ;;  %v3155_v25 = vpop.eup %3154  ;;  %6528 = vst [vmem:[#allocation20_spill] sm:$0xff] %v3778_v42  ;;  %v345_v45 = vsub.f32 0.0, %v3768_v36  ;;  %v3790_v46 = vadd.f32 %v3600_v21, %v3780_v43  ;;  %v3805_v50 = vadd.f32 %v3602_v22, %v3780_v43  ;;  %6538 = vst [vmem:[#allocation30_spill] sm:$0xff] %v3849_v2 }
 0x168   :  { %623 = vrot.lane.b32.xlu1 %v3614_v38, %s3453_s21  ;;  %637 = vrot.lane.b32.xlu0 %v3612_v37, %s3453_s21  ;;  %v3741_v28 = vmul.f32 %v3155_v25, %v3653_v49  ;;  %v3856_v9 = vrot.slane %v3694_v4, %v996_v62 }
 0x169   :  { %v369_v49 = vmul.f32 1.442695, %v345_v45  ;;  %v349_v21 = vsub.f32 0.0, %v3790_v46  ;;  %v351_v22 = vsub.f32 0.0, %v3805_v50 }
 0x16a   :  { %6539 = vst [vmem:[#allocation31_spill] sm:$0xff] %v3856_v9 }
 0x16b   :  { %3156 = vpow2.f32 %v369_v49  ;;  %v377_v55 = vmul.f32 1.442695, %v349_v21  ;;  %v381_v58 = vmul.f32 1.442695, %v351_v22 }
 0x16c   :  { %639 = vrot.lane.b32.xlu1 %v3622_v41, %s3453_s21  ;;  %702 = vrot.lane.b32.xlu0 %v3608_v34, %s3454_s22  ;;  %3158 = vpow2.f32 %v373_v54 }
 0x16d   :  { %3160 = vpow2.f32 %v377_v55 }
 0x16e   :  { %3162 = vpow2.f32 %v381_v58 }
 0x170   :  { %704 = vrot.lane.b32.xlu1 %v3614_v38, %s3454_s22  ;;  %718 = vrot.lane.b32.xlu0 %v3612_v37, %s3454_s22 }
 0x174   :  { %720 = vrot.lane.b32.xlu1 %v3622_v41, %s3454_s22  ;;  %783 = vrot.lane.b32.xlu0 %v3608_v34, %s3455_s23 }
 0x175   :  { %v3157_v7 = vpop.eup %3156 }
 0x176   :  { %v3159_v25 = vpop.eup %3158  ;;  %v393_v31 = vadd.f32 1.0, %v3157_v7 }
 0x177   :  { %v3161_v44 = vpop.eup %3160  ;;  %v395_v45 = vadd.f32 1.0, %v3159_v25 }
 0x178   :  { %785 = vrot.lane.b32.xlu1 %v3614_v38, %s3455_s23  ;;  %799 = vrot.lane.b32.xlu0 %v3612_v37, %s3455_s23  ;;  %3164 = vrcp.f32 %v393_v31  ;;  %v397_v49 = vadd.f32 1.0, %v3161_v44  ;;  %v3163_v17 = vpop.eup %3162 }
 0x179   :  { %3166 = vrcp.f32 %v395_v45  ;;  %v399_v21 = vadd.f32 1.0, %v3163_v17 }
 0x17a   :  { %3168 = vrcp.f32 %v397_v49 }
 0x17b   :  { %3170 = vrcp.f32 %v399_v21 }
 0x17c   :  { %801 = vrot.lane.b32.xlu1 %v3622_v41, %s3455_s23  ;;  %864 = vrot.lane.b32.xlu0 %v3608_v34, %s3456_s24 }
 0x180   :  { %866 = vrot.lane.b32.xlu1 %v3614_v38, %s3456_s24  ;;  %880 = vrot.lane.b32.xlu0 %v3612_v37, %s3456_s24 }
 0x182   :  { %v3165_v54 = vpop.eup %3164 }
 0x183   :  { %v3167_v22 = vpop.eup %3166  ;;  %v3880_v55 = vmul.f32 %v3165_v54, %v3768_v36  ;;  %v3921_v54 = vadd.f32 %v3596_v18, %v3754_v32  ;;  %v3942_v18 = vadd.f32 %v3598_v20, %v3754_v32 }
 0x184   :  { %882 = vrot.lane.b32.xlu1 %v3622_v41, %s3456_s24  ;;  %945 = vrot.lane.b32.xlu0 %v3608_v34, %s3457_s25  ;;  %v3169_v7 = vpop.eup %3168  ;;  %v3891_v25 = vmul.f32 %v3167_v22, %v3786_v15 }
 0x185   :  { %6541 = vst [vmem:[#allocation33_spill] sm:$0xff] %v3880_v55  ;;  %v3894_v31 = vmul.f32 %v3169_v7, %v3790_v46  ;;  %v3171_v45 = vpop.eup %3170  ;;  %v346_v7 = vsub.f32 0.0, %v3921_v54  ;;  %v348_v20 = vsub.f32 0.0, %v3942_v18 }
 0x186   :  { %6542 = vst [vmem:[#allocation34_spill] sm:$0xff] %v3891_v25  ;;  %v3905_v49 = vmul.f32 %v3171_v45, %v3805_v50  ;;  %v3934_v45 = vadd.f32 %v3604_v23, %v3780_v43  ;;  %v3951_v23 = vadd.f32 %v3606_v24, %v3780_v43 }
 0x187   :  { %v371_v61 = vmul.f32 1.442695, %v346_v7  ;;  %v375_v24 = vmul.f32 1.442695, %v348_v20 }
 0x188   :  { %947 = vrot.lane.b32.xlu1 %v3614_v38, %s3457_s25  ;;  %961 = vrot.lane.b32.xlu0 %v3612_v37, %s3457_s25  ;;  %6543 = vst [vmem:[#allocation35_spill] sm:$0xff] %v3905_v49  ;;  %v350_v19 = vsub.f32 0.0, %v3934_v45  ;;  %v352_v2 = vsub.f32 0.0, %v3951_v23 }
 0x189   :  { %3172 = vpow2.f32 %v371_v61 }
 0x18a   :  { %v379_v7 = vmul.f32 1.442695, %v350_v19  ;;  %v383_v60 = vmul.f32 1.442695, %v352_v2 }
 0x18c   :  { %963 = vrot.lane.b32.xlu1 %v3622_v41, %s3457_s25  ;;  %1026 = vrot.lane.b32.xlu0 %v3608_v34, %s3458_s26  ;;  %3174 = vpow2.f32 %v379_v7 }
 0x18d   :  { %3176 = vpow2.f32 %v375_v24 }
 0x18e   :  { %3178 = vpow2.f32 %v383_v60 }
 0x190   :  { %1028 = vrot.lane.b32.xlu1 %v3614_v38, %s3458_s26  ;;  %465 = vrot.lane.b32.xlu0 %v3707_v8, %s3452_s3 }
 0x193   :  { %v3173_v20 = vpop.eup %3172 }
 0x194   :  { %467 = vrot.lane.b32.xlu1 %v3727_v16, %s3452_s3  ;;  %481 = vrot.lane.b32.xlu0 %v3724_v14, %s3452_s3  ;;  %v394_v24 = vadd.f32 1.0, %v3173_v20 }
 0x196   :  { %v3175_v59 = vpop.eup %3174  ;;  %3180 = vrcp.f32 %v394_v24  ;;  %v6560_v24 = vlaneseq }
 0x197   :  { %v3177_v38 = vpop.eup %3176  ;;  %v398_v57 = vadd.f32 1.0, %v3175_v59 }
 0x198   :  { %483 = vrot.lane.b32.xlu1 %v3741_v28, %s3452_s3  ;;  %548 = vrot.lane.b32.xlu0 %v3707_v8, %s3443_s28  ;;  %v3179_v56 = vpop.eup %3178 }
 0x199   :  { %3182 = vrcp.f32 %v398_v57  ;;  %v400_v20 = vadd.f32 1.0, %v3179_v56  ;;  %v510_v57 = vsub.s32 0, %v3689_v63 }
 0x19c   :  { %550 = vrot.lane.b32.xlu1 %v3727_v16, %s3443_s28  ;;  %564 = vrot.lane.b32.xlu0 %v3724_v14, %s3443_s28 }
 0x1a0   :  { %566 = vrot.lane.b32.xlu1 %v3741_v28, %s3443_s28  ;;  %629 = vrot.lane.b32.xlu0 %v3707_v8, %s3453_s21  ;;  %v3181_v56 = vpop.eup %3180 }
 0x1a4   :  { %631 = vrot.lane.b32.xlu1 %v3727_v16, %s3453_s21  ;;  %645 = vrot.lane.b32.xlu0 %v3724_v14, %s3453_s21 }
 0x1a8   :  { %647 = vrot.lane.b32.xlu1 %v3741_v28, %s3453_s21  ;;  %710 = vrot.lane.b32.xlu0 %v3707_v8, %s3454_s22 }
 0x1ac   :  { %712 = vrot.lane.b32.xlu1 %v3727_v16, %s3454_s22  ;;  %726 = vrot.lane.b32.xlu0 %v3724_v14, %s3454_s22 }
 0x1b0   :  { %728 = vrot.lane.b32.xlu1 %v3741_v28, %s3454_s22  ;;  %791 = vrot.lane.b32.xlu0 %v3707_v8, %s3455_s23 }
 0x1b4   :  { %793 = vrot.lane.b32.xlu1 %v3727_v16, %s3455_s23  ;;  %807 = vrot.lane.b32.xlu0 %v3724_v14, %s3455_s23 }
 0x1b8   :  { %809 = vrot.lane.b32.xlu1 %v3741_v28, %s3455_s23  ;;  %872 = vrot.lane.b32.xlu0 %v3707_v8, %s3456_s24 }
 0x1bc   :  { %874 = vrot.lane.b32.xlu1 %v3727_v16, %s3456_s24  ;;  %888 = vrot.lane.b32.xlu0 %v3724_v14, %s3456_s24 }
 0x1c0   :  { %890 = vrot.lane.b32.xlu1 %v3741_v28, %s3456_s24  ;;  %953 = vrot.lane.b32.xlu0 %v3707_v8, %s3457_s25 }
 0x1c4   :  { %955 = vrot.lane.b32.xlu1 %v3727_v16, %s3457_s25  ;;  %969 = vrot.lane.b32.xlu0 %v3724_v14, %s3457_s25 }
 0x1c6   :  { %v3873_v53 = vpop.permute.xlu0 %457 }
 0x1c8   :  { %971 = vrot.lane.b32.xlu1 %v3741_v28, %s3457_s25  ;;  %1034 = vrot.lane.b32.xlu0 %v3707_v8, %s3458_s26 }
 0x1ca   :  { %v3882_v58 = vpop.permute.xlu1 %459  ;;  %v3884_v62 = vpop.permute.xlu0 %473 }
 0x1cc   :  { %1036 = vrot.lane.b32.xlu1 %v3727_v16, %s3458_s26  ;;  %461 = vrot.lane.b32.xlu0 %v3880_v55, %s3452_s3 }
 0x1ce   :  { %v3896_v44 = vpop.permute.xlu1 %475  ;;  %v3898_v36 = vpop.permute.xlu0 %540 }
 0x1d0   :  { %463 = vrot.lane.b32.xlu1 %v3894_v31, %s3452_s3  ;;  %477 = vrot.lane.b32.xlu0 %v3891_v25, %s3452_s3 }
 0x1d2   :  { %v3907_v17 = vpop.permute.xlu1 %542  ;;  %v3909_v15 = vpop.permute.xlu0 %556 }
 0x1d4   :  { %479 = vrot.lane.b32.xlu1 %v3905_v49, %s3452_s3  ;;  %544 = vrot.lane.b32.xlu0 %v3880_v55, %s3443_s28 }
 0x1d6   :  { %v3915_v46 = vpop.permute.xlu1 %558  ;;  %v3917_v21 = vpop.permute.xlu0 %621 }
 0x1d8   :  { %546 = vrot.lane.b32.xlu1 %v3894_v31, %s3443_s28  ;;  %560 = vrot.lane.b32.xlu0 %v3891_v25, %s3443_s28 }
 0x1da   :  { %v3927_v50 = vpop.permute.xlu1 %623  ;;  %v3929_v22 = vpop.permute.xlu0 %637 }
 0x1dc   :  { %562 = vrot.lane.b32.xlu1 %v3905_v49, %s3443_s28  ;;  %625 = vrot.lane.b32.xlu0 %v3880_v55, %s3453_s21 }
 0x1de   :  { %v3944_v0 = vpop.permute.xlu1 %639  ;;  %v3946_v40 = vpop.permute.xlu0 %702 }
 0x1e0   :  { %627 = vrot.lane.b32.xlu1 %v3894_v31, %s3453_s21  ;;  %641 = vrot.lane.b32.xlu0 %v3891_v25, %s3453_s21 }
 0x1e2   :  { %v3958_v32 = vpop.permute.xlu1 %704  ;;  %v3960_v9 = vpop.permute.xlu0 %718 }
 0x1e3   :  { %6544 = vst [vmem:[#allocation36_spill] sm:$0xff] %v3958_v32  ;;  %6545 = vst [vmem:[#allocation37_spill] sm:$0xff] %v3960_v9 }
 0x1e4   :  { %643 = vrot.lane.b32.xlu1 %v3905_v49, %s3453_s21  ;;  %706 = vrot.lane.b32.xlu0 %v3880_v55, %s3454_s22 }
 0x1e6   :  { %v3967_v43 = vpop.permute.xlu1 %720  ;;  %v3969_v1 = vpop.permute.xlu0 %783 }
 0x1e7   :  { %6546 = vst [vmem:[#allocation38_spill] sm:$0xff] %v3967_v43  ;;  %6547 = vst [vmem:[#allocation39_spill] sm:$0xff] %v3969_v1 }
 0x1e8   :  { %708 = vrot.lane.b32.xlu1 %v3894_v31, %s3454_s22  ;;  %722 = vrot.lane.b32.xlu0 %v3891_v25, %s3454_s22 }
 0x1ea   :  { %v3975_v61 = vpop.permute.xlu1 %785  ;;  %v3977_v19 = vpop.permute.xlu0 %799 }
 0x1eb   :  { %6548 = vst [vmem:[#allocation40_spill] sm:$0xff] %v3975_v61  ;;  %6549 = vst [vmem:[#allocation41_spill] sm:$0xff] %v3977_v19  ;;  %v4055_v19 = vrot.slane %v3709_v10, %v510_v57  ;;  %v4079_v61 = vrot.slane %v3694_v4, %v510_v57 }
 0x1ec   :  { %724 = vrot.lane.b32.xlu1 %v3905_v49, %s3454_s22  ;;  %787 = vrot.lane.b32.xlu0 %v3880_v55, %s3455_s23 }
 0x1ee   :  { %v3983_v2 = vpop.permute.xlu1 %801  ;;  %v3985_v7 = vpop.permute.xlu0 %864 }
 0x1ef   :  { %6550 = vst [vmem:[#allocation42_spill] sm:$0xff] %v3983_v2  ;;  %6551 = vst [vmem:[#allocation43_spill] sm:$0xff] %v3985_v7  ;;  %v396_v7 = vadd.f32 1.0, %v3177_v38 }
 0x1f0   :  { %789 = vrot.lane.b32.xlu1 %v3894_v31, %s3455_s23  ;;  %803 = vrot.lane.b32.xlu0 %v3891_v25, %s3455_s23 }
 0x1f1   :  { %3184 = vrcp.f32 %v396_v7  ;;  %v4028_v7 = vmul.f32 %v3181_v56, %v3921_v54 }
 0x1f2   :  { %v3991_v60 = vpop.permute.xlu1 %866  ;;  %v3993_v34 = vpop.permute.xlu0 %880  ;;  %3186 = vrcp.f32 %v400_v20 }
 0x1f3   :  { %6552 = vst [vmem:[#allocation44_spill] sm:$0xff] %v3991_v60  ;;  %6553 = vst [vmem:[#allocation45_spill] sm:$0xff] %v3993_v34 }
 0x1f4   :  { %805 = vrot.lane.b32.xlu1 %v3905_v49, %s3455_s23  ;;  %868 = vrot.lane.b32.xlu0 %v3880_v55, %s3456_s24 }
 0x1f6   :  { %v3999_v52 = vpop.permute.xlu1 %882  ;;  %v4001_v51 = vpop.permute.xlu0 %945 }
 0x1f7   :  { %6554 = vst [vmem:[#allocation46_spill] sm:$0xff] %v3999_v52  ;;  %6555 = vst [vmem:[#allocation47_spill] sm:$0xff] %v4001_v51  ;;  %v4020_v51 = vand.u32 127, %v6560_v24 }
 0x1f8   :  { %870 = vrot.lane.b32.xlu1 %v3894_v31, %s3456_s24  ;;  %884 = vrot.lane.b32.xlu0 %v3891_v25, %s3456_s24 }
 0x1f9   :  { %vm491_vm1 = vcmp.lt.s32.totalorder %v4020_v51, 17  ;;  %vm572_vm2 = vcmp.lt.s32.totalorder %v4020_v51, 16  ;;  %vm653_vm3 = vcmp.lt.s32.totalorder %v4020_v51, 15  ;;  %vm734_vm4 = vcmp.lt.s32.totalorder %v4020_v51, 1 }
 0x1fa   :  { %v4007_v60 = vpop.permute.xlu1 %947  ;;  %v4009_v34 = vpop.permute.xlu0 %961  ;;  %vm815_vm5 = vcmp.lt.s32.totalorder %v4020_v51, 127  ;;  %vm896_vm6 = vcmp.lt.s32.totalorder %v4020_v51, 113  ;;  %vm977_vm7 = vcmp.lt.s32.totalorder %v4020_v51, 112  ;;  %vm1058_vm8 = vcmp.lt.s32.totalorder %v4020_v51, 111  ;;  %v2138_v51 = vld [vmem:[#allocation8 + $0x10] sm:$0xff] }
 0x1fb   :  { %6556 = vst [vmem:[#allocation48_spill] sm:$0xff] %v4007_v60  ;;  %6557 = vst [vmem:[#allocation49_spill] sm:$0xff] %v4009_v34  ;;  %v4034_v60 = vrot.slane %v3692_v3, %v510_v57 }
 0x1fc   :  { %886 = vrot.lane.b32.xlu1 %v3905_v49, %s3456_s24  ;;  %949 = vrot.lane.b32.xlu0 %v3880_v55, %s3457_s25 }
 0x1fd   :  { %6562 = vst [vmem:[#allocation53_spill] sm:$0xff] %v4034_v60 }
 0x1fe   :  { %v4015_v38 = vpop.permute.xlu1 %963  ;;  %v4017_v59 = vpop.permute.xlu0 %1026 }
 0x1ff   :  { %6558 = vst [vmem:[#allocation50_spill] sm:$0xff] %v4015_v38  ;;  %6559 = vst [vmem:[#allocation51_spill] sm:$0xff] %v4017_v59  ;;  %v3183_v38 = vpop.eup %3182 }
 0x200   :  { %951 = vrot.lane.b32.xlu1 %v3894_v31, %s3457_s25  ;;  %965 = vrot.lane.b32.xlu0 %v3891_v25, %s3457_s25  ;;  %v3185_v24 = vpop.eup %3184  ;;  %v4044_v54 = vmul.f32 %v3183_v38, %v3934_v45  ;;  %v4058_v45 = vrot.slane %v3711_v11, %v510_v57 }
 0x201   :  { %v3187_v34 = vpop.eup %3186  ;;  %v4047_v52 = vmul.f32 %v3185_v24, %v3942_v18 }
 0x202   :  { %v4030_v20 = vpop.permute.xlu1 %1028  ;;  %v466_v59 = vpop.permute.xlu0 %465  ;;  %v4071_v10 = vmul.f32 %v3187_v34, %v3951_v23 }
 0x203   :  { %6561 = vst [vmem:[#allocation52_spill] sm:$0xff] %v4030_v20  ;;  %v500_v63 = vsel %vm491_vm1, %v3873_v53, %v466_v59 }
 0x204   :  { %967 = vrot.lane.b32.xlu1 %v3905_v49, %s3457_s25  ;;  %469 = vrot.lane.b32.xlu0 %v4028_v7, %s3452_s3  ;;  %v525_v48 = vmul.f32 %v4034_v60, %v500_v63 }
 0x206   :  { %v468_v56 = vpop.permute.xlu1 %467  ;;  %v482_v20 = vpop.permute.xlu0 %481 }
 0x207   :  { %v501_v3 = vsel %vm491_vm1, %v3882_v58, %v468_v56  ;;  %v492_v18 = vsel %vm491_vm1, %v3884_v62, %v482_v20  ;;  %v504_v38 = vsel %vm491_vm1, %v482_v20, %v3873_v53  ;;  %v497_v11 = vsel %vm491_vm1, %v468_v56, %v3896_v44 }
 0x208   :  { %v529_v47 = vmul.f32 %v4034_v60, %v501_v3  ;;  %471 = vrot.lane.b32.xlu1 %v4044_v54, %s3452_s3  ;;  %485 = vrot.lane.b32.xlu0 %v4047_v52, %s3452_s3  ;;  %v496_v53 = vsel %vm491_vm1, %v466_v59, %v3884_v62  ;;  %v524_v20 = vmul.f32 %v4055_v19, %v504_v38 }
 0x209   :  { %v527_v56 = vmul.f32 %v4058_v45, %v492_v18  ;;  %v526_v57 = vmul.f32 %v4079_v61, %v496_v53 }
 0x20a   :  { %v484_v24 = vpop.permute.xlu1 %483  ;;  %v4076_v63 = vpop.permute.xlu0 %548  ;;  %v2748_v3 = vpack.c.bf16 %v529_v47, %v525_v48  ;;  %v530_v48 = vmul.f32 %v4079_v61, %v497_v11 }
 0x20b   :  { %v493_v34 = vsel %vm491_vm1, %v3896_v44, %v484_v24  ;;  %v505_v23 = vsel %vm491_vm1, %v484_v24, %v3882_v58 }
 0x20c   :  { %v528_v47 = vmul.f32 %v4055_v19, %v505_v23  ;;  %v531_v4 = vmul.f32 %v4058_v45, %v493_v34  ;;  %487 = vrot.lane.b32.xlu1 %v4071_v10, %s3452_s3  ;;  %552 = vrot.lane.b32.xlu0 %v4028_v7, %s3443_s28  ;;  %v2822_v18 = vpack.c.bf16 %v530_v48, %v526_v57 }
 0x20d   :  { %2749 = vmatprep.subr.bf16.mxu0 %v2748_v3 }
 0x20e   :  { %v2750_v62 = vpack.c.bf16 %v528_v47, %v524_v20  ;;  %v4099_v44 = vpop.permute.xlu1 %550  ;;  %v4101_v58 = vpop.permute.xlu0 %564  ;;  %v2820_v59 = vpack.c.bf16 %v531_v4, %v527_v56 }
 0x210   :  { %554 = vrot.lane.b32.xlu1 %v4044_v54, %s3443_s28  ;;  %568 = vrot.lane.b32.xlu0 %v4047_v52, %s3443_s28 }
 0x211   :  { %2751 = vmatpush1.bf16.msra.mxu0 %v2750_v62  ;;  %2821 = vmatprep.subr.bf16.mxu1 %v2820_v59 }
 0x212   :  { %v4108_v38 = vpop.permute.xlu1 %566  ;;  %v4110_v11 = vpop.permute.xlu0 %629  ;;  %2823 = vmatpush1.bf16.msra.mxu1 %v2822_v18 }
 0x214   :  { %570 = vrot.lane.b32.xlu1 %v4071_v10, %s3443_s28  ;;  %633 = vrot.lane.b32.xlu0 %v4028_v7, %s3453_s21 }
 0x216   :  { %v4116_v24 = vpop.permute.xlu1 %631  ;;  %v4118_v3 = vpop.permute.xlu0 %645 }
 0x218   :  { %635 = vrot.lane.b32.xlu1 %v4044_v54, %s3453_s21  ;;  %649 = vrot.lane.b32.xlu0 %v4047_v52, %s3453_s21 }
 0x21a   :  { %v4124_v53 = vpop.permute.xlu1 %647  ;;  %v4126_v34 = vpop.permute.xlu0 %710 }
 0x21c   :  { %651 = vrot.lane.b32.xlu1 %v4071_v10, %s3453_s21  ;;  %714 = vrot.lane.b32.xlu0 %v4028_v7, %s3454_s22 }
 0x21e   :  { %v4132_v23 = vpop.permute.xlu1 %712  ;;  %v4134_v20 = vpop.permute.xlu0 %726 }
 0x21f   :  { %6563 = vst [vmem:[#allocation54_spill] sm:$0xff] %v4132_v23  ;;  %6564 = vst [vmem:[#allocation55_spill] sm:$0xff] %v4134_v20  ;;  %v1120_v20 = vld [vmem:[%s6345_s5 + $0x8] sm:$0xff] }
 0x220   :  { %716 = vrot.lane.b32.xlu1 %v4044_v54, %s3454_s22  ;;  %730 = vrot.lane.b32.xlu0 %v4047_v52, %s3454_s22 }
 0x222   :  { %v4140_v56 = vpop.permute.xlu1 %728  ;;  %v4142_v47 = vpop.permute.xlu0 %791 }
 0x223   :  { %6565 = vst [vmem:[#allocation56_spill] sm:$0xff] %v4140_v56  ;;  %6566 = vst [vmem:[#allocation57_spill] sm:$0xff] %v4142_v47  ;;  %v1119_v56 = vld [vmem:[%s6345_s5] sm:$0xff] }
 0x224   :  { %732 = vrot.lane.b32.xlu1 %v4071_v10, %s3454_s22  ;;  %1042 = vrot.lane.b32.xlu0 %v3612_v37, %s3458_s26 }
 0x226   :  { %v4148_v4 = vpop.permute.xlu1 %793  ;;  %v4150_v48 = vpop.permute.xlu0 %807 }
 0x227   :  { %6567 = vst [vmem:[#allocation58_spill] sm:$0xff] %v4148_v4  ;;  %6568 = vst [vmem:[#allocation59_spill] sm:$0xff] %v4150_v48 }
 0x228   :  { %1044 = vrot.lane.b32.xlu1 %v3622_v41, %s3458_s26  ;;  %795 = vrot.lane.b32.xlu0 %v4028_v7, %s3455_s23 }
 0x22a   :  { %v4156_v62 = vpop.permute.xlu1 %809  ;;  %v4158_v59 = vpop.permute.xlu0 %872 }
 0x22b   :  { %6569 = vst [vmem:[#allocation60_spill] sm:$0xff] %v4156_v62  ;;  %6570 = vst [vmem:[#allocation61_spill] sm:$0xff] %v4158_v59 }
 0x22c   :  { %1052 = vrot.lane.b32.xlu1 %v3741_v28, %s3458_s26  ;;  %811 = vrot.lane.b32.xlu0 %v4047_v52, %s3455_s23 }
 0x22e   :  { %v4164_v57 = vpop.permute.xlu1 %874  ;;  %v4166_v18 = vpop.permute.xlu0 %888 }
 0x22f   :  { %6571 = vst [vmem:[#allocation62_spill] sm:$0xff] %v4164_v57  ;;  %6572 = vst [vmem:[#allocation63_spill] sm:$0xff] %v4166_v18 }
 0x230   :  { %797 = vrot.lane.b32.xlu1 %v4044_v54, %s3455_s23  ;;  %876 = vrot.lane.b32.xlu0 %v4028_v7, %s3456_s24 }
 0x232   :  { %v4172_v48 = vpop.permute.xlu1 %890  ;;  %v4174_v62 = vpop.permute.xlu0 %953 }
 0x233   :  { %6573 = vst [vmem:[#allocation64_spill] sm:$0xff] %v4172_v48  ;;  %6574 = vst [vmem:[#allocation65_spill] sm:$0xff] %v4174_v62 }
 0x234   :  { %813 = vrot.lane.b32.xlu1 %v4071_v10, %s3455_s23  ;;  %892 = vrot.lane.b32.xlu0 %v4047_v52, %s3456_s24 }
 0x236   :  { %v4180_v59 = vpop.permute.xlu1 %955  ;;  %v4182_v57 = vpop.permute.xlu0 %969 }
 0x237   :  { %6575 = vst [vmem:[#allocation66_spill] sm:$0xff] %v4180_v59  ;;  %6576 = vst [vmem:[#allocation67_spill] sm:$0xff] %v4182_v57  ;;  %v1108_v57 = vld [vmem:[%s6344_s4 + $0x8] sm:$0xff] }
 0x238   :  { %878 = vrot.lane.b32.xlu1 %v4044_v54, %s3456_s24  ;;  %957 = vrot.lane.b32.xlu0 %v4028_v7, %s3457_s25 }
 0x239   :  { %1220 = vmatprep.mubr.f32.mxu0 %v1108_v57  ;;  %1398 = vmatprep.mubr.f32.mxu1 %v1108_v57 }
 0x23a   :  { %v4188_v18 = vpop.permute.xlu1 %971  ;;  %v4190_v48 = vpop.permute.xlu0 %1034 }
 0x23b   :  { %6577 = vst [vmem:[#allocation68_spill] sm:$0xff] %v4188_v18  ;;  %6578 = vst [vmem:[#allocation69_spill] sm:$0xff] %v4190_v48 }
 0x23c   :  { %894 = vrot.lane.b32.xlu1 %v4071_v10, %s3456_s24  ;;  %973 = vrot.lane.b32.xlu0 %v4047_v52, %s3457_s25 }
 0x23e   :  { %v4196_v62 = vpop.permute.xlu1 %1036  ;;  %v4198_v59 = vpop.permute.xlu0 %461 }
 0x23f   :  { %6579 = vst [vmem:[#allocation70_spill] sm:$0xff] %v4196_v62 }
 0x240   :  { %959 = vrot.lane.b32.xlu1 %v4044_v54, %s3457_s25  ;;  %1050 = vrot.lane.b32.xlu0 %v3724_v14, %s3458_s26 }
 0x242   :  { %v4207_v48 = vpop.permute.xlu1 %463  ;;  %v4209_v18 = vpop.permute.xlu0 %477 }
 0x244   :  { %975 = vrot.lane.b32.xlu1 %v4071_v10, %s3457_s25  ;;  %1030 = vrot.lane.b32.xlu0 %v3880_v55, %s3458_s26  ;;  %v654_v55 = vsel %vm653_vm3, %v3929_v22, %v4118_v3 }
 0x246   :  { %v4215_v62 = vpop.permute.xlu1 %479  ;;  %v4217_v4 = vpop.permute.xlu0 %544 }
 0x248   :  { %1032 = vrot.lane.b32.xlu1 %v3894_v31, %s3458_s26  ;;  %1038 = vrot.lane.b32.xlu0 %v4028_v7, %s3458_s26 }
 0x24a   :  { %v4223_v57 = vpop.permute.xlu1 %546  ;;  %v4225_v2 = vpop.permute.xlu0 %560 }
 0x24c   :  { %1048 = vrot.lane.b32.xlu1 %v3905_v49, %s3458_s26  ;;  %1046 = vrot.lane.b32.xlu0 %v3891_v25, %s3458_s26  ;;  %v663_v25 = vsel %vm653_vm3, %v3927_v50, %v4116_v24 }
 0x24e   :  { %v4231_v1 = vpop.permute.xlu1 %562  ;;  %v4233_v47 = vpop.permute.xlu0 %625 }
 0x24f   :  { %6580 = vst [vmem:[#allocation71_spill] sm:$0xff] %v4233_v47 }
 0x250   :  { %1040 = vrot.lane.b32.xlu1 %v4044_v54, %s3458_s26  ;;  %1054 = vrot.lane.b32.xlu0 %v4047_v52, %s3458_s26 }
 0x252   :  { %v4239_v42 = vpop.permute.xlu1 %627  ;;  %v4241_v39 = vpop.permute.xlu0 %641 }
 0x253   :  { %6581 = vst [vmem:[#allocation72_spill] sm:$0xff] %v4239_v42  ;;  %6582 = vst [vmem:[#allocation73_spill] sm:$0xff] %v4241_v39  ;;  %v1121_v39 = vld [vmem:[%s6345_s5 + $0x10] sm:$0xff]  ;;  %v1122_v42 = vld [vmem:[%s6345_s5 + $0x18] sm:$0xff] }
 0x254   :  { %1056 = vrot.lane.b32.xlu1 %v4071_v10, %s3458_s26  ;;  %1125 = vperm.xlu0 %3122, %v1119_v56  }
 0x256   :  { %v4251_v43 = vpop.permute.xlu1 %643  ;;  %v4253_v32 = vpop.permute.xlu0 %706 }
 0x257   :  { %6583 = vst [vmem:[#allocation74_spill] sm:$0xff] %v4251_v43  ;;  %6584 = vst [vmem:[#allocation75_spill] sm:$0xff] %v4253_v32 }
 0x258   :  { %1130 = vperm.xlu1 %3123, %v1120_v20   ;;  %1135 = vperm.xlu0 %3122, %v1121_v39  }
 0x25a   :  { %v4261_v23 = vpop.permute.xlu1 %708  ;;  %v4263_v56 = vpop.permute.xlu0 %722 }
 0x25b   :  { %6585 = vst [vmem:[#allocation76_spill] sm:$0xff] %v4261_v23  ;;  %6586 = vst [vmem:[#allocation77_spill] sm:$0xff] %v4263_v56 }
 0x25c   :  { %1140 = vperm.xlu1 %3123, %v1122_v42  }
 0x25e   :  { %v4265_v47 = vpop.permute.xlu1 %724  ;;  %v4267_v43 = vpop.permute.xlu0 %787 }
 0x25f   :  { %6587 = vst [vmem:[#allocation78_spill] sm:$0xff] %v4267_v43 }
 0x262   :  { %v4269_v32 = vpop.permute.xlu1 %789  ;;  %v4271_v35 = vpop.permute.xlu0 %803 }
 0x263   :  { %6588 = vst [vmem:[#allocation79_spill] sm:$0xff] %v4269_v32  ;;  %v578_v32 = vsel %vm572_vm2, %v4099_v44, %v3915_v46 }
 0x266   :  { %v4273_v33 = vpop.permute.xlu1 %805  ;;  %v4275_v39 = vpop.permute.xlu0 %868 }
 0x267   :  { %6589 = vst [vmem:[#allocation80_spill] sm:$0xff] %v4273_v33  ;;  %6590 = vst [vmem:[#allocation81_spill] sm:$0xff] %v4275_v39  ;;  %v582_v39 = vsel %vm572_vm2, %v3907_v17, %v4099_v44  ;;  %v577_v44 = vsel %vm572_vm2, %v4076_v63, %v3909_v15 }
 0x26a   :  { %v4277_v20 = vpop.permute.xlu1 %870  ;;  %v4279_v9 = vpop.permute.xlu0 %884 }
 0x26b   :  { %6591 = vst [vmem:[#allocation82_spill] sm:$0xff] %v4277_v20  ;;  %6592 = vst [vmem:[#allocation83_spill] sm:$0xff] %v4279_v9  ;;  %v581_v20 = vsel %vm572_vm2, %v3898_v36, %v4076_v63  ;;  %v585_v9 = vsel %vm572_vm2, %v4101_v58, %v3898_v36 }
 0x26e   :  { %v4281_v23 = vpop.permute.xlu1 %886  ;;  %v4283_v56 = vpop.permute.xlu0 %949 }
 0x26f   :  { %6593 = vst [vmem:[#allocation84_spill] sm:$0xff] %v4281_v23  ;;  %6594 = vst [vmem:[#allocation85_spill] sm:$0xff] %v4283_v56  ;;  %v586_v56 = vsel %vm572_vm2, %v4108_v38, %v3907_v17  ;;  %v574_v17 = vsel %vm572_vm2, %v3915_v46, %v4108_v38  ;;  %v4327_v23 = vmul.f32 %v3704_v6, %v578_v32 }
 0x270   :  { %v573_v38 = vsel %vm572_vm2, %v3909_v15, %v4101_v58  ;;  %v662_v32 = vsel %vm653_vm3, %v3917_v21, %v4110_v11  ;;  %v4354_v46 = vmul.f32 %v3704_v6, %v577_v44  ;;  %v658_v15 = vsel %vm653_vm3, %v4110_v11, %v3929_v22 }
 0x271   :  { %v4365_v58 = vmul.f32 %v3718_v12, %v585_v9  ;;  %v4378_v11 = vmul.f32 %v3735_v26, %v662_v32  ;;  %v4385_v49 = vmul.f32 %v3738_v27, %v658_v15  ;;  %v667_v22 = vsel %vm653_vm3, %v4124_v53, %v3927_v50 }
 0x272   :  { %v4286_v42 = vpop.permute.xlu1 %951  ;;  %v4288_v43 = vpop.permute.xlu0 %965 }
 0x273   :  { %6595 = vst [vmem:[#allocation86_spill] sm:$0xff] %v4286_v42  ;;  %6596 = vst [vmem:[#allocation87_spill] sm:$0xff] %v4288_v43  ;;  %v4324_v43 = vmul.f32 %v3701_v5, %v582_v39  ;;  %v4342_v39 = vmul.f32 %v3718_v12, %v586_v56  ;;  %v4351_v42 = vmul.f32 %v3701_v5, %v581_v20 }
 0x274   :  { %v659_v20 = vsel %vm653_vm3, %v4116_v24, %v3944_v0  ;;  %v666_v24 = vsel %vm653_vm3, %v4118_v3, %v3917_v21 }
 0x275   :  { %v2756_v9 = vpack.c.bf16 %v4324_v43, %v4351_v42 }
 0x276   :  { %v4333_v63 = vpop.permute.xlu1 %967  ;;  %v470_v33 = vpop.permute.xlu0 %469 }
 0x277   :  { %6597 = vst [vmem:[#allocation88_spill] sm:$0xff] %v4333_v63  ;;  %v4357_v63 = vmul.f32 %v3721_v13, %v574_v17  ;;  %v502_v56 = vsel %vm491_vm1, %v4198_v59, %v470_v33  ;;  %v4375_v17 = vmul.f32 %v3721_v13, %v573_v38 }
 0x278   :  { %v533_v44 = vmul.f32 %v4034_v60, %v502_v56 }
 0x279   :  { %v2828_v15 = vpack.c.bf16 %v4357_v63, %v4375_v17  ;;  %v4416_v63 = vmul.f32 %v3738_v27, %v659_v20 }
 0x27a   :  { %v472_v36 = vpop.permute.xlu1 %471  ;;  %v486_v32 = vpop.permute.xlu0 %485 }
 0x27b   :  { %v503_v38 = vsel %vm491_vm1, %v4207_v48, %v472_v36  ;;  %v499_v43 = vsel %vm491_vm1, %v472_v36, %v4215_v62  ;;  %v494_v56 = vsel %vm491_vm1, %v4209_v18, %v486_v32  ;;  %v506_v36 = vsel %vm491_vm1, %v486_v32, %v4198_v59 }
 0x27c   :  { %v537_v42 = vmul.f32 %v4034_v60, %v503_v38  ;;  %v498_v60 = vsel %vm491_vm1, %v470_v33, %v4209_v18  ;;  %v538_v59 = vmul.f32 %v4079_v61, %v499_v43  ;;  %v532_v32 = vmul.f32 %v4055_v19, %v506_v36 }
 0x27d   :  { %v535_v50 = vmul.f32 %v4058_v45, %v494_v56  ;;  %v4441_v33 = vmul.f32 %v3735_v26, %v663_v25  ;;  %v4444_v18 = vmul.f32 %v3748_v29, %v666_v24  ;;  %v655_v43 = vsel %vm653_vm3, %v3944_v0, %v4124_v53 }
 0x27e   :  { %v488_v17 = vpop.permute.xlu1 %487  ;;  %v2752_v38 = vpack.c.bf16 %v537_v42, %v533_v44  ;;  %v553_v3 = vpop.permute.xlu0 %552  ;;  %v534_v56 = vmul.f32 %v4079_v61, %v498_v60  ;;  %v2838_v24 = vpack.c.bf16 %v4416_v63, %v4385_v49 }
 0x27f   :  { %v495_v20 = vsel %vm491_vm1, %v4215_v62, %v488_v17  ;;  %v507_v21 = vsel %vm491_vm1, %v488_v17, %v4207_v48  ;;  %v4447_v62 = vmul.f32 %v3751_v30, %v654_v55  ;;  %v583_v48 = vsel %vm572_vm2, %v4217_v4, %v553_v3 }
 0x280   :  { %v536_v44 = vmul.f32 %v4055_v19, %v507_v21  ;;  %v539_v42 = vmul.f32 %v4058_v45, %v495_v20  ;;  %2753 = vmatprep.subr.bf16.mxu0 %v2752_v38  ;;  %v4460_v55 = vmul.f32 %v3748_v29, %v667_v22  ;;  %v743_v38 = vsel %vm734_vm4, %v3946_v40, %v4126_v34 }
 0x281   :  { %v2826_v60 = vpack.c.bf16 %v538_v59, %v534_v56  ;;  %v614_v20 = vmul.f32 %v3701_v5, %v583_v48  ;;  %v6598_v59 = vld [vmem:[#allocation37_spill] sm:$0xff] }
 0x282   :  { %v2754_v36 = vpack.c.bf16 %v536_v44, %v532_v32  ;;  %v555_v25 = vpop.permute.xlu1 %554  ;;  %v2824_v17 = vpack.c.bf16 %v539_v42, %v535_v50  ;;  %v569_v53 = vpop.permute.xlu0 %568  ;;  %v693_v32 = vmul.f32 %v3751_v30, %v655_v43  ;;  %v739_v42 = vsel %vm734_vm4, %v4126_v34, %v6598_v59  ;;  %v6599_v48 = vld [vmem:[#allocation17_spill] sm:$0xff] }
 0x283   :  { %v584_v0 = vsel %vm572_vm2, %v4223_v57, %v555_v25  ;;  %v580_v21 = vsel %vm572_vm2, %v555_v25, %v4231_v1  ;;  %v575_v50 = vsel %vm572_vm2, %v4225_v2, %v569_v53  ;;  %v587_v44 = vsel %vm572_vm2, %v569_v53, %v4217_v4  ;;  %v6601_v53 = vld [vmem:[#allocation18_spill] sm:$0xff] }
 0x284   :  { %v618_v22 = vmul.f32 %v3701_v5, %v584_v0  ;;  %2755 = vmatpush1.bf16.msra.mxu0 %v2754_v36  ;;  %2825 = vmatprep.subr.bf16.mxu1 %v2824_v17  ;;  %v4486_v56 = vmul.f32 %v6599_v48, %v743_v38  ;;  %v2764_v25 = vpack.c.bf16 %v4441_v33, %v4378_v11 }
 0x285   :  { %2757 = vmatprep.subr.bf16.mxu0 %v2756_v9  ;;  %2827 = vmatpush1.bf16.msra.mxu1 %v2826_v60  ;;  %v579_v4 = vsel %vm572_vm2, %v553_v3, %v4225_v2  ;;  %v619_v9 = vmul.f32 %v3704_v6, %v580_v21  ;;  %v613_v0 = vmul.f32 %v3718_v12, %v587_v44  ;;  %v6603_v21 = vld [vmem:[#allocation54_spill] sm:$0xff] }
 0x286   :  { %v571_v43 = vpop.permute.xlu1 %570  ;;  %v2760_v36 = vpack.c.bf16 %v618_v22, %v614_v20  ;;  %2829 = vmatprep.subr.bf16.mxu1 %v2828_v15  ;;  %v634_v38 = vpop.permute.xlu0 %633  ;;  %v616_v11 = vmul.f32 %v3721_v13, %v575_v50  ;;  %v6600_v3 = vpack.c.bf16 %v4342_v39, %v4365_v58  ;;  %v4510_v60 = vmul.f32 %v6601_v53, %v739_v42  ;;  %v6604_v22 = vld [vmem:[#allocation36_spill] sm:$0xff]  ;;  %v6606_v42 = vld [vmem:[#allocation38_spill] sm:$0xff] }
 0x287   :  { %v576_v17 = vsel %vm572_vm2, %v4231_v1, %v571_v43  ;;  %v588_v34 = vsel %vm572_vm2, %v571_v43, %v4223_v57  ;;  %v2766_v1 = vpack.c.bf16 %v4460_v55, %v4444_v18  ;;  %v6602_v57 = vld [vmem:[#allocation71_spill] sm:$0xff]  ;;  %v2836_v20 = vpack.c.bf16 %v693_v32, %v4447_v62 }
 0x288   :  { %v617_v33 = vmul.f32 %v3718_v12, %v588_v34  ;;  %v620_v2 = vmul.f32 %v3721_v13, %v576_v17  ;;  %2759 = vmatpush1.bf16.msra.mxu0 %v6600_v3  ;;  %v664_v15 = vsel %vm653_vm3, %v6602_v57, %v634_v38  ;;  %v744_v50 = vsel %vm734_vm4, %v6604_v22, %v6603_v21  ;;  %v6607_v62 = vld [vmem:[#allocation55_spill] sm:$0xff] }
 0x289   :  { %2761 = vmatprep.subr.bf16.mxu0 %v2760_v36  ;;  %v615_v39 = vmul.f32 %v3704_v6, %v579_v4  ;;  %v6605_v18 = vpack.c.bf16 %v4327_v23, %v4354_v46  ;;  %v740_v43 = vsel %vm734_vm4, %v6603_v21, %v6606_v42  ;;  %v735_v32 = vsel %vm734_vm4, %v6598_v59, %v6607_v62  ;;  %v6608_v4 = vld [vmem:[#allocation72_spill] sm:$0xff] }
 0x28a   :  { %v2762_v58 = vpack.c.bf16 %v617_v33, %v613_v0  ;;  %v636_v55 = vpop.permute.xlu1 %635  ;;  %v2832_v44 = vpack.c.bf16 %v620_v2, %v616_v11  ;;  %v747_v36 = vsel %vm734_vm4, %v6607_v62, %v3946_v40  ;;  %v650_v46 = vpop.permute.xlu0 %649  ;;  %v695_v34 = vmul.f32 %v3735_v26, %v664_v15  ;;  %v6609_v0 = vld [vmem:[#allocation74_spill] sm:$0xff]  ;;  %v6610_v40 = vld [vmem:[#allocation73_spill] sm:$0xff]  ;;  %v6611_v15 = vld [vmem:[#allocation56_spill] sm:$0xff] }
 0x28b   :  { %2831 = vmatpush1.bf16.msra.mxu1 %v6605_v18  ;;  %v665_v23 = vsel %vm653_vm3, %v6608_v4, %v636_v55  ;;  %v2834_v17 = vpack.c.bf16 %v619_v9, %v615_v39  ;;  %v661_v11 = vsel %vm653_vm3, %v636_v55, %v6609_v0  ;;  %v772_v59 = vmul.f32 %v6599_v48, %v744_v50  ;;  %v6612_v62 = vld [vmem:[#allocation19_spill] sm:$0xff] }
 0x28c   :  { %v699_v33 = vmul.f32 %v3735_v26, %v665_v23  ;;  %2763 = vmatpush1.bf16.msra.mxu0 %v2762_v58  ;;  %v656_v2 = vsel %vm653_vm3, %v6610_v40, %v650_v46  ;;  %v668_v9 = vsel %vm653_vm3, %v650_v46, %v6602_v57  ;;  %2833 = vmatprep.subr.bf16.mxu1 %v2832_v44  ;;  %v6613_v46 = vld [vmem:[#allocation20_spill] sm:$0xff] }
 0x28d   :  { %2765 = vmatprep.subr.bf16.mxu0 %v2764_v25  ;;  %v4553_v3 = vmul.f32 %v6601_v53, %v740_v43  ;;  %v736_v21 = vsel %vm734_vm4, %v6606_v42, %v6611_v15  ;;  %v748_v50 = vsel %vm734_vm4, %v6611_v15, %v6604_v22  ;;  %v660_v25 = vsel %vm653_vm3, %v634_v38, %v6610_v40  ;;  %v6615_v40 = vld [vmem:[#allocation57_spill] sm:$0xff]  ;;  %v6617_v15 = vld [vmem:[#allocation76_spill] sm:$0xff] }
 0x28e   :  { %v652_v39 = vpop.permute.xlu1 %651  ;;  %v2768_v58 = vpack.c.bf16 %v699_v33, %v695_v34  ;;  %v700_v57 = vmul.f32 %v3738_v27, %v661_v11  ;;  %v715_v44 = vpop.permute.xlu0 %714  ;;  %v694_v22 = vmul.f32 %v3748_v29, %v668_v9  ;;  %v697_v42 = vmul.f32 %v3751_v30, %v656_v2  ;;  %v6616_v2 = vld [vmem:[#allocation39_spill] sm:$0xff] }
 0x28f   :  { %2835 = vmatpush1.bf16.msra.mxu1 %v2834_v17  ;;  %v657_v18 = vsel %vm653_vm3, %v6609_v0, %v652_v39  ;;  %v669_v55 = vsel %vm653_vm3, %v652_v39, %v6608_v4  ;;  %v767_v23 = vmul.f32 %v6612_v62, %v747_v36  ;;  %v770_v17 = vmul.f32 %v6613_v46, %v735_v32  ;;  %v6614_v0 = vld [vmem:[#allocation75_spill] sm:$0xff] }
 0x290   :  { %2837 = vmatprep.subr.bf16.mxu1 %v2836_v20  ;;  %v698_v43 = vmul.f32 %v3748_v29, %v669_v55  ;;  %v701_v38 = vmul.f32 %v3751_v30, %v657_v18  ;;  %2767 = vmatpush1.bf16.msra.mxu0 %v2766_v1  ;;  %v774_v34 = vmul.f32 %v6613_v46, %v736_v21  ;;  %v6620_v18 = vld [vmem:[#allocation58_spill] sm:$0xff] }
 0x291   :  { %v745_v20 = vsel %vm734_vm4, %v6614_v0, %v715_v44  ;;  %2769 = vmatprep.subr.bf16.mxu0 %v2768_v58  ;;  %v771_v4 = vmul.f32 %v6612_v62, %v748_v50  ;;  %v696_v11 = vmul.f32 %v3738_v27, %v660_v25  ;;  %v2846_v32 = vpack.c.bf16 %v4553_v3, %v4510_v60  ;;  %v6618_v60 = vld [vmem:[#allocation77_spill] sm:$0xff] }
 0x292   :  { %v2770_v33 = vpack.c.bf16 %v698_v43, %v694_v22  ;;  %v717_v1 = vpop.permute.xlu1 %716  ;;  %v2840_v36 = vpack.c.bf16 %v701_v38, %v697_v42  ;;  %v824_v9 = vsel %vm815_vm5, %v6616_v2, %v6615_v40  ;;  %v731_v50 = vpop.permute.xlu0 %730  ;;  %v2772_v39 = vpack.c.bf16 %v772_v59, %v4486_v56  ;;  %v6621_v22 = vld [vmem:[#allocation40_spill] sm:$0xff] }
 0x293   :  { %2839 = vmatpush1.bf16.msra.mxu1 %v2838_v24  ;;  %v746_v21 = vsel %vm734_vm4, %v6617_v15, %v717_v1  ;;  %v2842_v58 = vpack.c.bf16 %v700_v57, %v696_v11  ;;  %v776_v49 = vmul.f32 %v6599_v48, %v745_v20  ;;  %v742_v63 = vsel %vm734_vm4, %v717_v1, %v4265_v47  ;;  %v6619_v57 = vld [vmem:[#allocation42_spill] sm:$0xff]  ;;  %v6622_v1 = vld [vmem:[#allocation41_spill] sm:$0xff] }
 0x294   :  { %v780_v24 = vmul.f32 %v6599_v48, %v746_v21  ;;  %2771 = vmatpush1.bf16.msra.mxu0 %v2770_v33  ;;  %v737_v3 = vsel %vm734_vm4, %v6618_v60, %v731_v50  ;;  %v749_v25 = vsel %vm734_vm4, %v731_v50, %v6614_v0  ;;  %2841 = vmatprep.subr.bf16.mxu1 %v2840_v36  ;;  %v6623_v36 = vld [vmem:[#allocation21_spill] sm:$0xff]  ;;  %v6624_v21 = vld [vmem:[#allocation60_spill] sm:$0xff] }
 0x295   :  { %2773 = vmatprep.subr.bf16.mxu0 %v2772_v39  ;;  %v2844_v56 = vpack.c.bf16 %v774_v34, %v770_v17  ;;  %v2774_v59 = vpack.c.bf16 %v771_v4, %v767_v23  ;;  %v821_v55 = vsel %vm815_vm5, %v6620_v18, %v6619_v57  ;;  %v825_v42 = vsel %vm815_vm5, %v6621_v22, %v6620_v18 }
 0x296   :  { %v733_v43 = vpop.permute.xlu1 %732  ;;  %v2776_v38 = vpack.c.bf16 %v780_v24, %v776_v49  ;;  %v741_v0 = vsel %vm734_vm4, %v715_v44, %v6618_v60  ;;  %v781_v17 = vmul.f32 %v6601_v53, %v742_v63  ;;  %v4627_v20 = vpop.permute.xlu0 %1042  ;;  %v775_v4 = vmul.f32 %v6612_v62, %v749_v25  ;;  %v6625_v24 = vld [vmem:[#allocation22_spill] sm:$0xff] }
 0x297   :  { %2843 = vmatpush1.bf16.msra.mxu1 %v2842_v58  ;;  %v738_v23 = vsel %vm734_vm4, %v4265_v47, %v733_v43  ;;  %v750_v34 = vsel %vm734_vm4, %v733_v43, %v6617_v15  ;;  %v778_v11 = vmul.f32 %v6613_v46, %v737_v3  ;;  %v820_v47 = vsel %vm815_vm5, %v6615_v40, %v6622_v1  ;;  %v6626_v3 = vld [vmem:[#allocation59_spill] sm:$0xff] }
 0x298   :  { %2845 = vmatprep.subr.bf16.mxu1 %v2844_v56  ;;  %v779_v33 = vmul.f32 %v6612_v62, %v750_v34  ;;  %v782_v44 = vmul.f32 %v6613_v46, %v738_v23  ;;  %2775 = vmatpush1.bf16.msra.mxu0 %v2774_v59  ;;  %v4639_v15 = vmul.f32 %v6623_v36, %v824_v9  ;;  %v6633_v34 = vld [vmem:[#allocation43_spill] sm:$0xff] }
 0x299   :  { %v817_v50 = vsel %vm815_vm5, %v6619_v57, %v6624_v21  ;;  %2777 = vmatprep.subr.bf16.mxu0 %v2776_v38  ;;  %v829_v39 = vsel %vm815_vm5, %v6624_v21, %v6621_v22  ;;  %v777_v58 = vmul.f32 %v6601_v53, %v741_v0  ;;  %v4653_v9 = vmul.f32 %v6623_v36, %v825_v42  ;;  %v6628_v57 = vld [vmem:[#allocation61_spill] sm:$0xff]  ;;  %v6629_v22 = vld [vmem:[#allocation62_spill] sm:$0xff]  ;;  %v6631_v38 = vld [vmem:[#allocation23_spill] sm:$0xff] }
 0x29a   :  { %v2778_v49 = vpack.c.bf16 %v779_v33, %v775_v4  ;;  %v4650_v63 = vpop.permute.xlu1 %1044  ;;  %v2848_v40 = vpack.c.bf16 %v782_v44, %v778_v11  ;;  %v853_v60 = vmul.f32 %v6625_v24, %v821_v55  ;;  %v816_v25 = vsel %vm815_vm5, %v6622_v1, %v6626_v3  ;;  %v796_v59 = vpop.permute.xlu0 %795  ;;  %v6630_v55 = vld [vmem:[#allocation44_spill] sm:$0xff]  ;;  %v6634_v11 = vld [vmem:[#allocation46_spill] sm:$0xff] }
 0x29b   :  { %2847 = vmatpush1.bf16.msra.mxu1 %v2846_v32  ;;  %v828_v56 = vsel %vm815_vm5, %v6626_v3, %v6616_v2  ;;  %v6627_v32 = vld [vmem:[#allocation45_spill] sm:$0xff]  ;;  %v906_v42 = vsel %vm896_vm6, %v6630_v55, %v6629_v22  ;;  %v2850_v43 = vpack.c.bf16 %v781_v17, %v777_v58  ;;  %v4674_v0 = vmul.f32 %v6631_v38, %v817_v50  ;;  %v6632_v2 = vld [vmem:[#allocation24_spill] sm:$0xff]  ;;  %v6636_v50 = vld [vmem:[#allocation63_spill] sm:$0xff] }
 0x29c   :  { %v901_v18 = vsel %vm896_vm6, %v6628_v57, %v6627_v32  ;;  %2779 = vmatpush1.bf16.msra.mxu0 %v2778_v49  ;;  %2849 = vmatprep.subr.bf16.mxu1 %v2848_v40  ;;  %v855_v23 = vmul.f32 %v6632_v2, %v829_v39  ;;  %v905_v4 = vsel %vm896_vm6, %v6633_v34, %v6628_v57  ;;  %v6638_v40 = vld [vmem:[#allocation64_spill] sm:$0xff] }
 0x29d   :  { %v902_v33 = vsel %vm896_vm6, %v6629_v22, %v6634_v11  ;;  %v6635_v17 = vpack.c.bf16 %v3727_v16, %v3707_v8  ;;  %v849_v44 = vmul.f32 %v6625_v24, %v820_v47  ;;  %v4690_v1 = vmul.f32 %v6631_v38, %v816_v25  ;;  %v6637_v8 = vld [vmem:[#allocation25_spill] sm:$0xff]  ;;  %v6641_v22 = vld [vmem:[#allocation16_spill] sm:$0xff] }
 0x29e   :  { %v851_v21 = vmul.f32 %v6632_v2, %v828_v56  ;;  %v897_v39 = vsel %vm896_vm6, %v6627_v32, %v6636_v50  ;;  %v4697_v58 = vpop.permute.xlu1 %1052  ;;  %v2790_v49 = vpack.c.bf16 %v4653_v9, %v4639_v15  ;;  %v4702_v16 = vmul.f32 %v6637_v8, %v906_v42  ;;  %v812_v56 = vpop.permute.xlu0 %811  ;;  %v6640_v9 = vld [vmem:[#allocation26_spill] sm:$0xff]  ;;  %v6642_v42 = vld [vmem:[#allocation15_spill] sm:$0xff] }
 0x29f   :  { %2781 = vmatprep.subr.bf16.mxu0 %v6635_v17  ;;  %2851 = vmatpush1.bf16.msra.mxu1 %v2850_v43  ;;  %v909_v47 = vsel %vm896_vm6, %v6636_v50, %v6633_v34  ;;  %v898_v3 = vsel %vm896_vm6, %v6634_v11, %v6638_v40  ;;  %v6639_v25 = vpack.c.bf16 %v3741_v28, %v3724_v14  ;;  %v6644_v14 = vld [vmem:[#allocation27_spill] sm:$0xff]  ;;  %v6646_v17 = vld [vmem:[#allocation28_spill] sm:$0xff] }
 0x2a0   :  { %v4716_v15 = vmul.f32 %v6637_v8, %v905_v4  ;;  %v4719_v32 = vmul.f32 %v6640_v9, %v901_v18  ;;  %v4722_v57 = vmul.f32 %v6640_v9, %v902_v33  ;;  %v6643_v43 = vpack.c.bf16 %v6641_v22, %v6642_v42  ;;  %v6654_v22 = vld [vmem:[#allocation78_spill] sm:$0xff] }
 0x2a1   :  { %2853 = vmatprep.subr.bf16.mxu1 %v6639_v25  ;;  %v2788_v34 = vpack.c.bf16 %v853_v60, %v849_v44  ;;  %v2862_v11 = vpack.c.bf16 %v4674_v0, %v4690_v1  ;;  %v4730_v28 = vmul.f32 %v6644_v14, %v897_v39  ;;  %v822_v4 = vsel %vm815_vm5, %v796_v59, %v4271_v35  ;;  %v6647_v44 = vld [vmem:[#allocation65_spill] sm:$0xff]  ;;  %v6648_v1 = vld [vmem:[#allocation47_spill] sm:$0xff] }
 0x2a2   :  { %2783 = vmatpush1.bf16.msra.mxu0 %v6643_v43  ;;  %v6645_v18 = vpack.c.bf16 %v4044_v54, %v4028_v7  ;;  %v2860_v33 = vpack.c.bf16 %v855_v23, %v851_v21  ;;  %v4739_v50 = vmul.f32 %v6646_v17, %v909_v47  ;;  %v910_v60 = vsel %vm896_vm6, %v6638_v40, %v6630_v55  ;;  %v798_v54 = vpop.permute.xlu1 %797  ;;  %v6650_v21 = vld [vmem:[#allocation49_spill] sm:$0xff]  ;;  %v6651_v47 = vld [vmem:[#allocation80_spill] sm:$0xff] }
 0x2a3   :  { %v4746_v0 = vmul.f32 %v6644_v14, %v898_v3  ;;  %v986_v39 = vsel %vm977_vm7, %v6648_v1, %v6647_v44  ;;  %v6649_v7 = vpack.c.bf16 %v3622_v41, %v3612_v37  ;;  %v982_v55 = vsel %vm977_vm7, %v6647_v44, %v6650_v21  ;;  %v6652_v3 = vld [vmem:[#allocation79_spill] sm:$0xff]  ;;  %v877_v41 = vpop.permute.xlu0 %876  ;;  %v6655_v44 = vld [vmem:[#allocation33_spill] sm:$0xff] }
 0x2a4   :  { %2785 = vmatprep.subr.bf16.mxu0 %v6645_v18  ;;  %v823_v40 = vsel %vm815_vm5, %v798_v54, %v6651_v47  ;;  %v827_v25 = vsel %vm815_vm5, %v6652_v3, %v798_v54  ;;  %v6653_v37 = vpack.c.bf16 %v4071_v10, %v4047_v52  ;;  %v826_v42 = vsel %vm815_vm5, %v6654_v22, %v796_v59  ;;  %v6657_v52 = vld [vmem:[#allocation29_spill] sm:$0xff] }
 0x2a5   :  { %2855 = vmatpush1.bf16.msra.mxu1 %v6649_v7  ;;  %v857_v43 = vmul.f32 %v6625_v24, %v822_v4  ;;  %v861_v18 = vmul.f32 %v6625_v24, %v823_v40  ;;  %v6656_v7 = vpack.c.bf16 %v3894_v31, %v6655_v44  ;;  %v2796_v54 = vpack.c.bf16 %v4722_v57, %v4719_v32  ;;  %v6658_v40 = vld [vmem:[#allocation30_spill] sm:$0xff]  ;;  %v6659_v57 = vld [vmem:[#allocation35_spill] sm:$0xff]  ;;  %v6663_v24 = vld [vmem:[#allocation48_spill] sm:$0xff] }
 0x2a6   :  { %2857 = vmatprep.subr.bf16.mxu1 %v6653_v37  ;;  %v936_v23 = vmul.f32 %v6646_v17, %v910_v60  ;;  %v4782_v10 = vmul.f32 %v6657_v52, %v986_v39  ;;  %v818_v59 = vsel %vm815_vm5, %v4271_v35, %v812_v56  ;;  %v830_v4 = vsel %vm815_vm5, %v812_v56, %v6654_v22  ;;  %v6660_v60 = vld [vmem:[#allocation34_spill] sm:$0xff]  ;;  %v814_v44 = vpop.permute.xlu1 %813 }
 0x2a7   :  { %2787 = vmatpush1.bf16.msra.mxu0 %v6656_v7  ;;  %v4793_v37 = vmul.f32 %v6658_v40, %v982_v55  ;;  %v860_v32 = vmul.f32 %v6623_v36, %v827_v25  ;;  %v6661_v39 = vpack.c.bf16 %v6659_v57, %v6660_v60  ;;  %v2792_v7 = vpack.c.bf16 %v861_v18, %v857_v43  ;;  %v6662_v35 = vld [vmem:[#allocation66_spill] sm:$0xff]  ;;  %v893_v22 = vpop.permute.xlu0 %892 }
 0x2a8   :  { %2789 = vmatprep.subr.bf16.mxu0 %v2788_v34  ;;  %v987_v56 = vsel %vm977_vm7, %v6663_v24, %v6662_v35  ;;  %v856_v34 = vmul.f32 %v6623_v36, %v826_v42  ;;  %v819_v55 = vsel %vm815_vm5, %v6651_v47, %v814_v44  ;;  %v831_v25 = vsel %vm815_vm5, %v814_v44, %v6652_v3  ;;  %v6664_v42 = vld [vmem:[#allocation50_spill] sm:$0xff]  ;;  %v6666_v3 = vld [vmem:[#allocation83_spill] sm:$0xff] }
 0x2a9   :  { %2859 = vmatpush1.bf16.msra.mxu1 %v6661_v39  ;;  %v858_v57 = vmul.f32 %v6631_v38, %v818_v59  ;;  %v859_v43 = vmul.f32 %v6632_v2, %v830_v4  ;;  %v862_v18 = vmul.f32 %v6631_v38, %v819_v55  ;;  %v863_v60 = vmul.f32 %v6632_v2, %v831_v25  ;;  %v6665_v39 = vld [vmem:[#allocation67_spill] sm:$0xff]  ;;  %v6668_v2 = vld [vmem:[#allocation84_spill] sm:$0xff] }
 0x2aa   :  { %2861 = vmatprep.subr.bf16.mxu1 %v2860_v33  ;;  %v983_v47 = vsel %vm977_vm7, %v6662_v35, %v6664_v42  ;;  %v978_v33 = vsel %vm977_vm7, %v6650_v21, %v6665_v39  ;;  %v903_v59 = vsel %vm896_vm6, %v877_v41, %v6666_v3  ;;  %v2868_v4 = vpack.c.bf16 %v936_v23, %v4739_v50  ;;  %v879_v35 = vpop.permute.xlu1 %878  ;;  %v6667_v21 = vld [vmem:[#allocation68_spill] sm:$0xff]  ;;  %v6669_v23 = vld [vmem:[#allocation82_spill] sm:$0xff] }
 0x2ab   :  { %2791 = vmatpush1.bf16.msra.mxu0 %v2790_v49  ;;  %v990_v49 = vsel %vm977_vm7, %v6665_v39, %v6648_v1  ;;  %v2794_v44 = vpack.c.bf16 %v860_v32, %v856_v34  ;;  %v2866_v55 = vpack.c.bf16 %v862_v18, %v858_v57  ;;  %v2864_v25 = vpack.c.bf16 %v863_v60, %v859_v43  ;;  %v958_v32 = vpop.permute.xlu0 %957 }
 0x2ac   :  { %2793 = vmatprep.subr.bf16.mxu0 %v2792_v7  ;;  %v4831_v31 = vmul.f32 %v6657_v52, %v987_v56  ;;  %v979_v7 = vsel %vm977_vm7, %v6664_v42, %v6667_v21  ;;  %v904_v50 = vsel %vm896_vm6, %v879_v35, %v6668_v2  ;;  %v908_v1 = vsel %vm896_vm6, %v6669_v23, %v879_v35  ;;  %v6670_v56 = vld [vmem:[#allocation81_spill] sm:$0xff]  ;;  %v6672_v35 = vld [vmem:[#allocation32_spill] sm:$0xff] }
 0x2ad   :  { %2863 = vmatpush1.bf16.msra.mxu1 %v2862_v11  ;;  %v991_v11 = vsel %vm977_vm7, %v6667_v21, %v6663_v24  ;;  %v907_v34 = vsel %vm896_vm6, %v6670_v56, %v877_v41  ;;  %v938_v57 = vmul.f32 %v6640_v9, %v903_v59  ;;  %v942_v43 = vmul.f32 %v6640_v9, %v904_v50  ;;  %v6671_v41 = vld [vmem:[#allocation31_spill] sm:$0xff] }
 0x2ae   :  { %v1015_v18 = vmul.f32 %v6658_v40, %v983_v47  ;;  %v899_v60 = vsel %vm896_vm6, %v6666_v3, %v893_v22  ;;  %v911_v24 = vsel %vm896_vm6, %v893_v22, %v6670_v56  ;;  %2865 = vmatprep.subr.bf16.mxu1 %v2864_v25  ;;  %v4861_v42 = vmul.f32 %v6671_v41, %v978_v33  ;;  %v895_v47 = vpop.permute.xlu1 %894 }
 0x2af   :  { %2795 = vmatpush1.bf16.msra.mxu0 %v2794_v44  ;;  %v4864_v39 = vmul.f32 %v6671_v41, %v979_v7  ;;  %v941_v59 = vmul.f32 %v6637_v8, %v908_v1  ;;  %v2800_v44 = vpack.c.bf16 %v942_v43, %v938_v57  ;;  %v1017_v21 = vmul.f32 %v6672_v35, %v991_v11  ;;  %v974_v33 = vpop.permute.xlu0 %973 }
 0x2b0   :  { %2797 = vmatprep.subr.bf16.mxu0 %v2796_v54  ;;  %v937_v3 = vmul.f32 %v6637_v8, %v907_v34  ;;  %v900_v22 = vsel %vm896_vm6, %v6668_v2, %v895_v47  ;;  %v912_v54 = vsel %vm896_vm6, %v895_v47, %v6669_v23  ;;  %v939_v25 = vmul.f32 %v6644_v14, %v899_v60  ;;  %v6674_v23 = vld [vmem:[#allocation87_spill] sm:$0xff]  ;;  %v6677_v60 = vld [vmem:[#allocation88_spill] sm:$0xff] }
 0x2b1   :  { %2867 = vmatpush1.bf16.msra.mxu1 %v2866_v55  ;;  %v940_v55 = vmul.f32 %v6646_v17, %v911_v24  ;;  %v943_v7 = vmul.f32 %v6644_v14, %v900_v22  ;;  %v944_v50 = vmul.f32 %v6646_v17, %v912_v54  ;;  %v6673_v1 = vpack.c.bf16 %v4702_v16, %v4716_v15  ;;  %v4913_v22 = vld [vmem:[#allocation5 + $0x28] ss:$0 sm:$0xff]  ;;  %v6681_v54 = vld [vmem:[#allocation69_spill] sm:$0xff] }
 0x2b2   :  { %2869 = vmatprep.subr.bf16.mxu1 %v2868_v4  ;;  %v2806_v2 = vpack.c.bf16 %v4831_v31, %v4782_v10  ;;  %v1013_v11 = vmul.f32 %v6672_v35, %v990_v49  ;;  %v984_v4 = vsel %vm977_vm7, %v958_v32, %v6674_v23  ;;  %v2804_v56 = vpack.c.bf16 %v1015_v18, %v4793_v37  ;;  %v960_v15 = vpop.permute.xlu1 %959  ;;  %v6676_v31 = vld [vmem:[#allocation70_spill] sm:$0xff] }
 0x2b3   :  { %2799 = vmatpush1.bf16.msra.mxu0 %v6673_v1  ;;  %v2878_v34 = vpack.c.bf16 %v4864_v39, %v4861_v42  ;;  %v2802_v57 = vpack.c.bf16 %v941_v59, %v937_v3  ;;  %v2874_v43 = vpack.c.bf16 %v943_v7, %v939_v25  ;;  %v6675_v16 = vpack.c.bf16 %v4746_v0, %v4730_v28  ;;  %v6678_v18 = vld [vmem:[#allocation86_spill] sm:$0xff]  ;;  %v1051_v42 = vpop.permute.xlu0 %1050  ;;  %v6679_v28 = vld [vmem:[#allocation52_spill] sm:$0xff]  ;;  %v6680_v59 = vld [vmem:[#allocation85_spill] sm:$0xff] }
 0x2b4   :  { %2801 = vmatprep.subr.bf16.mxu0 %v2800_v44  ;;  %v2872_v10 = vpack.c.bf16 %v944_v50, %v940_v55  ;;  %v1064_v49 = vsel %vm1058_vm8, %v6676_v31, %v4650_v63  ;;  %v985_v37 = vsel %vm977_vm7, %v960_v15, %v6677_v60  ;;  %v989_v24 = vsel %vm977_vm7, %v6678_v18, %v960_v15  ;;  %v6682_v50 = vld [vmem:[#allocation51_spill] sm:$0xff] }
 0x2b5   :  { %2871 = vmatpush1.bf16.msra.mxu1 %v6675_v16  ;;  %v2876_v39 = vpack.c.bf16 %v1017_v21, %v1013_v11  ;;  %v1068_v0 = vsel %vm1058_vm8, %v6679_v28, %v6676_v31  ;;  %v988_v47 = vsel %vm977_vm7, %v6680_v59, %v958_v32  ;;  %v1019_v44 = vmul.f32 %v6658_v40, %v984_v4 }
 0x2b6   :  { %v1023_v3 = vmul.f32 %v6658_v40, %v985_v37  ;;  %v1063_v21 = vsel %vm1058_vm8, %v6681_v54, %v4627_v20  ;;  %v980_v25 = vsel %vm977_vm7, %v6674_v23, %v974_v33  ;;  %v992_v32 = vsel %vm977_vm7, %v974_v33, %v6680_v59  ;;  %2873 = vmatprep.subr.bf16.mxu1 %v2872_v10  ;;  %v976_v11 = vpop.permute.xlu1 %975  ;;  %v2696_v37 = vld [vmem:[#allocation5 + $0x20] ss:$0 sm:$0xff] }
 0x2b7   :  { %2803 = vmatpush1.bf16.msra.mxu0 %v2802_v57  ;;  %v1096_v55 = vmul.f32 %v4913_v22, %v1064_v49  ;;  %v1022_v7 = vmul.f32 %v6657_v52, %v989_v24  ;;  %v1071_v1 = vsel %vm1058_vm8, %v1051_v42, %v6682_v50  ;;  %v1072_v23 = vsel %vm1058_vm8, %v4697_v58, %v6679_v28  ;;  %v1031_v16 = vpop.permute.xlu0 %1030 }
 0x2b8   :  { %2805 = vmatprep.subr.bf16.mxu0 %v2804_v56  ;;  %v2808_v4 = vpack.c.bf16 %v1023_v3, %v1019_v44  ;;  %v1018_v33 = vmul.f32 %v6657_v52, %v988_v47  ;;  %v981_v56 = vsel %vm977_vm7, %v6677_v60, %v976_v11  ;;  %v993_v57 = vsel %vm977_vm7, %v976_v11, %v6678_v18  ;;  %v2698_v3 = vld [vmem:[#allocation5 + $0x30] ss:$0 sm:$0xff] }
 0x2b9   :  { %2875 = vmatpush1.bf16.msra.mxu1 %v2874_v43  ;;  %v4941_v43 = vld [vmem:[#allocation5 + $0x38] ss:$0 sm:$0xff]  ;;  %v1020_v15 = vmul.f32 %v6671_v41, %v980_v25  ;;  %v1021_v10 = vmul.f32 %v6672_v35, %v992_v32  ;;  %v1024_v31 = vmul.f32 %v6671_v41, %v981_v56  ;;  %v1025_v49 = vmul.f32 %v6672_v35, %v993_v57 }
 0x2ba   :  { %2877 = vmatprep.subr.bf16.mxu1 %v2876_v39  ;;  %v1067_v60 = vsel %vm1058_vm8, %v6682_v50, %v6681_v54  ;;  %v1092_v18 = vmul.f32 %v4913_v22, %v1063_v21  ;;  %v1059_v24 = vsel %vm1058_vm8, %v4627_v20, %v1051_v42  ;;  %v1094_v39 = vmul.f32 %v4941_v43, %v1071_v1 }
 0x2bb   :  { %2807 = vmatpush1.bf16.msra.mxu0 %v2806_v2  ;;  %v1095_v28 = vmul.f32 %v2696_v37, %v1068_v0  ;;  %v2810_v59 = vpack.c.bf16 %v1022_v7, %v1018_v33  ;;  %v2882_v47 = vpack.c.bf16 %v1024_v31, %v1020_v15  ;;  %v1033_v2 = vpop.permute.xlu1 %1032  ;;  %v2880_v44 = vpack.c.bf16 %v1025_v49, %v1021_v10  ;;  %v1039_v25 = vpop.permute.xlu0 %1038  ;;  %v1111_v7 = vld [vmem:[%s6344_s4 + $0x20] sm:$0xff]  ;;  %v1114_v33 = vld [vmem:[%s6344_s4 + $0x38] sm:$0xff] }
 0x2bc   :  { %2809 = vmatprep.subr.bf16.mxu0 %v2808_v4  ;;  %v1060_v54 = vsel %vm1058_vm8, %v4650_v63, %v4697_v58  ;;  %v1098_v21 = vmul.f32 %v4941_v43, %v1072_v23  ;;  %v2812_v32 = vpack.c.bf16 %v1096_v55, %v1092_v18  ;;  %v1091_v20 = vmul.f32 %v2696_v37, %v1067_v60  ;;  %v1110_v4 = vld [vmem:[%s6344_s4 + $0x18] sm:$0xff] }
 0x2bd   :  { %2879 = vmatpush1.bf16.msra.mxu1 %v2878_v34  ;;  %v1093_v42 = vmul.f32 %v2698_v3, %v1059_v24  ;;  %v1107_v34 = vld [vmem:[%s6344_s4] sm:$0xff]  ;;  %v1097_v63 = vmul.f32 %v2698_v3, %v1060_v54  ;;  %v1069_v11 = vsel %vm1058_vm8, %v1031_v16, %v1039_v25 }
 0x2be   :  { %2881 = vmatprep.subr.bf16.mxu1 %v2880_v44  ;;  %v2884_v0 = vpack.c.bf16 %v1098_v21, %v1094_v39  ;;  %v2814_v50 = vpack.c.bf16 %v1095_v28, %v1091_v20  ;;  %v1099_v57 = vmul.f32 %v2696_v37, %v1069_v11  ;;  %v1113_v39 = vld [vmem:[%s6344_s4 + $0x30] sm:$0xff]  ;;  %v1116_v20 = vld [vmem:[%s6344_s4 + $0x48] sm:$0xff] }
 0x2bf   :  { %2811 = vmatpush1.bf16.msra.mxu0 %v2810_v59  ;;  %v1049_v58 = vpop.permute.xlu1 %1048  ;;  %v1047_v55 = vpop.permute.xlu0 %1046  ;;  %v2886_v1 = vpack.c.bf16 %v1097_v63, %v1093_v42  ;;  %v1117_v59 = vld [vmem:[%s6344_s4 + $0x50] sm:$0xff] }
 0x2c0   :  { %2813 = vmatprep.subr.bf16.mxu0 %v2812_v32  ;;  %v1065_v23 = vsel %vm1058_vm8, %v1039_v25, %v1047_v55 }
 0x2c1   :  { %2883 = vmatpush1.bf16.msra.mxu1 %v2882_v47  ;;  %v1100_v49 = vmul.f32 %v4913_v22, %v1065_v23 }
 0x2c2   :  { %2885 = vmatprep.subr.bf16.mxu1 %v2884_v0  ;;  %1221 = vmatmul.mubr.f32.vlgmr.msra.gmra.mrb[8].mxu0 %v1107_v34  ;;  %v1115_v0 = vld [vmem:[%s6344_s4 + $0x40] sm:$0xff] }
 0x2c3   :  { %2815 = vmatpush1.bf16.msra.mxu0 %v2814_v50  ;;  %1226 = vmatprep.mubr.f32.mxu0 %v1111_v7  ;;  %v1041_v56 = vpop.permute.xlu1 %1040  ;;  %v1055_v31 = vpop.permute.xlu0 %1054 }
 0x2c4   :  { %1399 = vmatmul.mubr.f32.vlgmr.msra.gmra.mrb[8].mxu1 %v1107_v34  ;;  %v1066_v15 = vsel %vm1058_vm8, %v1041_v56, %v1049_v58  ;;  %v1070_v10 = vsel %vm1058_vm8, %v1033_v2, %v1041_v56  ;;  %v1061_v24 = vsel %vm1058_vm8, %v1047_v55, %v1055_v31  ;;  %v1073_v28 = vsel %vm1058_vm8, %v1055_v31, %v1031_v16 }
 0x2c5   :  { %2887 = vmatpush1.bf16.msra.mxu1 %v2886_v1  ;;  %1404 = vmatprep.mubr.f32.mxu1 %v1111_v7  ;;  %v1103_v60 = vmul.f32 %v2696_v37, %v1070_v10  ;;  %v1104_v18 = vmul.f32 %v4913_v22, %v1066_v15  ;;  %v1101_v44 = vmul.f32 %v2698_v3, %v1061_v24  ;;  %v1118_v7 = vld [vmem:[%s6344_s4 + $0x58] sm:$0xff] }
 0x2c6   :  { %1227 = vmatmul.mubr.f32.gmra.mrb[10].mxu0 %v1110_v4  ;;  %v1102_v25 = vmul.f32 %v4941_v43, %v1073_v28 }
 0x2c7   :  { %1232 = vmatprep.mubr.f32.mxu0 %v1114_v33  ;;  %v2818_v47 = vpack.c.bf16 %v1103_v60, %v1099_v57  ;;  %v1057_v37 = vpop.permute.xlu1 %1056  ;;  %v2816_v22 = vpack.c.bf16 %v1104_v18, %v1100_v49 }
 0x2c8   :  { %1405 = vmatmul.mubr.f32.gmra.mrb[10].mxu1 %v1110_v4  ;;  %v1062_v54 = vsel %vm1058_vm8, %v1049_v58, %v1057_v37  ;;  %v1074_v21 = vsel %vm1058_vm8, %v1057_v37, %v1033_v2  ;;  %v6683_v2 = vmov 0.0  }
 0x2c9   :  { %1410 = vmatprep.mubr.f32.mxu1 %v1114_v33  ;;  %v1105_v16 = vmul.f32 %v2698_v3, %v1062_v54  ;;  %v1106_v32 = vmul.f32 %v4941_v43, %v1074_v21  ;;  %2817 = vmatprep.subr.bf16.mxu0 %v2816_v22  ;;  %v1109_v3 = vld [vmem:[%s6344_s4 + $0x10] sm:$0xff]  ;;  %v1112_v43 = vld [vmem:[%s6344_s4 + $0x28] sm:$0xff] }
 0x2ca   :  { %1233 = vmatmul.mubr.f32.gmra.mrb[12].mxu0 %v1113_v39 }
 0x2cb   :  { %1238 = vmatprep.mubr.f32.mxu0 %v1117_v59  ;;  %2819 = vmatpush1.bf16.msra.mxu0 %v2818_v47  ;;  %v2890_v42 = vpack.c.bf16 %v1105_v16, %v1101_v44  ;;  %v2888_v34 = vpack.c.bf16 %v1106_v32, %v1102_v25 }
 0x2cc   :  { %1411 = vmatmul.mubr.f32.gmra.mrb[12].mxu1 %v1113_v39 }
 0x2cd   :  { %1416 = vmatprep.mubr.f32.mxu1 %v1117_v59  ;;  %2889 = vmatprep.subr.bf16.mxu1 %v2888_v34 }
 0x2ce   :  { %1239 = vmatmul.mubr.f32.gmra.mrb[14].mxu0 %v1116_v20  ;;  %2891 = vmatpush1.bf16.msra.mxu1 %v2890_v42 }
 0x2cf   :  { %1309 = vmatprep.mubr.f32.mxu0 %v6683_v2 }
 0x2d0   :  { %1417 = vmatmul.mubr.f32.gmra.mrb[14].mxu1 %v1116_v20 }
 0x2d1   :  { %1487 = vmatprep.mubr.f32.mxu1 %v6683_v2 }
 0x2d2   :  { %2700 = vmatmul.mubr.msk.f32.vlgmr.msra.gmra.mrb[8].mxu0 %vm1143_vm9, %v1109_v3 }
 0x2d3   :  { %1315 = vmatprep.mubr.f32.mxu0 %v6683_v2  ;;  %v5030_v50 = vpop.permute.xlu0 %1125 }
 0x2d4   :  { %2704 = vmatmul.mubr.msk.f32.vlgmr.msra.gmra.mrb[8].mxu1 %vm1143_vm9, %v1109_v3 }
 0x2d5   :  { %1493 = vmatprep.mubr.f32.mxu1 %v6683_v2 }
 0x2d6   :  { %2701 = vmatmul.mubr.msk.f32.gmra.mrb[10].mxu0 %vm1143_vm9, %v1112_v43 }
 0x2d7   :  { %1321 = vmatprep.mubr.f32.mxu0 %v6683_v2  ;;  %v5034_v33 = vpop.permute.xlu1 %1130 }
 0x2d8   :  { %2705 = vmatmul.mubr.msk.f32.gmra.mrb[10].mxu1 %vm1143_vm9, %v1112_v43 }
 0x2d9   :  { %1499 = vmatprep.mubr.f32.mxu1 %v6683_v2 }
 0x2da   :  { %2702 = vmatmul.mubr.msk.f32.gmra.mrb[12].mxu0 %vm1143_vm9, %v1115_v0 }
 0x2db   :  { %1327 = vmatprep.mubr.f32.mxu0 %v6683_v2 }
 0x2dc   :  { %2706 = vmatmul.mubr.msk.f32.gmra.mrb[12].mxu1 %vm1143_vm9, %v1115_v0 }
 0x2dd   :  { %1505 = vmatprep.mubr.f32.mxu1 %v6683_v2 }
 0x2de   :  { %2703 = vmatmul.mubr.msk.f32.gmra.mrb[14].mxu0 %vm1143_vm9, %v1118_v7 }
 0x2e0   :  { %2707 = vmatmul.mubr.msk.f32.gmra.mrb[14].mxu1 %vm1143_vm9, %v1118_v7 }
 0x3a5   :  { %v1311_v63 = vpop.f32.mrb[8].mxu0 }
 0x3a6   :  { %v3036_v58 = vadd.f32 %v1311_v63, %v5030_v50  ;;  %v1313_v55 = vpop.f32.mrb[9].mxu0 }
 0x3a7   :  { %v1489_v1 = vpop.f32.mrb[8].mxu1 }
 0x3a8   :  { %v1512_v11 = vsub.f32 0.0, %v3036_v58  ;;  %v3044_v4 = vadd.f32 %v1489_v1, %v5030_v50  ;;  %v1491_v23 = vpop.f32.mrb[9].mxu1 }
 0x3a9   :  { %v1317_v56 = vpop.f32.mrb[10].mxu0 }
 0x3aa   :  { %v1528_v57 = vmul.f32 1.442695, %v1512_v11  ;;  %v1514_v15 = vsub.f32 0.0, %v3044_v4  ;;  %v3038_v10 = vadd.f32 %v1317_v56, %v5034_v33  ;;  %v1319_v31 = vpop.f32.mrb[11].mxu0 }
 0x3ab   :  { %v1495_v49 = vpop.f32.mrb[10].mxu1 }
 0x3ac   :  { %3188 = vpow2.f32 %v1528_v57  ;;  %v1532_v60 = vmul.f32 1.442695, %v1514_v15  ;;  %v1516_v18 = vsub.f32 0.0, %v3038_v10  ;;  %v3046_v24 = vadd.f32 %v1495_v49, %v5034_v33  ;;  %v1497_v39 = vpop.f32.mrb[11].mxu1 }
 0x3ad   :  { %v5038_v28 = vpop.f32.mrb[12].mxu0 }
 0x3ae   :  { %3190 = vpow2.f32 %v1532_v60  ;;  %v1536_v59 = vmul.f32 1.442695, %v1516_v18  ;;  %v1518_v47 = vsub.f32 0.0, %v3046_v24  ;;  %v5040_v37 = vpop.f32.mrb[13].mxu0 }
 0x3af   :  { %v5042_v22 = vpop.f32.mrb[12].mxu1 }
 0x3b0   :  { %3192 = vpow2.f32 %v1536_v59  ;;  %v1540_v44 = vmul.f32 1.442695, %v1518_v47  ;;  %v5044_v54 = vpop.f32.mrb[13].mxu1  ;;  %v3039_v59 = vadd.f32 %v1319_v31, %v5034_v33 }
 0x3b1   :  { %v5046_v21 = vpop.f32.mrb[14].mxu0 }
 0x3b2   :  { %3194 = vpow2.f32 %v1540_v44  ;;  %v5048_v25 = vpop.f32.mrb[15].mxu0 }
 0x3b3   :  { %v5050_v16 = vpop.f32.mrb[14].mxu1 }
 0x3b4   :  { %v5052_v32 = vpop.f32.mrb[15].mxu1 }
 0x3b6   :  { %v3189_v20 = vpop.eup %3188 }
 0x3b7   :  { %v1560_v42 = vadd.f32 1.0, %v3189_v20  ;;  %v3047_v20 = vadd.f32 %v1497_v39, %v5034_v33 }
 0x3b8   :  { %v3191_v34 = vpop.eup %3190 }
 0x3b9   :  { %3196 = vrcp.f32 %v1560_v42  ;;  %v1562_v3 = vadd.f32 1.0, %v3191_v34  ;;  %v1519_v31 = vsub.f32 0.0, %v3047_v20 }
 0x3ba   :  { %v3193_v43 = vpop.eup %3192 }
 0x3bb   :  { %3198 = vrcp.f32 %v1562_v3  ;;  %v1564_v0 = vadd.f32 1.0, %v3193_v43  ;;  %v1542_v42 = vmul.f32 1.442695, %v1519_v31 }
 0x3bc   :  { %v3195_v7 = vpop.eup %3194 }
 0x3bd   :  { %3200 = vrcp.f32 %v1564_v0  ;;  %v1566_v63 = vadd.f32 1.0, %v3195_v7 }
 0x3bf   :  { %3202 = vrcp.f32 %v1566_v63 }
 0x3c3   :  { %v3197_v1 = vpop.eup %3196 }
 0x3c4   :  { %v5054_v11 = vmul.f32 %v3197_v1, %v3036_v58 }
 0x3c5   :  { %v3199_v56 = vpop.eup %3198 }
 0x3c6   :  { %6684 = vst [vmem:[#allocation37_spill] sm:$0xff] %v5054_v11  ;;  %1624 = vrot.lane.b32.xlu0 %v5054_v11, %s3452_s3  ;;  %v5058_v15 = vmul.f32 %v3199_v56, %v3044_v4  ;;  %v3037_v4 = vadd.f32 %v1313_v55, %v5030_v50  ;;  %v1517_v55 = vsub.f32 0.0, %v3039_v59 }
 0x3c7   :  { %v3201_v57 = vpop.eup %3200 }
 0x3c8   :  { %6685 = vst [vmem:[#allocation17_spill] sm:$0xff] %v5058_v15  ;;  %v5060_v49 = vmul.f32 %v3201_v57, %v3038_v10  ;;  %v3045_v10 = vadd.f32 %v1491_v23, %v5030_v50  ;;  %v1538_v23 = vmul.f32 1.442695, %v1517_v55  ;;  %v5158_v55 = vpop.permute.xlu1 %1140 }
 0x3c9   :  { %v3203_v60 = vpop.eup %3202 }
 0x3ca   :  { %6686 = vst [vmem:[#allocation71_spill] sm:$0xff] %v5060_v49  ;;  %1626 = vrot.lane.b32.xlu1 %v5060_v49, %s3452_s3  ;;  %1640 = vrot.lane.b32.xlu0 %v5058_v15, %s3452_s3  ;;  %v5068_v18 = vmul.f32 %v3203_v60, %v3046_v24  ;;  %v1513_v24 = vsub.f32 0.0, %v3037_v4  ;;  %v1515_v47 = vsub.f32 0.0, %v3045_v10 }
 0x3cc   :  { %6687 = vst [vmem:[#allocation54_spill] sm:$0xff] %v5068_v18  ;;  %v1530_v44 = vmul.f32 1.442695, %v1513_v24  ;;  %v1534_v50 = vmul.f32 1.442695, %v1515_v47 }
 0x3ce   :  { %1642 = vrot.lane.b32.xlu1 %v5068_v18, %s3452_s3  ;;  %1688 = vrot.lane.b32.xlu0 %v5054_v11, %s3443_s28  ;;  %3204 = vpow2.f32 %v1530_v44 }
 0x3cf   :  { %3206 = vpow2.f32 %v1534_v50 }
 0x3d0   :  { %3208 = vpow2.f32 %v1538_v23  ;;  %v3042_v23 = vadd.f32 %v5046_v21, %v5158_v55 }
 0x3d1   :  { %3210 = vpow2.f32 %v1542_v42 }
 0x3d2   :  { %1690 = vrot.lane.b32.xlu1 %v5060_v49, %s3443_s28  ;;  %1704 = vrot.lane.b32.xlu0 %v5058_v15, %s3443_s28  ;;  %v1524_v42 = vsub.f32 0.0, %v3042_v23 }
 0x3d4   :  { %v1552_v21 = vmul.f32 1.442695, %v1524_v42 }
 0x3d6   :  { %1706 = vrot.lane.b32.xlu1 %v5068_v18, %s3443_s28  ;;  %1752 = vrot.lane.b32.xlu0 %v5054_v11, %s3453_s21 }
 0x3d8   :  { %v3205_v33 = vpop.eup %3204 }
 0x3d9   :  { %v3207_v39 = vpop.eup %3206  ;;  %v1561_v34 = vadd.f32 1.0, %v3205_v33  ;;  %v3050_v33 = vadd.f32 %v5050_v16, %v5158_v55 }
 0x3da   :  { %1754 = vrot.lane.b32.xlu1 %v5060_v49, %s3453_s21  ;;  %1768 = vrot.lane.b32.xlu0 %v5058_v15, %s3453_s21  ;;  %v3209_v3 = vpop.eup %3208  ;;  %v1563_v43 = vadd.f32 1.0, %v3207_v39 }
 0x3db   :  { %3212 = vrcp.f32 %v1561_v34  ;;  %v1565_v0 = vadd.f32 1.0, %v3209_v3  ;;  %v3211_v7 = vpop.eup %3210  ;;  %v1526_v39 = vsub.f32 0.0, %v3050_v33 }
 0x3dc   :  { %3214 = vrcp.f32 %v1563_v43  ;;  %v1567_v63 = vadd.f32 1.0, %v3211_v7 }
 0x3dd   :  { %3216 = vrcp.f32 %v1565_v0  ;;  %v1556_v34 = vmul.f32 1.442695, %v1526_v39 }
 0x3de   :  { %1770 = vrot.lane.b32.xlu1 %v5068_v18, %s3453_s21  ;;  %1816 = vrot.lane.b32.xlu0 %v5054_v11, %s3454_s22  ;;  %3218 = vrcp.f32 %v1567_v63 }
 0x3e2   :  { %1818 = vrot.lane.b32.xlu1 %v5060_v49, %s3454_s22  ;;  %1832 = vrot.lane.b32.xlu0 %v5058_v15, %s3454_s22 }
 0x3e5   :  { %v3213_v1 = vpop.eup %3212 }
 0x3e6   :  { %1834 = vrot.lane.b32.xlu1 %v5068_v18, %s3454_s22  ;;  %1880 = vrot.lane.b32.xlu0 %v5054_v11, %s3455_s23  ;;  %v3215_v56 = vpop.eup %3214  ;;  %v5126_v57 = vmul.f32 %v3213_v1, %v3037_v4 }
 0x3e7   :  { %v3217_v60 = vpop.eup %3216  ;;  %v5132_v24 = vmul.f32 %v3215_v56, %v3045_v10  ;;  %v5150_v10 = vpop.permute.xlu0 %1135 }
 0x3e8   :  { %6688 = vst [vmem:[#allocation36_spill] sm:$0xff] %v5126_v57  ;;  %v5134_v47 = vmul.f32 %v3217_v60, %v3039_v59  ;;  %v3219_v44 = vpop.eup %3218  ;;  %v3040_v59 = vadd.f32 %v5038_v28, %v5150_v10 }
 0x3e9   :  { %6689 = vst [vmem:[#allocation38_spill] sm:$0xff] %v5132_v24  ;;  %v5140_v4 = vmul.f32 %v3219_v44, %v3047_v20  ;;  %v3048_v20 = vadd.f32 %v5042_v22, %v5150_v10 }
 0x3ea   :  { %1882 = vrot.lane.b32.xlu1 %v5060_v49, %s3455_s23  ;;  %1896 = vrot.lane.b32.xlu0 %v5058_v15, %s3455_s23  ;;  %6690 = vst [vmem:[#allocation55_spill] sm:$0xff] %v5134_v47  ;;  %v1520_v50 = vsub.f32 0.0, %v3040_v59 }
 0x3eb   :  { %6691 = vst [vmem:[#allocation72_spill] sm:$0xff] %v5140_v4  ;;  %v1522_v28 = vsub.f32 0.0, %v3048_v20 }
 0x3ec   :  { %v1544_v31 = vmul.f32 1.442695, %v1520_v50 }
 0x3ed   :  { %v1548_v22 = vmul.f32 1.442695, %v1522_v28 }
 0x3ee   :  { %1898 = vrot.lane.b32.xlu1 %v5068_v18, %s3455_s23  ;;  %1944 = vrot.lane.b32.xlu0 %v5054_v11, %s3456_s24  ;;  %3220 = vpow2.f32 %v1544_v31 }
 0x3ef   :  { %3222 = vpow2.f32 %v1548_v22 }
 0x3f0   :  { %3224 = vpow2.f32 %v1552_v21 }
 0x3f1   :  { %3226 = vpow2.f32 %v1556_v34 }
 0x3f2   :  { %1946 = vrot.lane.b32.xlu1 %v5060_v49, %s3456_s24  ;;  %1960 = vrot.lane.b32.xlu0 %v5058_v15, %s3456_s24 }
 0x3f6   :  { %1962 = vrot.lane.b32.xlu1 %v5068_v18, %s3456_s24  ;;  %2008 = vrot.lane.b32.xlu0 %v5054_v11, %s3457_s25 }
 0x3f8   :  { %v3221_v16 = vpop.eup %3220 }
 0x3f9   :  { %v3223_v3 = vpop.eup %3222  ;;  %v1568_v43 = vadd.f32 1.0, %v3221_v16 }
 0x3fa   :  { %2010 = vrot.lane.b32.xlu1 %v5060_v49, %s3457_s25  ;;  %2024 = vrot.lane.b32.xlu0 %v5058_v15, %s3457_s25  ;;  %v3225_v0 = vpop.eup %3224  ;;  %v1570_v7 = vadd.f32 1.0, %v3223_v3 }
 0x3fb   :  { %3228 = vrcp.f32 %v1568_v43  ;;  %v1572_v63 = vadd.f32 1.0, %v3225_v0  ;;  %v3227_v1 = vpop.eup %3226 }
 0x3fc   :  { %3230 = vrcp.f32 %v1570_v7  ;;  %v1574_v56 = vadd.f32 1.0, %v3227_v1  ;;  %v5246_v7 = vadd.f32 %v5040_v37, %v5150_v10  ;;  %v5267_v37 = vadd.f32 %v5044_v54, %v5150_v10 }
 0x3fd   :  { %3232 = vrcp.f32 %v1572_v63 }
 0x3fe   :  { %2026 = vrot.lane.b32.xlu1 %v5068_v18, %s3457_s25  ;;  %2072 = vrot.lane.b32.xlu0 %v5054_v11, %s3458_s26  ;;  %3234 = vrcp.f32 %v1574_v56  ;;  %v1521_v1 = vsub.f32 0.0, %v5246_v7  ;;  %v5259_v56 = vadd.f32 %v5048_v25, %v5158_v55  ;;  %v5276_v25 = vadd.f32 %v5052_v32, %v5158_v55 }
 0x3ff   :  { %v1523_v54 = vsub.f32 0.0, %v5267_v37 }
 0x400   :  { %v1527_v2 = vsub.f32 0.0, %v5276_v25 }
 0x401   :  { %v1550_v32 = vmul.f32 1.442695, %v1523_v54 }
 0x402   :  { %2074 = vrot.lane.b32.xlu1 %v5060_v49, %s3458_s26  ;;  %1632 = vrot.lane.b32.xlu0 %v5126_v57, %s3452_s3  ;;  %v1558_v49 = vmul.f32 1.442695, %v1527_v2 }
 0x405   :  { %v3229_v44 = vpop.eup %3228 }
 0x406   :  { %1634 = vrot.lane.b32.xlu1 %v5134_v47, %s3452_s3  ;;  %1648 = vrot.lane.b32.xlu0 %v5132_v24, %s3452_s3  ;;  %v3231_v50 = vpop.eup %3230  ;;  %v5208_v28 = vmul.f32 %v3229_v44, %v3040_v59 }
 0x407   :  { %v3233_v22 = vpop.eup %3232  ;;  %v5218_v21 = vmul.f32 %v3231_v50, %v3048_v20 }
 0x408   :  { %6692 = vst [vmem:[#allocation74_spill] sm:$0xff] %v5208_v28  ;;  %v5220_v39 = vmul.f32 %v3233_v22, %v3042_v23  ;;  %v3235_v59 = vpop.eup %3234  ;;  %v1546_v22 = vmul.f32 1.442695, %v1521_v1 }
 0x409   :  { %6693 = vst [vmem:[#allocation73_spill] sm:$0xff] %v5218_v21  ;;  %v5230_v3 = vmul.f32 %v3235_v59, %v3050_v33  ;;  %v1525_v59 = vsub.f32 0.0, %v5259_v56 }
 0x40a   :  { %1650 = vrot.lane.b32.xlu1 %v5140_v4, %s3452_s3  ;;  %1696 = vrot.lane.b32.xlu0 %v5126_v57, %s3443_s28  ;;  %6694 = vst [vmem:[#allocation56_spill] sm:$0xff] %v5220_v39  ;;  %3236 = vpow2.f32 %v1546_v22 }
 0x40b   :  { %6695 = vst [vmem:[#allocation75_spill] sm:$0xff] %v5230_v3  ;;  %v1554_v1 = vmul.f32 1.442695, %v1525_v59 }
 0x40d   :  { %3238 = vpow2.f32 %v1554_v1 }
 0x40e   :  { %1698 = vrot.lane.b32.xlu1 %v5134_v47, %s3443_s28  ;;  %1712 = vrot.lane.b32.xlu0 %v5132_v24, %s3443_s28  ;;  %3240 = vpow2.f32 %v1550_v32 }
 0x40f   :  { %3242 = vpow2.f32 %v1558_v49 }
 0x412   :  { %1714 = vrot.lane.b32.xlu1 %v5140_v4, %s3443_s28  ;;  %1760 = vrot.lane.b32.xlu0 %v5126_v57, %s3453_s21 }
 0x414   :  { %v3237_v54 = vpop.eup %3236 }
 0x415   :  { %v1569_v32 = vadd.f32 1.0, %v3237_v54 }
 0x416   :  { %1762 = vrot.lane.b32.xlu1 %v5134_v47, %s3453_s21  ;;  %1776 = vrot.lane.b32.xlu0 %v5132_v24, %s3453_s21 }
 0x417   :  { %3244 = vrcp.f32 %v1569_v32 }
 0x41a   :  { %1778 = vrot.lane.b32.xlu1 %v5140_v4, %s3453_s21  ;;  %1824 = vrot.lane.b32.xlu0 %v5126_v57, %s3454_s22 }
 0x41e   :  { %1826 = vrot.lane.b32.xlu1 %v5134_v47, %s3454_s22  ;;  %1840 = vrot.lane.b32.xlu0 %v5132_v24, %s3454_s22 }
 0x422   :  { %1842 = vrot.lane.b32.xlu1 %v5140_v4, %s3454_s22  ;;  %1888 = vrot.lane.b32.xlu0 %v5126_v57, %s3455_s23 }
 0x426   :  { %1890 = vrot.lane.b32.xlu1 %v5134_v47, %s3455_s23  ;;  %1904 = vrot.lane.b32.xlu0 %v5132_v24, %s3455_s23 }
 0x42a   :  { %1906 = vrot.lane.b32.xlu1 %v5140_v4, %s3455_s23  ;;  %1952 = vrot.lane.b32.xlu0 %v5126_v57, %s3456_s24 }
 0x42e   :  { %1954 = vrot.lane.b32.xlu1 %v5134_v47, %s3456_s24  ;;  %1968 = vrot.lane.b32.xlu0 %v5132_v24, %s3456_s24 }
 0x432   :  { %1970 = vrot.lane.b32.xlu1 %v5140_v4, %s3456_s24  ;;  %2016 = vrot.lane.b32.xlu0 %v5126_v57, %s3457_s25 }
 0x436   :  { %2018 = vrot.lane.b32.xlu1 %v5134_v47, %s3457_s25  ;;  %2032 = vrot.lane.b32.xlu0 %v5132_v24, %s3457_s25 }
 0x438   :  { %v5202_v60 = vpop.permute.xlu0 %1624 }
 0x43a   :  { %2034 = vrot.lane.b32.xlu1 %v5140_v4, %s3457_s25  ;;  %2080 = vrot.lane.b32.xlu0 %v5126_v57, %s3458_s26 }
 0x43c   :  { %v5210_v31 = vpop.permute.xlu1 %1626  ;;  %v5212_v42 = vpop.permute.xlu0 %1640 }
 0x43e   :  { %2082 = vrot.lane.b32.xlu1 %v5134_v47, %s3458_s26  ;;  %1628 = vrot.lane.b32.xlu0 %v5208_v28, %s3452_s3  ;;  %v3239_v47 = vpop.eup %3238 }
 0x43f   :  { %v3241_v24 = vpop.eup %3240  ;;  %v1573_v35 = vadd.f32 1.0, %v3239_v47 }
 0x440   :  { %v5222_v34 = vpop.permute.xlu1 %1642  ;;  %v5224_v16 = vpop.permute.xlu0 %1688  ;;  %v1571_v40 = vadd.f32 1.0, %v3241_v24 }
 0x441   :  { %v3243_v41 = vpop.eup %3242  ;;  %3246 = vrcp.f32 %v1573_v35 }
 0x442   :  { %1630 = vrot.lane.b32.xlu1 %v5220_v39, %s3452_s3  ;;  %1644 = vrot.lane.b32.xlu0 %v5218_v21, %s3452_s3  ;;  %v1575_v54 = vadd.f32 1.0, %v3243_v41  ;;  %3248 = vrcp.f32 %v1571_v40  ;;  %v3245_v32 = vpop.eup %3244 }
 0x443   :  { %v5349_v40 = vmul.f32 %v3245_v32, %v5246_v7 }
 0x444   :  { %v5232_v43 = vpop.permute.xlu1 %1690  ;;  %v5234_v0 = vpop.permute.xlu0 %1704  ;;  %3250 = vrcp.f32 %v1575_v54 }
 0x445   :  { %6701 = vst [vmem:[#allocation58_spill] sm:$0xff] %v5349_v40 }
 0x446   :  { %1646 = vrot.lane.b32.xlu1 %v5230_v3, %s3452_s3  ;;  %1692 = vrot.lane.b32.xlu0 %v5208_v28, %s3443_s28 }
 0x448   :  { %v5240_v20 = vpop.permute.xlu1 %1706  ;;  %v5242_v23 = vpop.permute.xlu0 %1752 }
 0x44a   :  { %1694 = vrot.lane.b32.xlu1 %v5220_v39, %s3443_s28  ;;  %1708 = vrot.lane.b32.xlu0 %v5218_v21, %s3443_s28 }
 0x44c   :  { %v5252_v33 = vpop.permute.xlu1 %1754  ;;  %v5254_v63 = vpop.permute.xlu0 %1768 }
 0x44e   :  { %1710 = vrot.lane.b32.xlu1 %v5230_v3, %s3443_s28  ;;  %1756 = vrot.lane.b32.xlu0 %v5208_v28, %s3453_s21 }
 0x450   :  { %v5269_v44 = vpop.permute.xlu1 %1770  ;;  %v5271_v50 = vpop.permute.xlu0 %1816 }
 0x452   :  { %1758 = vrot.lane.b32.xlu1 %v5220_v39, %s3453_s21  ;;  %1772 = vrot.lane.b32.xlu0 %v5218_v21, %s3453_s21 }
 0x454   :  { %v5283_v10 = vpop.permute.xlu1 %1818  ;;  %v5285_v58 = vpop.permute.xlu0 %1832 }
 0x456   :  { %1774 = vrot.lane.b32.xlu1 %v5230_v3, %s3453_s21  ;;  %1820 = vrot.lane.b32.xlu0 %v5208_v28, %s3454_s22 }
 0x458   :  { %v5292_v55 = vpop.permute.xlu1 %1834  ;;  %v5294_v11 = vpop.permute.xlu0 %1880 }
 0x45a   :  { %1822 = vrot.lane.b32.xlu1 %v5220_v39, %s3454_s22  ;;  %1836 = vrot.lane.b32.xlu0 %v5218_v21, %s3454_s22 }
 0x45c   :  { %v5300_v22 = vpop.permute.xlu1 %1882  ;;  %v5302_v59 = vpop.permute.xlu0 %1896 }
 0x45e   :  { %1838 = vrot.lane.b32.xlu1 %v5230_v3, %s3454_s22  ;;  %1884 = vrot.lane.b32.xlu0 %v5208_v28, %s3455_s23 }
 0x460   :  { %v5308_v2 = vpop.permute.xlu1 %1898  ;;  %v5310_v1 = vpop.permute.xlu0 %1944 }
 0x462   :  { %1886 = vrot.lane.b32.xlu1 %v5220_v39, %s3455_s23  ;;  %1900 = vrot.lane.b32.xlu0 %v5218_v21, %s3455_s23 }
 0x464   :  { %v5316_v49 = vpop.permute.xlu1 %1946  ;;  %v5318_v57 = vpop.permute.xlu0 %1960 }
 0x466   :  { %1902 = vrot.lane.b32.xlu1 %v5230_v3, %s3455_s23  ;;  %1948 = vrot.lane.b32.xlu0 %v5208_v28, %s3456_s24 }
 0x468   :  { %v5324_v52 = vpop.permute.xlu1 %1962  ;;  %v5326_v17 = vpop.permute.xlu0 %2008 }
 0x469   :  { %6696 = vst [vmem:[#allocation57_spill] sm:$0xff] %v5326_v17 }
 0x46a   :  { %1950 = vrot.lane.b32.xlu1 %v5220_v39, %s3456_s24  ;;  %1964 = vrot.lane.b32.xlu0 %v5218_v21, %s3456_s24 }
 0x46c   :  { %v5332_v14 = vpop.permute.xlu1 %2010  ;;  %v5334_v9 = vpop.permute.xlu0 %2024 }
 0x46d   :  { %6697 = vst [vmem:[#allocation39_spill] sm:$0xff] %v5332_v14  ;;  %6698 = vst [vmem:[#allocation76_spill] sm:$0xff] %v5334_v9  ;;  %v3247_v14 = vpop.eup %3246 }
 0x46e   :  { %1966 = vrot.lane.b32.xlu1 %v5230_v3, %s3456_s24  ;;  %2012 = vrot.lane.b32.xlu0 %v5208_v28, %s3457_s25  ;;  %v3249_v28 = vpop.eup %3248 }
 0x470   :  { %v5340_v24 = vpop.permute.xlu1 %2026  ;;  %v5342_v47 = vpop.permute.xlu0 %2072 }
 0x471   :  { %6699 = vst [vmem:[#allocation77_spill] sm:$0xff] %v5340_v24  ;;  %6700 = vst [vmem:[#allocation42_spill] sm:$0xff] %v5342_v47  ;;  %v5361_v47 = vmul.f32 %v3247_v14, %v5259_v56 }
 0x472   :  { %2014 = vrot.lane.b32.xlu1 %v5220_v39, %s3457_s25  ;;  %2028 = vrot.lane.b32.xlu0 %v5218_v21, %s3457_s25  ;;  %v3251_v21 = vpop.eup %3250  ;;  %v6705_v39 = vld [vmem:[#allocation53_spill] sm:$0xff] }
 0x473   :  { %6703 = vst [vmem:[#allocation41_spill] sm:$0xff] %v5361_v47  ;;  %v5382_v56 = vmul.f32 %v3251_v21, %v5276_v25 }
 0x474   :  { %v5351_v41 = vpop.permute.xlu1 %2074  ;;  %v1633_v35 = vpop.permute.xlu0 %1632 }
 0x475   :  { %6702 = vst [vmem:[#allocation40_spill] sm:$0xff] %v5351_v41  ;;  %v1664_v54 = vsel %vm491_vm1, %v5202_v60, %v1633_v35  ;;  %v5364_v41 = vmul.f32 %v3249_v28, %v5267_v37  ;;  %6706 = vst [vmem:[#allocation59_spill] sm:$0xff] %v5382_v56  ;;  %v1660_v9 = vsel %vm491_vm1, %v1633_v35, %v5212_v42 }
 0x476   :  { %2030 = vrot.lane.b32.xlu1 %v5230_v3, %s3457_s25  ;;  %1636 = vrot.lane.b32.xlu0 %v5349_v40, %s3452_s3  ;;  %v1673_v24 = vmul.f32 %v1664_v54, %v6705_v39 }
 0x477   :  { %6704 = vst [vmem:[#allocation60_spill] sm:$0xff] %v5364_v41 }
 0x478   :  { %v1635_v7 = vpop.permute.xlu1 %1634  ;;  %v1649_v32 = vpop.permute.xlu0 %1648 }
 0x479   :  { %v1665_v3 = vsel %vm491_vm1, %v5210_v31, %v1635_v7  ;;  %v1656_v14 = vsel %vm491_vm1, %v5212_v42, %v1649_v32  ;;  %v1668_v28 = vsel %vm491_vm1, %v1649_v32, %v5202_v60 }
 0x47a   :  { %v1677_v17 = vmul.f32 %v1665_v3, %v6705_v39  ;;  %1638 = vrot.lane.b32.xlu1 %v5361_v47, %s3452_s3  ;;  %1652 = vrot.lane.b32.xlu0 %v5364_v41, %s3452_s3  ;;  %v1661_v3 = vsel %vm491_vm1, %v1635_v7, %v5222_v34  ;;  %v1672_v25 = vmul.f32 %v1668_v28, %v4055_v19 }
 0x47b   :  { %v1675_v32 = vmul.f32 %v1656_v14, %v4058_v45  ;;  %v1678_v42 = vmul.f32 %v1661_v3, %v4079_v61 }
 0x47c   :  { %v1651_v37 = vpop.permute.xlu1 %1650  ;;  %v1697_v54 = vpop.permute.xlu0 %1696  ;;  %v2892_v39 = vpack.c.bf16 %v1677_v17, %v1673_v24 }
 0x47d   :  { %v1657_v60 = vsel %vm491_vm1, %v5222_v34, %v1651_v37  ;;  %v1669_v21 = vsel %vm491_vm1, %v1651_v37, %v5210_v31  ;;  %v1724_v34 = vsel %vm572_vm2, %v1697_v54, %v5234_v0  ;;  %v1728_v31 = vsel %vm572_vm2, %v5224_v16, %v1697_v54 }
 0x47e   :  { %v1676_v7 = vmul.f32 %v1669_v21, %v4055_v19  ;;  %v1679_v17 = vmul.f32 %v1657_v60, %v4058_v45  ;;  %1654 = vrot.lane.b32.xlu1 %v5382_v56, %s3452_s3  ;;  %1700 = vrot.lane.b32.xlu0 %v5349_v40, %s3443_s28  ;;  %v1674_v37 = vmul.f32 %v1660_v9, %v4079_v61 }
 0x47f   :  { %2893 = vmatprep.subr.bf16.mxu0 %v2892_v39  ;;  %v5419_v54 = vmul.f32 %v1728_v31, %v3701_v5  ;;  %v5422_v21 = vmul.f32 %v1724_v34, %v3704_v6 }
 0x480   :  { %v2894_v24 = vpack.c.bf16 %v1676_v7, %v1672_v25  ;;  %v1699_v35 = vpop.permute.xlu1 %1698  ;;  %v1713_v14 = vpop.permute.xlu0 %1712  ;;  %v2964_v28 = vpack.c.bf16 %v1679_v17, %v1675_v32  ;;  %v2966_v9 = vpack.c.bf16 %v1678_v42, %v1674_v37 }
 0x481   :  { %v1725_v3 = vsel %vm572_vm2, %v1699_v35, %v5240_v20  ;;  %v1729_v60 = vsel %vm572_vm2, %v5232_v43, %v1699_v35  ;;  %v1720_v32 = vsel %vm572_vm2, %v5234_v0, %v1713_v14  ;;  %v1732_v7 = vsel %vm572_vm2, %v1713_v14, %v5224_v16 }
 0x482   :  { %v5425_v39 = vmul.f32 %v1729_v60, %v3701_v5  ;;  %v5428_v25 = vmul.f32 %v1725_v3, %v3704_v6  ;;  %1702 = vrot.lane.b32.xlu1 %v5361_v47, %s3443_s28  ;;  %1716 = vrot.lane.b32.xlu0 %v5364_v41, %s3443_s28  ;;  %v5454_v35 = vmul.f32 %v1720_v32, %v3721_v13 }
 0x483   :  { %2895 = vmatpush1.bf16.msra.mxu0 %v2894_v24  ;;  %2965 = vmatprep.subr.bf16.mxu1 %v2964_v28  ;;  %v5451_v24 = vmul.f32 %v1732_v7, %v3718_v12 }
 0x484   :  { %v1715_v34 = vpop.permute.xlu1 %1714  ;;  %v1761_v31 = vpop.permute.xlu0 %1760  ;;  %2967 = vmatpush1.bf16.msra.mxu1 %v2966_v9 }
 0x485   :  { %v1721_v0 = vsel %vm572_vm2, %v5240_v20, %v1715_v34  ;;  %v1733_v16 = vsel %vm572_vm2, %v1715_v34, %v5232_v43  ;;  %v1788_v20 = vsel %vm653_vm3, %v1761_v31, %v5254_v63  ;;  %v1792_v43 = vsel %vm653_vm3, %v5242_v23, %v1761_v31 }
 0x486   :  { %v5457_v14 = vmul.f32 %v1733_v16, %v3718_v12  ;;  %v5460_v28 = vmul.f32 %v1721_v0, %v3721_v13  ;;  %1718 = vrot.lane.b32.xlu1 %v5382_v56, %s3443_s28  ;;  %1764 = vrot.lane.b32.xlu0 %v5349_v40, %s3453_s21  ;;  %v5483_v34 = vmul.f32 %v1792_v43, %v3735_v26 }
 0x487   :  { %v5486_v31 = vmul.f32 %v1788_v20, %v3738_v27 }
 0x488   :  { %v1763_v3 = vpop.permute.xlu1 %1762  ;;  %v1777_v60 = vpop.permute.xlu0 %1776 }
 0x489   :  { %v1789_v32 = vsel %vm653_vm3, %v1763_v3, %v5269_v44  ;;  %v1793_v7 = vsel %vm653_vm3, %v5252_v33, %v1763_v3  ;;  %6707 = vst [vmem:[#allocation45_spill] sm:$0xff] %v5486_v31  ;;  %v1784_v17 = vsel %vm653_vm3, %v5254_v63, %v1777_v60  ;;  %v1796_v43 = vsel %vm653_vm3, %v1777_v60, %v5242_v23 }
 0x48a   :  { %v5489_v0 = vmul.f32 %v1793_v7, %v3735_v26  ;;  %v5492_v16 = vmul.f32 %v1789_v32, %v3738_v27  ;;  %1766 = vrot.lane.b32.xlu1 %v5361_v47, %s3453_s21  ;;  %1780 = vrot.lane.b32.xlu0 %v5364_v41, %s3453_s21  ;;  %v5515_v23 = vmul.f32 %v1796_v43, %v3748_v29 }
 0x48b   :  { %v5518_v60 = vmul.f32 %v1784_v17, %v3751_v30 }
 0x48c   :  { %v1779_v3 = vpop.permute.xlu1 %1778  ;;  %v1825_v32 = vpop.permute.xlu0 %1824 }
 0x48d   :  { %v1785_v37 = vsel %vm653_vm3, %v5269_v44, %v1779_v3  ;;  %v1797_v63 = vsel %vm653_vm3, %v1779_v3, %v5252_v33  ;;  %v1852_v44 = vsel %vm734_vm4, %v1825_v32, %v5285_v58  ;;  %v1856_v33 = vsel %vm734_vm4, %v5271_v50, %v1825_v32 }
 0x48e   :  { %v5521_v20 = vmul.f32 %v1797_v63, %v3748_v29  ;;  %v5524_v9 = vmul.f32 %v1785_v37, %v3751_v30  ;;  %1782 = vrot.lane.b32.xlu1 %v5382_v56, %s3453_s21  ;;  %1828 = vrot.lane.b32.xlu0 %v5349_v40, %s3454_s22  ;;  %v5547_v32 = vmul.f32 %v1856_v33, %v6599_v48 }
 0x48f   :  { %v5550_v42 = vmul.f32 %v1852_v44, %v6601_v53 }
 0x490   :  { %v1827_v43 = vpop.permute.xlu1 %1826  ;;  %v1841_v37 = vpop.permute.xlu0 %1840 }
 0x491   :  { %v1853_v63 = vsel %vm734_vm4, %v1827_v43, %v5292_v55  ;;  %v1857_v7 = vsel %vm734_vm4, %v5283_v10, %v1827_v43  ;;  %6708 = vst [vmem:[#allocation61_spill] sm:$0xff] %v5550_v42  ;;  %v1848_v3 = vsel %vm734_vm4, %v5285_v58, %v1841_v37  ;;  %v1860_v33 = vsel %vm734_vm4, %v1841_v37, %v5271_v50 }
 0x492   :  { %v5553_v17 = vmul.f32 %v1857_v7, %v6599_v48  ;;  %v5556_v31 = vmul.f32 %v1853_v63, %v6601_v53  ;;  %1830 = vrot.lane.b32.xlu1 %v5361_v47, %s3454_s22  ;;  %1844 = vrot.lane.b32.xlu0 %v5364_v41, %s3454_s22  ;;  %v5579_v50 = vmul.f32 %v1860_v33, %v6612_v62 }
 0x493   :  { %v5582_v37 = vmul.f32 %v1848_v3, %v6613_v46 }
 0x494   :  { %6709 = vst [vmem:[#allocation62_spill] sm:$0xff] %v5556_v31  ;;  %v1843_v44 = vpop.permute.xlu1 %1842  ;;  %v1889_v43 = vpop.permute.xlu0 %1888  ;;  %6710 = vst [vmem:[#allocation44_spill] sm:$0xff] %v5579_v50 }
 0x495   :  { %v1849_v53 = vsel %vm734_vm4, %v5292_v55, %v1843_v44  ;;  %v1861_v58 = vsel %vm734_vm4, %v1843_v44, %v5283_v10  ;;  %v1916_v55 = vsel %vm815_vm5, %v1889_v43, %v5302_v59  ;;  %v1920_v10 = vsel %vm815_vm5, %v5294_v11, %v1889_v43 }
 0x496   :  { %v5585_v7 = vmul.f32 %v1861_v58, %v6612_v62  ;;  %v5588_v42 = vmul.f32 %v1849_v53, %v6613_v46  ;;  %1846 = vrot.lane.b32.xlu1 %v5382_v56, %s3454_s22  ;;  %2088 = vrot.lane.b32.xlu0 %v5058_v15, %s3458_s26  ;;  %v5611_v43 = vmul.f32 %v1920_v10, %v6623_v36  ;;  %v6713_v15 = vld [vmem:[#allocation22_spill] sm:$0xff] }
 0x497   :  { %v5614_v31 = vmul.f32 %v1916_v55, %v6713_v15 }
 0x498   :  { %6711 = vst [vmem:[#allocation43_spill] sm:$0xff] %v5585_v7  ;;  %v1891_v33 = vpop.permute.xlu1 %1890  ;;  %v1905_v53 = vpop.permute.xlu0 %1904  ;;  %6712 = vst [vmem:[#allocation46_spill] sm:$0xff] %v5611_v43 }
 0x499   :  { %v1917_v58 = vsel %vm815_vm5, %v1891_v33, %v5308_v2  ;;  %v1921_v63 = vsel %vm815_vm5, %v5300_v22, %v1891_v33  ;;  %6714 = vst [vmem:[#allocation63_spill] sm:$0xff] %v5614_v31  ;;  %v1912_v44 = vsel %vm815_vm5, %v5302_v59, %v1905_v53  ;;  %v1924_v10 = vsel %vm815_vm5, %v1905_v53, %v5294_v11  ;;  %v6718_v53 = vld [vmem:[#allocation24_spill] sm:$0xff]  ;;  %v2151_v31 = vld [vmem:[%s6347_s7 + $0x18] sm:$0xff] }
 0x49a   :  { %v5617_v3 = vmul.f32 %v1921_v63, %v6623_v36  ;;  %v5620_v50 = vmul.f32 %v1917_v58, %v6713_v15  ;;  %2090 = vrot.lane.b32.xlu1 %v5068_v18, %s3458_s26  ;;  %1892 = vrot.lane.b32.xlu0 %v5349_v40, %s3455_s23  ;;  %v5643_v11 = vmul.f32 %v1912_v44, %v6631_v38 }
 0x49b   :  { %v5646_v15 = vmul.f32 %v1924_v10, %v6718_v53 }
 0x49c   :  { %6715 = vst [vmem:[#allocation64_spill] sm:$0xff] %v5617_v3  ;;  %6716 = vst [vmem:[#allocation16_spill] sm:$0xff] %v5620_v50  ;;  %v1907_v55 = vpop.permute.xlu1 %1906  ;;  %v1953_v33 = vpop.permute.xlu0 %1952  ;;  %v6723_v3 = vld [vmem:[#allocation26_spill] sm:$0xff] }
 0x49d   :  { %v1913_v36 = vsel %vm815_vm5, %v5308_v2, %v1907_v55  ;;  %v1925_v59 = vsel %vm815_vm5, %v1907_v55, %v5300_v22  ;;  %6717 = vst [vmem:[#allocation15_spill] sm:$0xff] %v5643_v11  ;;  %6719 = vst [vmem:[#allocation65_spill] sm:$0xff] %v5646_v15  ;;  %v1980_v2 = vsel %vm896_vm6, %v1953_v33, %v5318_v57 }
 0x49e   :  { %v5649_v63 = vmul.f32 %v1913_v36, %v6631_v38  ;;  %v5652_v43 = vmul.f32 %v1925_v59, %v6718_v53  ;;  %2098 = vrot.lane.b32.xlu1 %v5140_v4, %s3458_s26  ;;  %v1984_v22 = vsel %vm896_vm6, %v5310_v1, %v1953_v33  ;;  %1908 = vrot.lane.b32.xlu0 %v5364_v41, %s3455_s23  ;;  %v6739_v38 = vld [vmem:[#allocation30_spill] sm:$0xff] }
 0x49f   :  { %v5675_v33 = vmul.f32 %v1984_v22, %v6637_v8  ;;  %v5678_v53 = vmul.f32 %v1980_v2, %v6723_v3 }
 0x4a0   :  { %6720 = vst [vmem:[#allocation47_spill] sm:$0xff] %v5649_v63  ;;  %6721 = vst [vmem:[#allocation49_spill] sm:$0xff] %v5652_v43  ;;  %v1955_v44 = vpop.permute.xlu1 %1954  ;;  %v1969_v10 = vpop.permute.xlu0 %1968  ;;  %v2150_v43 = vld [vmem:[%s6347_s7 + $0x10] sm:$0xff] }
 0x4a1   :  { %v1981_v59 = vsel %vm896_vm6, %v1955_v44, %v5324_v52  ;;  %v1985_v58 = vsel %vm896_vm6, %v5316_v49, %v1955_v44  ;;  %6722 = vst [vmem:[#allocation80_spill] sm:$0xff] %v5675_v33  ;;  %6724 = vst [vmem:[#allocation79_spill] sm:$0xff] %v5678_v53  ;;  %v1976_v55 = vsel %vm896_vm6, %v5318_v57, %v1969_v10 }
 0x4a2   :  { %v5681_v36 = vmul.f32 %v1985_v58, %v6637_v8  ;;  %v5684_v11 = vmul.f32 %v1981_v59, %v6723_v3  ;;  %1894 = vrot.lane.b32.xlu1 %v5361_v47, %s3455_s23  ;;  %v1988_v22 = vsel %vm896_vm6, %v1969_v10, %v5310_v1  ;;  %1956 = vrot.lane.b32.xlu0 %v5349_v40, %s3456_s24  ;;  %v6727_v1 = vld [vmem:[#allocation27_spill] sm:$0xff]  ;;  %v6729_v3 = vld [vmem:[#allocation28_spill] sm:$0xff] }
 0x4a3   :  { %v5707_v10 = vmul.f32 %v1976_v55, %v6727_v1  ;;  %v5710_v63 = vmul.f32 %v1988_v22, %v6729_v3 }
 0x4a4   :  { %6725 = vst [vmem:[#allocation78_spill] sm:$0xff] %v5681_v36  ;;  %6726 = vst [vmem:[#allocation33_spill] sm:$0xff] %v5684_v11  ;;  %v1971_v2 = vpop.permute.xlu1 %1970  ;;  %v2017_v44 = vpop.permute.xlu0 %2016  ;;  %v6735_v36 = vld [vmem:[#allocation77_spill] sm:$0xff] }
 0x4a5   :  { %v1977_v8 = vsel %vm896_vm6, %v5324_v52, %v1971_v2  ;;  %v1989_v57 = vsel %vm896_vm6, %v1971_v2, %v5316_v49  ;;  %6728 = vst [vmem:[#allocation35_spill] sm:$0xff] %v5707_v10  ;;  %6730 = vst [vmem:[#allocation34_spill] sm:$0xff] %v5710_v63  ;;  %v6733_v52 = vld [vmem:[#allocation76_spill] sm:$0xff]  ;;  %v6734_v49 = vld [vmem:[#allocation57_spill] sm:$0xff] }
 0x4a6   :  { %v5713_v58 = vmul.f32 %v1977_v8, %v6727_v1  ;;  %v5716_v33 = vmul.f32 %v1989_v57, %v6729_v3  ;;  %1910 = vrot.lane.b32.xlu1 %v5382_v56, %s3455_s23  ;;  %v2044_v59 = vsel %vm977_vm7, %v2017_v44, %v6733_v52  ;;  %v2048_v55 = vsel %vm977_vm7, %v6734_v49, %v2017_v44  ;;  %v6736_v1 = vld [vmem:[#allocation39_spill] sm:$0xff]  ;;  %v6737_v44 = vld [vmem:[#allocation29_spill] sm:$0xff] }
 0x4a7   :  { %1972 = vrot.lane.b32.xlu0 %v5364_v41, %s3456_s24  ;;  %v5739_v11 = vmul.f32 %v2048_v55, %v6737_v44  ;;  %v5742_v15 = vmul.f32 %v2044_v59, %v6739_v38 }
 0x4a8   :  { %6731 = vst [vmem:[#allocation66_spill] sm:$0xff] %v5713_v58  ;;  %6732 = vst [vmem:[#allocation48_spill] sm:$0xff] %v5716_v33  ;;  %v2019_v22 = vpop.permute.xlu1 %2018  ;;  %v2033_v2 = vpop.permute.xlu0 %2032 }
 0x4a9   :  { %v2045_v3 = vsel %vm977_vm7, %v2019_v22, %v6735_v36  ;;  %v2049_v53 = vsel %vm977_vm7, %v6736_v1, %v2019_v22  ;;  %6738 = vst [vmem:[#allocation50_spill] sm:$0xff] %v5739_v11  ;;  %6740 = vst [vmem:[#allocation67_spill] sm:$0xff] %v5742_v15  ;;  %v2040_v57 = vsel %vm977_vm7, %v6733_v52, %v2033_v2 }
 0x4aa   :  { %v5745_v8 = vmul.f32 %v2049_v53, %v6737_v44  ;;  %v5748_v10 = vmul.f32 %v2045_v3, %v6739_v38  ;;  %1958 = vrot.lane.b32.xlu1 %v5361_v47, %s3456_s24  ;;  %v2052_v55 = vsel %vm977_vm7, %v2033_v2, %v6734_v49  ;;  %v6744_v2 = vld [vmem:[#allocation31_spill] sm:$0xff]  ;;  %v6746_v38 = vld [vmem:[#allocation32_spill] sm:$0xff] }
 0x4ab   :  { %2020 = vrot.lane.b32.xlu0 %v5349_v40, %s3457_s25  ;;  %v5773_v44 = vmul.f32 %v2040_v57, %v6744_v2  ;;  %v5776_v58 = vmul.f32 %v2052_v55, %v6746_v38  ;;  %v6753_v55 = vld [vmem:[#allocation56_spill] sm:$0xff] }
 0x4ac   :  { %6741 = vst [vmem:[#allocation83_spill] sm:$0xff] %v5745_v8  ;;  %6742 = vst [vmem:[#allocation68_spill] sm:$0xff] %v5748_v10  ;;  %v2035_v59 = vpop.permute.xlu1 %2034  ;;  %v5762_v3 = vpop.permute.xlu0 %2080 }
 0x4ad   :  { %6743 = vst [vmem:[#allocation84_spill] sm:$0xff] %v5762_v3  ;;  %v2041_v52 = vsel %vm977_vm7, %v6735_v36, %v2035_v59  ;;  %v2053_v49 = vsel %vm977_vm7, %v2035_v59, %v6736_v1  ;;  %6745 = vst [vmem:[#allocation82_spill] sm:$0xff] %v5773_v44  ;;  %v2137_v59 = vld [vmem:[#allocation8 + $0x8] sm:$0xff]  ;;  %v6752_v36 = vld [vmem:[#allocation74_spill] sm:$0xff] }
 0x4ae   :  { %6747 = vst [vmem:[#allocation81_spill] sm:$0xff] %v5776_v58  ;;  %v5779_v53 = vmul.f32 %v2041_v52, %v6744_v2  ;;  %v5782_v11 = vmul.f32 %v2053_v49, %v6746_v38  ;;  %1974 = vrot.lane.b32.xlu1 %v5382_v56, %s3456_s24  ;;  %2248 = vmatprep.mubr.f32.mxu0 %v2137_v59  ;;  %v6751_v52 = vld [vmem:[#allocation38_spill] sm:$0xff]  ;;  %v6754_v38 = vld [vmem:[#allocation75_spill] sm:$0xff]  ;;  %v6755_v2 = vld [vmem:[#allocation73_spill] sm:$0xff] }
 0x4af   :  { %2036 = vrot.lane.b32.xlu0 %v5364_v41, %s3457_s25  ;;  %2426 = vmatprep.mubr.f32.mxu1 %v2137_v59  ;;  %v2148_v3 = vld [vmem:[%s6347_s7] sm:$0xff] }
 0x4b0   :  { %6748 = vst [vmem:[#allocation87_spill] sm:$0xff] %v5779_v53  ;;  %6749 = vst [vmem:[#allocation70_spill] sm:$0xff] %v5782_v11  ;;  %v5790_v1 = vpop.permute.xlu1 %2082  ;;  %v1629_v57 = vpop.permute.xlu0 %1628 }
 0x4b1   :  { %6750 = vst [vmem:[#allocation88_spill] sm:$0xff] %v5790_v1  ;;  %v2149_v1 = vld [vmem:[%s6347_s7 + $0x8] sm:$0xff]  ;;  %s3459_s7 = smov [#allocation10]  }
 0x4b2   :  { %2022 = vrot.lane.b32.xlu1 %v5361_v47, %s3457_s25 }
 0x4b3   :  { %2096 = vrot.lane.b32.xlu0 %v6751_v52, %s3458_s26 }
 0x4b4   :  { %v1631_v49 = vpop.permute.xlu1 %1630  ;;  %v1645_v22 = vpop.permute.xlu0 %1644 }
 0x4b6   :  { %2038 = vrot.lane.b32.xlu1 %v5382_v56, %s3457_s25 }
 0x4b7   :  { %2076 = vrot.lane.b32.xlu0 %v6752_v36, %s3458_s26 }
 0x4b8   :  { %v1647_v44 = vpop.permute.xlu1 %1646  ;;  %v5802_v53 = vpop.permute.xlu0 %1692 }
 0x4ba   :  { %2078 = vrot.lane.b32.xlu1 %v6753_v55, %s3458_s26 }
 0x4bb   :  { %2084 = vrot.lane.b32.xlu0 %v5349_v40, %s3458_s26 }
 0x4bc   :  { %v5808_v59 = vpop.permute.xlu1 %1694  ;;  %v5810_v8 = vpop.permute.xlu0 %1708 }
 0x4be   :  { %2094 = vrot.lane.b32.xlu1 %v6754_v38, %s3458_s26 }
 0x4bf   :  { %2092 = vrot.lane.b32.xlu0 %v6755_v2, %s3458_s26 }
 0x4c0   :  { %v5816_v58 = vpop.permute.xlu1 %1710  ;;  %v5818_v11 = vpop.permute.xlu0 %1756 }
 0x4c2   :  { %2086 = vrot.lane.b32.xlu1 %v5361_v47, %s3458_s26 }
 0x4c3   :  { %2100 = vrot.lane.b32.xlu0 %v5364_v41, %s3458_s26 }
 0x4c4   :  { %v5824_v15 = vpop.permute.xlu1 %1758  ;;  %v5826_v10 = vpop.permute.xlu0 %1772 }
 0x4c6   :  { %2102 = vrot.lane.b32.xlu1 %v5382_v56, %s3458_s26  ;;  %s2674_s26 = sshll.u32 %s3459_s7, 4  ;;  %s2675_s26 = int_to_ptr.vmem [resolvable:$true] %s2674_s26 }
 0x4c7   :  { %2154 = vperm.xlu0 %3122, %v2148_v3   ;;  %s3408_s17 = scalar_lea.vmem %s2675_s26, 2048  ;;  %p3413_p5 = scmp.lt.s32.totalorder %s2675_s26, %s2675_s26 }
 0x4c8   :  { %v5836_v63 = vpop.permute.xlu1 %1774  ;;  %v5838_v33 = vpop.permute.xlu0 %1820  ;;  %p3409_p4 = scmp.ne.s32.totalorder %s2675_s26, %s3408_s17  ;;  %p3414_p6 = scmp.lt.s32.totalorder %s3408_s17, %s3408_s17 }
 0x4ca   :  { %2159 = vperm.xlu1 %3123, %v2149_v1   ;;  %p3415_p7 = por %p3414_p6, %p3413_p5 }
 0x4cb   :  { %2164 = vperm.xlu0 %3122, %v2150_v43  }
 0x4cc   :  { %v5846_v50 = vpop.permute.xlu1 %1822  ;;  %v5848_v3 = vpop.permute.xlu0 %1836  ;;  %p3416_p8 = pnand %p3415_p7, %p3409_p4 }
 0x4ce   :  { %2169 = vperm.xlu1 %3123, %v2151_v31  }
 0x4d0   :  { %v5850_v38 = vpop.permute.xlu1 %1838  ;;  %v5852_v2 = vpop.permute.xlu0 %1884 }
 0x4d1   :  { %6756 = vst [vmem:[#allocation86_spill] sm:$0xff] %v5852_v2 }
 0x4d4   :  { %v5854_v55 = vpop.permute.xlu1 %1886  ;;  %v5856_v36 = vpop.permute.xlu0 %1900 }
 0x4d5   :  { %6757 = vst [vmem:[#allocation52_spill] sm:$0xff] %v5854_v55  ;;  %6758 = vst [vmem:[#allocation85_spill] sm:$0xff] %v5856_v36 }
 0x4d8   :  { %v5858_v56 = vpop.permute.xlu1 %1902  ;;  %v5860_v43 = vpop.permute.xlu0 %1948 }
 0x4d9   :  { %6759 = vst [vmem:[#allocation69_spill] sm:$0xff] %v5858_v56  ;;  %6760 = vst [vmem:[#allocation51_spill] sm:$0xff] %v5860_v43 }
 0x4dc   :  { %v5862_v1 = vpop.permute.xlu1 %1950  ;;  %v5864_v41 = vpop.permute.xlu0 %1964 }
 0x4dd   :  { %6761 = vst [vmem:[#allocation76_spill] sm:$0xff] %v5862_v1  ;;  %6762 = vst [vmem:[#allocation57_spill] sm:$0xff] %v5864_v41  ;;  %v6768_v41 = vld [vmem:[#allocation53_spill] sm:$0xff] }
 0x4e0   :  { %v5866_v18 = vpop.permute.xlu1 %1966  ;;  %v5868_v47 = vpop.permute.xlu0 %2012 }
 0x4e1   :  { %6763 = vst [vmem:[#allocation77_spill] sm:$0xff] %v5866_v18  ;;  %6764 = vst [vmem:[#allocation39_spill] sm:$0xff] %v5868_v47 }
 0x4e4   :  { %v5870_v31 = vpop.permute.xlu1 %2014  ;;  %v5872_v40 = vpop.permute.xlu0 %2028 }
 0x4e5   :  { %6765 = vst [vmem:[#allocation89_spill] sm:$0xff] %v5870_v31  ;;  %6766 = vst [vmem:[#allocation90_spill] sm:$0xff] %v5872_v40 }
 0x4e8   :  { %v5874_v2 = vpop.permute.xlu1 %2030  ;;  %v1637_v55 = vpop.permute.xlu0 %1636 }
 0x4e9   :  { %6767 = vst [vmem:[#allocation91_spill] sm:$0xff] %v5874_v2  ;;  %v1666_v56 = vsel %vm491_vm1, %v1629_v57, %v1637_v55  ;;  %v1662_v7 = vsel %vm491_vm1, %v1637_v55, %v1645_v22 }
 0x4ea   :  { %v1681_v4 = vmul.f32 %v1666_v56, %v6768_v41 }
 0x4ec   :  { %v1639_v36 = vpop.permute.xlu1 %1638  ;;  %v1653_v1 = vpop.permute.xlu0 %1652 }
 0x4ed   :  { %v1667_v43 = vsel %vm491_vm1, %v1631_v49, %v1639_v36  ;;  %v1663_v47 = vsel %vm491_vm1, %v1639_v36, %v1647_v44  ;;  %v1658_v40 = vsel %vm491_vm1, %v1645_v22, %v1653_v1  ;;  %v1670_v2 = vsel %vm491_vm1, %v1653_v1, %v1629_v57 }
 0x4ee   :  { %v1685_v31 = vmul.f32 %v1667_v43, %v6768_v41  ;;  %v1686_v46 = vmul.f32 %v1663_v47, %v4079_v61  ;;  %v1680_v43 = vmul.f32 %v1670_v2, %v4055_v19  ;;  %v1683_v62 = vmul.f32 %v1658_v40, %v4058_v45 }
 0x4ef   :  { %v1682_v22 = vmul.f32 %v1662_v7, %v4079_v61 }
 0x4f0   :  { %v1655_v18 = vpop.permute.xlu1 %1654  ;;  %v2896_v52 = vpack.c.bf16 %v1685_v31, %v1681_v4  ;;  %v1701_v41 = vpop.permute.xlu0 %1700 }
 0x4f1   :  { %v1659_v56 = vsel %vm491_vm1, %v1647_v44, %v1655_v18  ;;  %v1671_v36 = vsel %vm491_vm1, %v1655_v18, %v1631_v49  ;;  %v1730_v47 = vsel %vm572_vm2, %v5802_v53, %v1701_v41  ;;  %v2970_v40 = vpack.c.bf16 %v1686_v46, %v1682_v22 }
 0x4f2   :  { %v1684_v57 = vmul.f32 %v1671_v36, %v4055_v19  ;;  %v1687_v4 = vmul.f32 %v1659_v56, %v4058_v45  ;;  %2897 = vmatprep.subr.bf16.mxu0 %v2896_v52  ;;  %v1745_v19 = vmul.f32 %v1730_v47, %v3701_v5  ;;  %v6769_v46 = vpack.c.bf16 %v5425_v39, %v5419_v54 }
 0x4f3   :  { %v6770_v54 = vpack.c.bf16 %v5460_v28, %v5454_v35 }
 0x4f4   :  { %v2898_v44 = vpack.c.bf16 %v1684_v57, %v1680_v43  ;;  %v1703_v55 = vpop.permute.xlu1 %1702  ;;  %v2968_v1 = vpack.c.bf16 %v1687_v4, %v1683_v62  ;;  %v1717_v2 = vpop.permute.xlu0 %1716  ;;  %v6772_v57 = vpack.c.bf16 %v5428_v25, %v5422_v21 }
 0x4f5   :  { %v1731_v18 = vsel %vm572_vm2, %v5808_v59, %v1703_v55  ;;  %v1727_v45 = vsel %vm572_vm2, %v1703_v55, %v5816_v58  ;;  %v1722_v61 = vsel %vm572_vm2, %v5810_v8, %v1717_v2  ;;  %v1734_v62 = vsel %vm572_vm2, %v1717_v2, %v5802_v53 }
 0x4f6   :  { %v1749_v52 = vmul.f32 %v1731_v18, %v3701_v5  ;;  %2899 = vmatpush1.bf16.msra.mxu0 %v2898_v44  ;;  %2969 = vmatprep.subr.bf16.mxu1 %v2968_v1  ;;  %v1726_v5 = vsel %vm572_vm2, %v1701_v41, %v5810_v8  ;;  %v1750_v31 = vmul.f32 %v1727_v45, %v3704_v6 }
 0x4f7   :  { %2901 = vmatprep.subr.bf16.mxu0 %v6769_v46  ;;  %2971 = vmatpush1.bf16.msra.mxu1 %v2970_v40  ;;  %v1744_v36 = vmul.f32 %v1734_v62, %v3718_v12  ;;  %v1747_v43 = vmul.f32 %v1722_v61, %v3721_v13  ;;  %v1746_v35 = vmul.f32 %v1726_v5, %v3704_v6 }
 0x4f8   :  { %v1719_v7 = vpop.permute.xlu1 %1718  ;;  %v2904_v49 = vpack.c.bf16 %v1749_v52, %v1745_v19  ;;  %2973 = vmatprep.subr.bf16.mxu1 %v6770_v54  ;;  %v1765_v39 = vpop.permute.xlu0 %1764  ;;  %v6773_v44 = vpack.c.bf16 %v5489_v0, %v5483_v34  ;;  %v6774_v34 = vpack.c.bf16 %v5524_v9, %v5518_v60  ;;  %v6776_v52 = vld [vmem:[#allocation45_spill] sm:$0xff]  ;;  %v6778_v5 = vpack.c.bf16 %v5553_v17, %v5547_v32 }
 0x4f9   :  { %v1723_v56 = vsel %vm572_vm2, %v5816_v58, %v1719_v7  ;;  %v1735_v53 = vsel %vm572_vm2, %v1719_v7, %v5808_v59  ;;  %v6771_v58 = vpack.c.bf16 %v5457_v14, %v5451_v24  ;;  %v1794_v59 = vsel %vm653_vm3, %v5818_v11, %v1765_v39 }
 0x4fa   :  { %v1748_v8 = vmul.f32 %v1735_v53, %v3718_v12  ;;  %v1751_v41 = vmul.f32 %v1723_v56, %v3721_v13  ;;  %v2978_v14 = vpack.c.bf16 %v1750_v31, %v1746_v35  ;;  %v1809_v47 = vmul.f32 %v1794_v59, %v3735_v26  ;;  %v6779_v53 = vld [vmem:[#allocation18_spill] sm:$0xff]  ;;  %v6783_v59 = vld [vmem:[#allocation43_spill] sm:$0xff] }
 0x4fb   :  { %2903 = vmatpush1.bf16.msra.mxu0 %v6771_v58  ;;  %2975 = vmatpush1.bf16.msra.mxu1 %v6772_v57  ;;  %v6777_v61 = vpack.c.bf16 %v5492_v16, %v6776_v52  ;;  %v6780_v17 = vpack.c.bf16 %v5588_v42, %v5582_v37  ;;  %v6786_v42 = vld [vmem:[#allocation62_spill] sm:$0xff]  ;;  %v6787_v37 = vld [vmem:[#allocation61_spill] sm:$0xff] }
 0x4fc   :  { %2905 = vmatprep.subr.bf16.mxu0 %v2904_v49  ;;  %v2906_v28 = vpack.c.bf16 %v1748_v8, %v1744_v36  ;;  %v1767_v4 = vpop.permute.xlu1 %1766  ;;  %v2976_v12 = vpack.c.bf16 %v1751_v41, %v1747_v43  ;;  %v1781_v24 = vpop.permute.xlu0 %1780  ;;  %v6781_v36 = vld [vmem:[#allocation19_spill] sm:$0xff]  ;;  %v6782_v8 = vld [vmem:[#allocation20_spill] sm:$0xff]  ;;  %v6788_v57 = vpack.c.bf16 %v6786_v42, %v6787_v37  ;;  %v6803_v52 = vld [vmem:[#allocation74_spill] sm:$0xff] }
 0x4fd   :  { %v1795_v13 = vsel %vm653_vm3, %v5824_v15, %v1767_v4  ;;  %v1791_v22 = vsel %vm653_vm3, %v1767_v4, %v5836_v63  ;;  %v1786_v21 = vsel %vm653_vm3, %v5826_v10, %v1781_v24  ;;  %v1798_v25 = vsel %vm653_vm3, %v1781_v24, %v5818_v11  ;;  %v6789_v24 = vld [vmem:[#allocation36_spill] sm:$0xff]  ;;  %v6818_v42 = vld [vmem:[#allocation23_spill] sm:$0xff] }
 0x4fe   :  { %v1813_v6 = vmul.f32 %v1795_v13, %v3735_v26  ;;  %2977 = vmatprep.subr.bf16.mxu1 %v2976_v12  ;;  %v1790_v26 = vsel %vm653_vm3, %v1765_v39, %v5826_v10  ;;  %v1814_v18 = vmul.f32 %v1791_v22, %v3738_v27  ;;  %v1808_v40 = vmul.f32 %v1798_v25, %v3748_v29 }
 0x4ff   :  { %2907 = vmatpush1.bf16.msra.mxu0 %v2906_v28  ;;  %2979 = vmatpush1.bf16.msra.mxu1 %v2978_v14  ;;  %v1811_v19 = vmul.f32 %v1786_v21, %v3751_v30  ;;  %v1810_v9 = vmul.f32 %v1790_v26, %v3738_v27  ;;  %v6790_v14 = vld [vmem:[#allocation55_spill] sm:$0xff]  ;;  %v6792_v21 = vld [vmem:[#allocation72_spill] sm:$0xff]  ;;  %v6794_v26 = vld [vmem:[#allocation41_spill] sm:$0xff] }
 0x500   :  { %2909 = vmatprep.subr.bf16.mxu0 %v6773_v44  ;;  %v1783_v55 = vpop.permute.xlu1 %1782  ;;  %v2912_v1 = vpack.c.bf16 %v1813_v6, %v1809_v47  ;;  %2981 = vmatprep.subr.bf16.mxu1 %v6774_v34  ;;  %v1829_v0 = vpop.permute.xlu0 %1828  ;;  %v2924_v47 = vpack.c.bf16 %v6790_v14, %v6789_v24  ;;  %v6791_v6 = vld [vmem:[#allocation38_spill] sm:$0xff]  ;;  %v6820_v14 = vld [vmem:[#allocation64_spill] sm:$0xff] }
 0x501   :  { %v1787_v2 = vsel %vm653_vm3, %v5836_v63, %v1783_v55  ;;  %v1799_v11 = vsel %vm653_vm3, %v1783_v55, %v5824_v15  ;;  %v6775_v63 = vpack.c.bf16 %v5521_v20, %v5515_v23  ;;  %v1858_v15 = vsel %vm734_vm4, %v5838_v33, %v1829_v0 }
 0x502   :  { %v1812_v10 = vmul.f32 %v1799_v11, %v3748_v29  ;;  %v1815_v45 = vmul.f32 %v1787_v2, %v3751_v30  ;;  %v2986_v23 = vpack.c.bf16 %v1814_v18, %v1810_v9  ;;  %v1873_v46 = vmul.f32 %v1858_v15, %v6599_v48  ;;  %v6795_v2 = vld [vmem:[#allocation71_spill] sm:$0xff]  ;;  %v6796_v11 = vld [vmem:[#allocation37_spill] sm:$0xff] }
 0x503   :  { %2911 = vmatpush1.bf16.msra.mxu0 %v6775_v63  ;;  %2983 = vmatpush1.bf16.msra.mxu1 %v6777_v61  ;;  %v2996_v25 = vpack.c.bf16 %v6792_v21, %v6791_v6  ;;  %v6797_v34 = vpack.c.bf16 %v6795_v2, %v6796_v11  ;;  %v6801_v63 = vld [vmem:[#allocation60_spill] sm:$0xff]  ;;  %v6802_v15 = vld [vmem:[#allocation59_spill] sm:$0xff]  ;;  %v6823_v6 = vld [vmem:[#allocation57_spill] sm:$0xff] }
 0x504   :  { %2913 = vmatprep.subr.bf16.mxu0 %v2912_v1  ;;  %v2914_v60 = vpack.c.bf16 %v1812_v10, %v1808_v40  ;;  %v1831_v62 = vpop.permute.xlu1 %1830  ;;  %v2984_v29 = vpack.c.bf16 %v1815_v45, %v1811_v19  ;;  %v1845_v20 = vpop.permute.xlu0 %1844  ;;  %v6793_v1 = vld [vmem:[#allocation58_spill] sm:$0xff]  ;;  %v6800_v10 = vld [vmem:[#allocation85_spill] sm:$0xff]  ;;  %v3000_v9 = vpack.c.bf16 %v6802_v15, %v6801_v63  ;;  %v6804_v61 = vld [vmem:[#allocation56_spill] sm:$0xff] }
 0x505   :  { %v1859_v30 = vsel %vm734_vm4, %v5846_v50, %v1831_v62  ;;  %v1855_v7 = vsel %vm734_vm4, %v1831_v62, %v5850_v38  ;;  %v1850_v16 = vsel %vm734_vm4, %v5848_v3, %v1845_v20  ;;  %v1862_v49 = vsel %vm734_vm4, %v1845_v20, %v5838_v33  ;;  %v6799_v40 = vld [vmem:[#allocation54_spill] sm:$0xff]  ;;  %v6806_v20 = vld [vmem:[#allocation52_spill] sm:$0xff] }
 0x506   :  { %v1877_v27 = vmul.f32 %v1859_v30, %v6599_v48  ;;  %2985 = vmatprep.subr.bf16.mxu1 %v2984_v29  ;;  %v1854_v48 = vsel %vm734_vm4, %v1829_v0, %v5848_v3  ;;  %v1878_v54 = vmul.f32 %v1855_v7, %v6779_v53  ;;  %v1872_v43 = vmul.f32 %v1862_v49, %v6781_v36  ;;  %v6798_v0 = vld [vmem:[#allocation17_spill] sm:$0xff]  ;;  %v6807_v7 = vld [vmem:[#allocation86_spill] sm:$0xff] }
 0x507   :  { %2915 = vmatpush1.bf16.msra.mxu0 %v2914_v60  ;;  %2987 = vmatpush1.bf16.msra.mxu1 %v2986_v23  ;;  %v1875_v3 = vmul.f32 %v1850_v16, %v6782_v8  ;;  %v2928_v18 = vpack.c.bf16 %v6794_v26, %v6793_v1  ;;  %v2998_v19 = vpack.c.bf16 %v6799_v40, %v6798_v0  ;;  %v6805_v29 = vld [vmem:[#allocation69_spill] sm:$0xff]  ;;  %v6808_v16 = vld [vmem:[#allocation22_spill] sm:$0xff]  ;;  %v6824_v1 = vld [vmem:[#allocation47_spill] sm:$0xff] }
 0x508   :  { %2917 = vmatprep.subr.bf16.mxu0 %v6778_v5  ;;  %v1847_v31 = vpop.permute.xlu1 %1846  ;;  %v2920_v56 = vpack.c.bf16 %v1877_v27, %v1873_v46  ;;  %2989 = vmatprep.subr.bf16.mxu1 %v6780_v17  ;;  %v6021_v32 = vpop.permute.xlu0 %2088  ;;  %v2930_v62 = vpack.c.bf16 %v6804_v61, %v6803_v52  ;;  %v6825_v26 = vld [vmem:[#allocation15_spill] sm:$0xff]  ;;  %v6828_v40 = vld [vmem:[#allocation76_spill] sm:$0xff]  ;;  %v6830_v15 = vld [vmem:[#allocation26_spill] sm:$0xff] }
 0x509   :  { %v1851_v39 = vsel %vm734_vm4, %v5850_v38, %v1847_v31  ;;  %v1863_v33 = vsel %vm734_vm4, %v1847_v31, %v5846_v50  ;;  %v6784_v38 = vld [vmem:[#allocation44_spill] sm:$0xff]  ;;  %v1874_v50 = vmul.f32 %v1854_v48, %v6779_v53  ;;  %v6809_v31 = vld [vmem:[#allocation73_spill] sm:$0xff] }
 0x50a   :  { %v1876_v41 = vmul.f32 %v1863_v33, %v6781_v36  ;;  %v1879_v58 = vmul.f32 %v1851_v39, %v6782_v8  ;;  %v6785_v35 = vpack.c.bf16 %v6783_v59, %v6784_v38  ;;  %v6811_v39 = vld [vmem:[#allocation16_spill] sm:$0xff]  ;;  %v6812_v33 = vld [vmem:[#allocation63_spill] sm:$0xff]  ;;  %v6814_v36 = vld [vmem:[#allocation21_spill] sm:$0xff] }
 0x50b   :  { %2991 = vmatpush1.bf16.msra.mxu1 %v6788_v57  ;;  %v2994_v22 = vpack.c.bf16 %v1878_v54, %v1874_v50  ;;  %v6813_v17 = vpack.c.bf16 %v6811_v39, %v6812_v33  ;;  %v6815_v38 = vld [vmem:[#allocation49_spill] sm:$0xff]  ;;  %v6819_v57 = vld [vmem:[#allocation24_spill] sm:$0xff] }
 0x50c   :  { %2919 = vmatpush1.bf16.msra.mxu0 %v6785_v35  ;;  %v2922_v28 = vpack.c.bf16 %v1876_v41, %v1872_v43  ;;  %v6034_v4 = vpop.permute.xlu1 %2090  ;;  %v2992_v12 = vpack.c.bf16 %v1879_v58, %v1875_v3  ;;  %v1893_v13 = vpop.permute.xlu0 %1892  ;;  %v6816_v35 = vld [vmem:[#allocation65_spill] sm:$0xff]  ;;  %v6839_v39 = vld [vmem:[#allocation28_spill] sm:$0xff] }
 0x50d   :  { %2921 = vmatprep.subr.bf16.mxu0 %v2920_v56  ;;  %v1918_v45 = vsel %vm815_vm5, %v1893_v13, %v6800_v10  ;;  %v1922_v27 = vsel %vm815_vm5, %v6807_v7, %v1893_v13  ;;  %v6810_v56 = vld [vmem:[#allocation75_spill] sm:$0xff]  ;;  %v6817_v50 = vpack.c.bf16 %v6815_v38, %v6816_v35  ;;  %v6844_v35 = vld [vmem:[#allocation66_spill] sm:$0xff] }
 0x50e   :  { %2993 = vmatprep.subr.bf16.mxu1 %v2992_v12  ;;  %v1937_v49 = vmul.f32 %v1918_v45, %v6808_v16  ;;  %v3002_v48 = vpack.c.bf16 %v6810_v56, %v6809_v31  ;;  %v1936_v41 = vmul.f32 %v1922_v27, %v6814_v36  ;;  %v6829_v45 = vld [vmem:[#allocation51_spill] sm:$0xff]  ;;  %v6836_v31 = vld [vmem:[#allocation34_spill] sm:$0xff] }
 0x50f   :  { %2995 = vmatpush1.bf16.msra.mxu1 %v2994_v22 }
 0x510   :  { %2923 = vmatpush1.bf16.msra.mxu0 %v2922_v28  ;;  %v6040_v44 = vpop.permute.xlu1 %2098  ;;  %2997 = vmatprep.subr.bf16.mxu1 %v2996_v25  ;;  %v1909_v55 = vpop.permute.xlu0 %1908 }
 0x511   :  { %2925 = vmatprep.subr.bf16.mxu0 %v2924_v47  ;;  %v1914_v53 = vsel %vm815_vm5, %v6800_v10, %v1909_v55  ;;  %v1926_v54 = vsel %vm815_vm5, %v1909_v55, %v6807_v7  ;;  %v6821_v47 = vld [vmem:[#allocation46_spill] sm:$0xff] }
 0x512   :  { %v1938_v37 = vmul.f32 %v1914_v53, %v6818_v42  ;;  %v1939_v12 = vmul.f32 %v1926_v54, %v6819_v57  ;;  %v6822_v22 = vpack.c.bf16 %v6820_v14, %v6821_v47  ;;  %v6838_v53 = vld [vmem:[#allocation27_spill] sm:$0xff]  ;;  %v6849_v14 = vld [vmem:[#allocation89_spill] sm:$0xff] }
 0x513   :  { %2999 = vmatpush1.bf16.msra.mxu1 %v2998_v19 }
 0x514   :  { %2927 = vmatpush1.bf16.msra.mxu0 %v6797_v34  ;;  %v1895_v60 = vpop.permute.xlu1 %1894  ;;  %3001 = vmatprep.subr.bf16.mxu1 %v3000_v9  ;;  %v1957_v46 = vpop.permute.xlu0 %1956  ;;  %v6827_v34 = vld [vmem:[#allocation77_spill] sm:$0xff] }
 0x515   :  { %2929 = vmatprep.subr.bf16.mxu0 %v2928_v18  ;;  %v1919_v30 = vsel %vm815_vm5, %v1895_v60, %v6805_v29  ;;  %v1923_v23 = vsel %vm815_vm5, %v6806_v20, %v1895_v60  ;;  %v1982_v21 = vsel %vm896_vm6, %v1957_v46, %v6823_v6  ;;  %v6826_v18 = vpack.c.bf16 %v6824_v1, %v6825_v26  ;;  %v6852_v1 = vld [vmem:[#allocation30_spill] sm:$0xff] }
 0x516   :  { %v1941_v5 = vmul.f32 %v1919_v30, %v6808_v16  ;;  %v1940_v43 = vmul.f32 %v1923_v23, %v6814_v36  ;;  %v1986_v63 = vsel %vm896_vm6, %v6829_v45, %v1957_v46  ;;  %v2001_v9 = vmul.f32 %v1982_v21, %v6830_v15 }
 0x517   :  { %3003 = vmatpush1.bf16.msra.mxu1 %v3002_v48 }
 0x518   :  { %2931 = vmatpush1.bf16.msra.mxu0 %v2930_v62  ;;  %v1911_v8 = vpop.permute.xlu1 %1910  ;;  %v2936_v3 = vpack.c.bf16 %v1941_v5, %v1937_v49  ;;  %3005 = vmatprep.subr.bf16.mxu1 %v6817_v50  ;;  %v2938_v25 = vpack.c.bf16 %v1940_v43, %v1936_v41  ;;  %v6831_v62 = vld [vmem:[#allocation33_spill] sm:$0xff]  ;;  %v6835_v5 = vld [vmem:[#allocation48_spill] sm:$0xff]  ;;  %v6840_v43 = vld [vmem:[#allocation78_spill] sm:$0xff] }
 0x519   :  { %2933 = vmatprep.subr.bf16.mxu0 %v6813_v17  ;;  %v1915_v58 = vsel %vm815_vm5, %v6805_v29, %v1911_v8  ;;  %v1927_v59 = vsel %vm815_vm5, %v1911_v8, %v6806_v20  ;;  %v1973_v28 = vpop.permute.xlu0 %1972  ;;  %v6832_v29 = vld [vmem:[#allocation79_spill] sm:$0xff]  ;;  %v6834_v20 = vld [vmem:[#allocation25_spill] sm:$0xff]  ;;  %v6837_v56 = vpack.c.bf16 %v6835_v5, %v6836_v31  ;;  %v6841_v8 = vld [vmem:[#allocation80_spill] sm:$0xff] }
 0x51a   :  { %v1942_v13 = vmul.f32 %v1915_v58, %v6818_v42  ;;  %v1943_v24 = vmul.f32 %v1927_v59, %v6819_v57  ;;  %v1978_v52 = vsel %vm896_vm6, %v6823_v6, %v1973_v28  ;;  %v1990_v61 = vsel %vm896_vm6, %v1973_v28, %v6829_v45  ;;  %v6843_v41 = vld [vmem:[#allocation90_spill] sm:$0xff]  ;;  %v6845_v50 = vld [vmem:[#allocation35_spill] sm:$0xff]  ;;  %v6847_v57 = vld [vmem:[#allocation88_spill] sm:$0xff] }
 0x51b   :  { %3007 = vmatpush1.bf16.msra.mxu1 %v6826_v18  ;;  %v6833_v30 = vpack.c.bf16 %v6831_v62, %v6832_v29  ;;  %v2000_v27 = vmul.f32 %v1986_v63, %v6834_v20  ;;  %v2002_v54 = vmul.f32 %v1978_v52, %v6838_v53  ;;  %v2003_v33 = vmul.f32 %v1990_v61, %v6839_v39  ;;  %v6850_v6 = vld [vmem:[#allocation40_spill] sm:$0xff] }
 0x51c   :  { %2935 = vmatpush1.bf16.msra.mxu0 %v6822_v22  ;;  %v3010_v55 = vpack.c.bf16 %v1942_v13, %v1938_v37  ;;  %v1959_v2 = vpop.permute.xlu1 %1958  ;;  %v3008_v11 = vpack.c.bf16 %v1943_v24, %v1939_v12  ;;  %v6846_v28 = vpack.c.bf16 %v6844_v35, %v6845_v50  ;;  %v2109_v12 = vsel %vm1058_vm8, %v6847_v57, %v6034_v4  ;;  %v6848_v13 = vld [vmem:[#allocation91_spill] sm:$0xff]  ;;  %v6178_v45 = vld [vmem:[#allocation5 + $0x28] ss:$0 sm:$0xff]  ;;  %v6868_v50 = vld [vmem:[#allocation82_spill] sm:$0xff] }
 0x51d   :  { %2937 = vmatprep.subr.bf16.mxu0 %v2936_v3  ;;  %v1983_v0 = vsel %vm896_vm6, %v1959_v2, %v6827_v34  ;;  %v1987_v19 = vsel %vm896_vm6, %v6828_v40, %v1959_v2  ;;  %v2021_v10 = vpop.permute.xlu0 %2020  ;;  %v6842_v3 = vpack.c.bf16 %v6840_v43, %v6841_v8  ;;  %v2113_v21 = vsel %vm1058_vm8, %v6850_v6, %v6847_v57  ;;  %v6853_v2 = vld [vmem:[#allocation84_spill] sm:$0xff]  ;;  %v6214_v8 = vld [vmem:[#allocation5 + $0x38] ss:$0 sm:$0xff]  ;;  %v6867_v35 = vld [vmem:[#allocation87_spill] sm:$0xff] }
 0x51e   :  { %v2005_v60 = vmul.f32 %v1983_v0, %v6830_v15  ;;  %3009 = vmatprep.subr.bf16.mxu1 %v3008_v11  ;;  %v2004_v23 = vmul.f32 %v1987_v19, %v6834_v20  ;;  %v2046_v58 = vsel %vm977_vm7, %v2021_v10, %v6843_v41  ;;  %v2108_v11 = vsel %vm1058_vm8, %v6853_v2, %v6021_v32  ;;  %v6855_v19 = vld [vmem:[#allocation67_spill] sm:$0xff]  ;;  %v6857_v15 = vld [vmem:[#allocation29_spill] sm:$0xff]  ;;  %v6863_v31 = vld [vmem:[#allocation32_spill] sm:$0xff] }
 0x51f   :  { %3011 = vmatpush1.bf16.msra.mxu1 %v3010_v55  ;;  %v2065_v26 = vmul.f32 %v2046_v58, %v6852_v1  ;;  %v2125_v63 = vmul.f32 %v6178_v45, %v2109_v12  ;;  %v2117_v29 = vsel %vm1058_vm8, %v6040_v44, %v6850_v6 }
 0x520   :  { %2939 = vmatpush1.bf16.msra.mxu0 %v2938_v25  ;;  %v1975_v46 = vpop.permute.xlu1 %1974  ;;  %v2944_v7 = vpack.c.bf16 %v2005_v60, %v2001_v9  ;;  %3013 = vmatprep.subr.bf16.mxu1 %v6837_v56  ;;  %v2946_v59 = vpack.c.bf16 %v2004_v23, %v2000_v27  ;;  %v6851_v25 = vld [vmem:[#allocation39_spill] sm:$0xff]  ;;  %v6858_v60 = vld [vmem:[#allocation42_spill] sm:$0xff]  ;;  %v2127_v57 = vmul.f32 %v6214_v8, %v2117_v29 }
 0x521   :  { %2941 = vmatprep.subr.bf16.mxu0 %v6833_v30  ;;  %v1979_v16 = vsel %vm896_vm6, %v6827_v34, %v1975_v46  ;;  %v1991_v49 = vsel %vm896_vm6, %v1975_v46, %v6828_v40  ;;  %v2037_v48 = vpop.permute.xlu0 %2036  ;;  %v2050_v55 = vsel %vm977_vm7, %v6851_v25, %v2021_v10  ;;  %v6854_v40 = vld [vmem:[#allocation68_spill] sm:$0xff]  ;;  %v6859_v46 = vld [vmem:[#allocation70_spill] sm:$0xff] }
 0x522   :  { %v2006_v17 = vmul.f32 %v1979_v16, %v6838_v53  ;;  %v2007_v36 = vmul.f32 %v1991_v49, %v6839_v39  ;;  %v2042_v34 = vsel %vm977_vm7, %v6843_v41, %v2037_v48  ;;  %v2054_v0 = vsel %vm977_vm7, %v2037_v48, %v6851_v25  ;;  %v6862_v49 = vld [vmem:[#allocation31_spill] sm:$0xff]  ;;  %v6865_v39 = vld [vmem:[#allocation50_spill] sm:$0xff] }
 0x523   :  { %3015 = vmatpush1.bf16.msra.mxu1 %v6846_v28  ;;  %v6856_v10 = vpack.c.bf16 %v6854_v40, %v6855_v19  ;;  %v2064_v30 = vmul.f32 %v2050_v55, %v6857_v15  ;;  %v2066_v5 = vmul.f32 %v2042_v34, %v6862_v49  ;;  %v2067_v56 = vmul.f32 %v2054_v0, %v6863_v31  ;;  %v3318_v41 = vld [vmem:[#allocation5 + $0x20] ss:$0 sm:$0xff] }
 0x524   :  { %2943 = vmatpush1.bf16.msra.mxu0 %v6842_v3  ;;  %v3018_v38 = vpack.c.bf16 %v2006_v17, %v2002_v54  ;;  %v2023_v42 = vpop.permute.xlu1 %2022  ;;  %v3016_v37 = vpack.c.bf16 %v2007_v36, %v2003_v33  ;;  %v6864_v54 = vld [vmem:[#allocation83_spill] sm:$0xff]  ;;  %v2112_v17 = vsel %vm1058_vm8, %v6858_v60, %v6853_v2  ;;  %v2121_v36 = vmul.f32 %v6178_v45, %v2108_v11  ;;  %v2143_v11 = vld [vmem:[#allocation8 + $0x38] sm:$0xff] }
 0x525   :  { %2945 = vmatprep.subr.bf16.mxu0 %v2944_v7  ;;  %v2047_v24 = vsel %vm977_vm7, %v2023_v42, %v6848_v13  ;;  %v2051_v47 = vsel %vm977_vm7, %v6849_v14, %v2023_v42  ;;  %v2097_v22 = vpop.permute.xlu0 %2096  ;;  %v6860_v7 = vld [vmem:[#allocation81_spill] sm:$0xff]  ;;  %v6866_v33 = vpack.c.bf16 %v6864_v54, %v6865_v39  ;;  %v2124_v58 = vmul.f32 %v3318_v41, %v2113_v21  ;;  %v2140_v21 = vld [vmem:[#allocation8 + $0x20] sm:$0xff]  ;;  %v2147_v54 = vld [vmem:[#allocation8 + $0x58] sm:$0xff] }
 0x526   :  { %v2069_v18 = vmul.f32 %v2047_v24, %v6852_v1  ;;  %3017 = vmatprep.subr.bf16.mxu1 %v3016_v37  ;;  %v2068_v9 = vmul.f32 %v2051_v47, %v6857_v15  ;;  %v2116_v52 = vsel %vm1058_vm8, %v2097_v22, %v6858_v60  ;;  %v6861_v27 = vpack.c.bf16 %v6859_v46, %v6860_v7 }
 0x527   :  { %3019 = vmatpush1.bf16.msra.mxu1 %v3018_v38  ;;  %v2104_v43 = vsel %vm1058_vm8, %v6021_v32, %v2097_v22  ;;  %v2123_v3 = vmul.f32 %v6214_v8, %v2116_v52  ;;  %v6869_v28 = vpack.c.bf16 %v6867_v35, %v6868_v50  ;;  %v2105_v32 = vsel %vm1058_vm8, %v6034_v4, %v6040_v44  ;;  %v2136_v22 = vld [vmem:[#allocation8] sm:$0xff]  ;;  %v2142_v52 = vld [vmem:[#allocation8 + $0x30] sm:$0xff] }
 0x528   :  { %2947 = vmatpush1.bf16.msra.mxu0 %v2946_v59  ;;  %v2039_v61 = vpop.permute.xlu1 %2038  ;;  %v2952_v62 = vpack.c.bf16 %v2069_v18, %v2065_v26  ;;  %3021 = vmatprep.subr.bf16.mxu1 %v6861_v27  ;;  %v2954_v59 = vpack.c.bf16 %v2068_v9, %v2064_v30  ;;  %v2120_v24 = vmul.f32 %v3318_v41, %v2112_v17  ;;  %v2139_v18 = vld [vmem:[#allocation8 + $0x18] sm:$0xff] }
 0x529   :  { %2949 = vmatprep.subr.bf16.mxu0 %v6856_v10  ;;  %v2043_v20 = vsel %vm977_vm7, %v6848_v13, %v2039_v61  ;;  %v2055_v23 = vsel %vm977_vm7, %v2039_v61, %v6849_v14  ;;  %v2077_v16 = vpop.permute.xlu0 %2076  ;;  %v2956_v13 = vpack.c.bf16 %v2125_v63, %v2121_v36  ;;  %v3319_v14 = vld [vmem:[#allocation5 + $0x30] ss:$0 sm:$0xff]  ;;  %v3028_v6 = vpack.c.bf16 %v2127_v57, %v2123_v3 }
 0x52a   :  { %v2070_v48 = vmul.f32 %v2043_v20, %v6862_v49  ;;  %v2071_v53 = vmul.f32 %v2055_v23, %v6863_v31  ;;  %v2122_v47 = vmul.f32 %v3319_v14, %v2104_v43  ;;  %v2958_v25 = vpack.c.bf16 %v2124_v58, %v2120_v24 }
 0x52b   :  { %3023 = vmatpush1.bf16.msra.mxu1 %v6869_v28  ;;  %v2126_v55 = vmul.f32 %v3319_v14, %v2105_v32 }
 0x52c   :  { %2951 = vmatpush1.bf16.msra.mxu0 %v6866_v33  ;;  %v3026_v38 = vpack.c.bf16 %v2070_v48, %v2066_v5  ;;  %v2079_v42 = vpop.permute.xlu1 %2078  ;;  %v3024_v37 = vpack.c.bf16 %v2071_v53, %v2067_v56  ;;  %v6870_v56 = vmov 0.0   ;;  %v2141_v48 = vld [vmem:[#allocation8 + $0x28] sm:$0xff]  ;;  %v2144_v53 = vld [vmem:[#allocation8 + $0x40] sm:$0xff] }
 0x52d   :  { %2953 = vmatprep.subr.bf16.mxu0 %v2952_v62  ;;  %v2085_v12 = vpop.permute.xlu0 %2084  ;;  %v3030_v4 = vpack.c.bf16 %v2126_v55, %v2122_v47  ;;  %v2146_v62 = vld [vmem:[#allocation8 + $0x50] sm:$0xff] }
 0x52e   :  { %3025 = vmatprep.subr.bf16.mxu1 %v3024_v37  ;;  %v2114_v44 = vsel %vm1058_vm8, %v2077_v16, %v2085_v12 }
 0x52f   :  { %3027 = vmatpush1.bf16.msra.mxu1 %v3026_v38  ;;  %v2128_v0 = vmul.f32 %v3318_v41, %v2114_v44 }
 0x530   :  { %2955 = vmatpush1.bf16.msra.mxu0 %v2954_v59  ;;  %v2095_v1 = vpop.permute.xlu1 %2094  ;;  %3029 = vmatprep.subr.bf16.mxu1 %v3028_v6 }
 0x531   :  { %2957 = vmatprep.subr.bf16.mxu0 %v2956_v13  ;;  %v2093_v26 = vpop.permute.xlu0 %2092 }
 0x532   :  { %v2110_v2 = vsel %vm1058_vm8, %v2085_v12, %v2093_v26  ;;  %2427 = vmatmul.mubr.f32.vlgmr.msra.gmra.mrb[16].mxu1 %v2136_v22 }
 0x533   :  { %2249 = vmatmul.mubr.f32.vlgmr.msra.gmra.mrb[16].mxu0 %v2136_v22  ;;  %3031 = vmatpush1.bf16.msra.mxu1 %v3030_v4  ;;  %v2129_v63 = vmul.f32 %v6178_v45, %v2110_v2 }
 0x534   :  { %2959 = vmatpush1.bf16.msra.mxu0 %v2958_v25  ;;  %2254 = vmatprep.mubr.f32.mxu0 %v2140_v21  ;;  %v2087_v34 = vpop.permute.xlu1 %2086 }
 0x535   :  { %2432 = vmatprep.mubr.f32.mxu1 %v2140_v21  ;;  %v2111_v40 = vsel %vm1058_vm8, %v2087_v34, %v2095_v1  ;;  %v2115_v19 = vsel %vm1058_vm8, %v2079_v42, %v2087_v34  ;;  %v2101_v10 = vpop.permute.xlu0 %2100 }
 0x536   :  { %v2132_v15 = vmul.f32 %v3318_v41, %v2115_v19  ;;  %v2133_v9 = vmul.f32 %v6178_v45, %v2111_v40  ;;  %v2106_v60 = vsel %vm1058_vm8, %v2093_v26, %v2101_v10  ;;  %v2118_v61 = vsel %vm1058_vm8, %v2101_v10, %v2077_v16  ;;  %2433 = vmatmul.mubr.f32.gmra.mrb[18].mxu1 %v2139_v18  ;;  %v2145_v16 = vld [vmem:[#allocation8 + $0x48] sm:$0xff] }
 0x537   :  { %2255 = vmatmul.mubr.f32.gmra.mrb[18].mxu0 %v2139_v18  ;;  %2438 = vmatprep.mubr.f32.mxu1 %v2143_v11  ;;  %v2130_v23 = vmul.f32 %v3319_v14, %v2106_v60  ;;  %v2131_v7 = vmul.f32 %v6214_v8, %v2118_v61 }
 0x538   :  { %2260 = vmatprep.mubr.f32.mxu0 %v2143_v11  ;;  %v2962_v29 = vpack.c.bf16 %v2132_v15, %v2128_v0  ;;  %v2103_v30 = vpop.permute.xlu1 %2102  ;;  %v2960_v20 = vpack.c.bf16 %v2133_v9, %v2129_v63 }
 0x539   :  { %v2107_v46 = vsel %vm1058_vm8, %v2095_v1, %v2103_v30  ;;  %v2119_v45 = vsel %vm1058_vm8, %v2103_v30, %v2079_v42 }
 0x53a   :  { %v2134_v27 = vmul.f32 %v3319_v14, %v2107_v46  ;;  %v2135_v49 = vmul.f32 %v6214_v8, %v2119_v45  ;;  %2961 = vmatprep.subr.bf16.mxu0 %v2960_v20  ;;  %2439 = vmatmul.mubr.f32.gmra.mrb[20].mxu1 %v2142_v52 }
 0x53b   :  { %2261 = vmatmul.mubr.f32.gmra.mrb[20].mxu0 %v2142_v52  ;;  %2444 = vmatprep.mubr.f32.mxu1 %v2146_v62 }
 0x53c   :  { %2266 = vmatprep.mubr.f32.mxu0 %v2146_v62  ;;  %2963 = vmatpush1.bf16.msra.mxu0 %v2962_v29  ;;  %v3034_v5 = vpack.c.bf16 %v2134_v27, %v2130_v23  ;;  %v3032_v31 = vpack.c.bf16 %v2135_v49, %v2131_v7 }
 0x53e   :  { %3033 = vmatprep.subr.bf16.mxu1 %v3032_v31  ;;  %2445 = vmatmul.mubr.f32.gmra.mrb[22].mxu1 %v2145_v16 }
 0x53f   :  { %2267 = vmatmul.mubr.f32.gmra.mrb[22].mxu0 %v2145_v16  ;;  %3035 = vmatpush1.bf16.msra.mxu1 %v3034_v5 }
 0x540   :  { %2337 = vmatprep.mubr.f32.mxu0 %v6870_v56  ;;  %2515 = vmatprep.mubr.f32.mxu1 %v6870_v56 }
 0x542   :  { %2712 = vmatmul.mubr.msk.f32.vlgmr.msra.gmra.mrb[16].mxu1 %vm1143_vm9, %v2138_v51 }
 0x543   :  { %2708 = vmatmul.mubr.msk.f32.vlgmr.msra.gmra.mrb[16].mxu0 %vm1143_vm9, %v2138_v51  ;;  %2521 = vmatprep.mubr.f32.mxu1 %v6870_v56 }
 0x544   :  { %2343 = vmatprep.mubr.f32.mxu0 %v6870_v56 }
 0x546   :  { %2713 = vmatmul.mubr.msk.f32.gmra.mrb[18].mxu1 %vm1143_vm9, %v2141_v48  ;;  %v2155_v39 = vpop.permute.xlu0 %2154 }
 0x547   :  { %2709 = vmatmul.mubr.msk.f32.gmra.mrb[18].mxu0 %vm1143_vm9, %v2141_v48  ;;  %2527 = vmatprep.mubr.f32.mxu1 %v6870_v56 }
 0x548   :  { %2349 = vmatprep.mubr.f32.mxu0 %v6870_v56 }
 0x549   :  { %v2160_v59 = vpop.permute.xlu1 %2159 }
 0x54a   :  { %2714 = vmatmul.mubr.msk.f32.gmra.mrb[20].mxu1 %vm1143_vm9, %v2144_v53  ;;  %v2165_v21 = vpop.permute.xlu0 %2164 }
 0x54b   :  { %2710 = vmatmul.mubr.msk.f32.gmra.mrb[20].mxu0 %vm1143_vm9, %v2144_v53  ;;  %2533 = vmatprep.mubr.f32.mxu1 %v6870_v56 }
 0x54c   :  { %2355 = vmatprep.mubr.f32.mxu0 %v6870_v56 }
 0x54d   :  { %v2170_v9 = vpop.permute.xlu1 %2169 }
 0x54e   :  { %2715 = vmatmul.mubr.msk.f32.gmra.mrb[22].mxu1 %vm1143_vm9, %v2147_v54 }
 0x54f   :  { %2711 = vmatmul.mubr.msk.f32.gmra.mrb[22].mxu0 %vm1143_vm9, %v2147_v54 }
 0x615   :  { %v2517_v8 = vpop.f32.mrb[16].mxu1 }
 0x616   :  { %v2339_v33 = vpop.f32.mrb[16].mxu0  ;;  %v6266_v41 = vadd.f32 %v2517_v8, %v2155_v39  ;;  %v2519_v58 = vpop.f32.mrb[17].mxu1 }
 0x617   :  { %v6261_v17 = vadd.f32 %v2339_v33, %v2155_v39  ;;  %v2341_v36 = vpop.f32.mrb[17].mxu0  ;;  %v6269_v35 = vadd.f32 %v2519_v58, %v2155_v39 }
 0x618   :  { %v6263_v43 = vadd.f32 %v2341_v36, %v2155_v39  ;;  %v2542_v42 = vsub.f32 0.0, %v6266_v41 }
 0x619   :  { %v2540_v3 = vsub.f32 0.0, %v6261_v17  ;;  %v2543_v12 = vsub.f32 0.0, %v6269_v35  ;;  %v2523_v24 = vpop.f32.mrb[18].mxu1 }
 0x61a   :  { %v2541_v38 = vsub.f32 0.0, %v6263_v43  ;;  %v2345_v50 = vpop.f32.mrb[18].mxu0  ;;  %v2560_v14 = vmul.f32 1.442695, %v2542_v42  ;;  %v6278_v22 = vadd.f32 %v2523_v24, %v2160_v59  ;;  %v2525_v6 = vpop.f32.mrb[19].mxu1 }
 0x61b   :  { %v2556_v28 = vmul.f32 1.442695, %v2540_v3  ;;  %v6272_v37 = vadd.f32 %v2345_v50, %v2160_v59  ;;  %v2347_v32 = vpop.f32.mrb[19].mxu0  ;;  %v2562_v25 = vmul.f32 1.442695, %v2543_v12  ;;  %v6281_v1 = vadd.f32 %v2525_v6, %v2160_v59 }
 0x61c   :  { %v2558_v57 = vmul.f32 1.442695, %v2541_v38  ;;  %v6275_v13 = vadd.f32 %v2347_v32, %v2160_v59  ;;  %v2546_v44 = vsub.f32 0.0, %v6278_v22 }
 0x61d   :  { %3252 = vpow2.f32 %v2556_v28  ;;  %v2544_v47 = vsub.f32 0.0, %v6272_v37  ;;  %v2547_v34 = vsub.f32 0.0, %v6281_v1  ;;  %v2529_v40 = vpop.f32.mrb[20].mxu1 }
 0x61e   :  { %3254 = vpow2.f32 %v2558_v57  ;;  %v2545_v55 = vsub.f32 0.0, %v6275_v13  ;;  %v2351_v26 = vpop.f32.mrb[20].mxu0  ;;  %v2568_v19 = vmul.f32 1.442695, %v2546_v44  ;;  %v6290_v63 = vadd.f32 %v2529_v40, %v2165_v21  ;;  %v2531_v15 = vpop.f32.mrb[21].mxu1 }
 0x61f   :  { %3256 = vpow2.f32 %v2560_v14  ;;  %v2564_v4 = vmul.f32 1.442695, %v2544_v47  ;;  %v6284_v18 = vadd.f32 %v2351_v26, %v2165_v21  ;;  %v2353_v2 = vpop.f32.mrb[21].mxu0  ;;  %v2570_v60 = vmul.f32 1.442695, %v2547_v34 }
 0x620   :  { %3258 = vpow2.f32 %v2562_v25  ;;  %v2566_v11 = vmul.f32 1.442695, %v2545_v55  ;;  %v6287_v0 = vadd.f32 %v2353_v2, %v2165_v21  ;;  %v6293_v61 = vadd.f32 %v2531_v15, %v2165_v21 }
 0x621   :  { %3260 = vpow2.f32 %v2564_v4  ;;  %v2548_v10 = vsub.f32 0.0, %v6284_v18  ;;  %v2550_v30 = vsub.f32 0.0, %v6290_v63  ;;  %v2535_v7 = vpop.f32.mrb[22].mxu1 }
 0x622   :  { %3262 = vpow2.f32 %v2566_v11  ;;  %v2549_v52 = vsub.f32 0.0, %v6287_v0  ;;  %v2357_v62 = vpop.f32.mrb[22].mxu0  ;;  %v2551_v45 = vsub.f32 0.0, %v6293_v61  ;;  %v2537_v16 = vpop.f32.mrb[23].mxu1  ;;  %v6302_v38 = vadd.f32 %v2535_v7, %v2170_v9 }
 0x623   :  { %3264 = vpow2.f32 %v2568_v19  ;;  %v2572_v29 = vmul.f32 1.442695, %v2548_v10  ;;  %v6296_v20 = vadd.f32 %v2357_v62, %v2170_v9  ;;  %v2359_v23 = vpop.f32.mrb[23].mxu0  ;;  %v2576_v27 = vmul.f32 1.442695, %v2550_v30 }
 0x624   :  { %3266 = vpow2.f32 %v2570_v60  ;;  %v2574_v46 = vmul.f32 1.442695, %v2549_v52  ;;  %v2578_v5 = vmul.f32 1.442695, %v2551_v45  ;;  %v6300_v3 = vadd.f32 %v2359_v23, %v2170_v9 }
 0x625   :  { %3268 = vpow2.f32 %v2572_v29  ;;  %v2552_v49 = vsub.f32 0.0, %v6296_v20  ;;  %v6304_v42 = vadd.f32 %v2537_v16, %v2170_v9  ;;  %v2554_v21 = vsub.f32 0.0, %v6302_v38 }
 0x626   :  { %3270 = vpow2.f32 %v2574_v46  ;;  %v2553_v14 = vsub.f32 0.0, %v6300_v3 }
 0x627   :  { %v3253_v31 = vpop.eup %3252  ;;  %3272 = vpow2.f32 %v2576_v27  ;;  %v2580_v56 = vmul.f32 1.442695, %v2552_v49  ;;  %v2555_v26 = vsub.f32 0.0, %v6304_v42  ;;  %v2584_v10 = vmul.f32 1.442695, %v2554_v21 }
 0x628   :  { %v3255_v51 = vpop.eup %3254  ;;  %v2588_v48 = vadd.f32 1.0, %v3253_v31  ;;  %3274 = vpow2.f32 %v2578_v5  ;;  %v2582_v34 = vmul.f32 1.442695, %v2553_v14 }
 0x629   :  { %v3257_v53 = vpop.eup %3256  ;;  %v2589_v54 = vadd.f32 1.0, %v3255_v51  ;;  %3276 = vpow2.f32 %v2580_v56  ;;  %v2586_v60 = vmul.f32 1.442695, %v2555_v26 }
 0x62a   :  { %v3259_v39 = vpop.eup %3258  ;;  %3278 = vrcp.f32 %v2588_v48  ;;  %v2590_v33 = vadd.f32 1.0, %v3257_v53 }
 0x62b   :  { %v3261_v36 = vpop.eup %3260  ;;  %3280 = vrcp.f32 %v2589_v54  ;;  %v2591_v8 = vadd.f32 1.0, %v3259_v39 }
 0x62c   :  { %v3263_v58 = vpop.eup %3262  ;;  %3282 = vrcp.f32 %v2590_v33  ;;  %v2592_v59 = vadd.f32 1.0, %v3261_v36 }
 0x62d   :  { %v3265_v50 = vpop.eup %3264  ;;  %3284 = vrcp.f32 %v2591_v8  ;;  %v2593_v28 = vadd.f32 1.0, %v3263_v58 }
 0x62e   :  { %v3267_v32 = vpop.eup %3266  ;;  %3286 = vrcp.f32 %v2592_v59  ;;  %v2594_v57 = vadd.f32 1.0, %v3265_v50 }
 0x62f   :  { %v3269_v12 = vpop.eup %3268  ;;  %3288 = vrcp.f32 %v2593_v28  ;;  %v2595_v24 = vadd.f32 1.0, %v3267_v32 }
 0x630   :  { %v3271_v47 = vpop.eup %3270  ;;  %3290 = vrcp.f32 %v2594_v57  ;;  %v2596_v6 = vadd.f32 1.0, %v3269_v12 }
 0x631   :  { %v3273_v25 = vpop.eup %3272  ;;  %3292 = vrcp.f32 %v2595_v24  ;;  %v2597_v55 = vadd.f32 1.0, %v3271_v47 }
 0x632   :  { %v3275_v4 = vpop.eup %3274  ;;  %3294 = vrcp.f32 %v2596_v6  ;;  %v2598_v44 = vadd.f32 1.0, %v3273_v25 }
 0x633   :  { %v3277_v2 = vpop.eup %3276  ;;  %3296 = vrcp.f32 %v2597_v55  ;;  %v2599_v11 = vadd.f32 1.0, %v3275_v4 }
 0x634   :  { %v3279_v40 = vpop.eup %3278  ;;  %3298 = vrcp.f32 %v2598_v44  ;;  %v2600_v19 = vadd.f32 1.0, %v3277_v2 }
 0x635   :  { %v3281_v15 = vpop.eup %3280  ;;  %v2636_v9 = vmul.f32 %v3279_v40, %v6261_v17  ;;  %3300 = vrcp.f32 %v2599_v11 }
 0x636   :  { %v3283_v52 = vpop.eup %3282  ;;  %v2637_v62 = vmul.f32 %v3281_v15, %v6263_v43  ;;  %3302 = vrcp.f32 %v2600_v19 }
 0x637   :  { %v3285_v29 = vpop.eup %3284  ;;  %2652 = vst [vmem:[#allocation10] sm:$0xff] %v2636_v9  ;;  %v2638_v30 = vmul.f32 %v3283_v52, %v6266_v41  ;;  %3304 = vpow2.f32 %v2582_v34 }
 0x638   :  { %v3287_v23 = vpop.eup %3286  ;;  %2653 = vst [vmem:[#allocation10 + $0x8] sm:$0xff] %v2637_v62  ;;  %v2639_v46 = vmul.f32 %v3285_v29, %v6269_v35  ;;  %3306 = vpow2.f32 %v2584_v10 }
 0x639   :  { %v3289_v45 = vpop.eup %3288  ;;  %2661 = vst [vmem:[#allocation10 + $0x40] sm:$0xff] %v2638_v30  ;;  %v2640_v17 = vmul.f32 %v3287_v23, %v6272_v37  ;;  %3308 = vpow2.f32 %v2586_v60 }
 0x63a   :  { %v3291_v7 = vpop.eup %3290  ;;  %2662 = vst [vmem:[#allocation10 + $0x48] sm:$0xff] %v2639_v46  ;;  %v2641_v43 = vmul.f32 %v3289_v45, %v6275_v13 }
 0x63b   :  { %v3293_v27 = vpop.eup %3292  ;;  %2654 = vst [vmem:[#allocation10 + $0x10] sm:$0xff] %v2640_v17  ;;  %v2642_v49 = vmul.f32 %v3291_v7, %v6278_v22 }
 0x63c   :  { %v3295_v41 = vpop.eup %3294  ;;  %2655 = vst [vmem:[#allocation10 + $0x18] sm:$0xff] %v2641_v43  ;;  %v2643_v16 = vmul.f32 %v3293_v27, %v6281_v1 }
 0x63d   :  { %v3297_v5 = vpop.eup %3296  ;;  %2663 = vst [vmem:[#allocation10 + $0x50] sm:$0xff] %v2642_v49  ;;  %v2644_v35 = vmul.f32 %v3295_v41, %v6284_v18 }
 0x63e   :  { %v3299_v31 = vpop.eup %3298  ;;  %2664 = vst [vmem:[#allocation10 + $0x58] sm:$0xff] %v2643_v16  ;;  %v2645_v37 = vmul.f32 %v3297_v5, %v6287_v0 }
 0x63f   :  { %v3301_v56 = vpop.eup %3300  ;;  %2656 = vst [vmem:[#allocation10 + $0x20] sm:$0xff] %v2644_v35  ;;  %v2646_v13 = vmul.f32 %v3299_v31, %v6290_v63 }
 0x640   :  { %v3303_v51 = vpop.eup %3302  ;;  %2657 = vst [vmem:[#allocation10 + $0x28] sm:$0xff] %v2645_v37  ;;  %v2647_v22 = vmul.f32 %v3301_v56, %v6293_v61 }
 0x641   :  { %v3305_v48 = vpop.eup %3304  ;;  %2665 = vst [vmem:[#allocation10 + $0x60] sm:$0xff] %v2646_v13  ;;  %v2648_v1 = vmul.f32 %v3303_v51, %v6296_v20 }
 0x642   :  { %v3307_v53 = vpop.eup %3306  ;;  %2666 = vst [vmem:[#allocation10 + $0x68] sm:$0xff] %v2647_v22  ;;  %v2601_v54 = vadd.f32 1.0, %v3305_v48 }
 0x643   :  { %v3309_v18 = vpop.eup %3308  ;;  %2658 = vst [vmem:[#allocation10 + $0x30] sm:$0xff] %v2648_v1  ;;  %v2602_v39 = vadd.f32 1.0, %v3307_v53 }
 0x644   :  { %3310 = vrcp.f32 %v2601_v54  ;;  %v2603_v0 = vadd.f32 1.0, %v3309_v18 }
 0x645   :  { %3312 = vrcp.f32 %v2602_v39 }
 0x646   :  { %3314 = vrcp.f32 %v2603_v0 }
 0x64e   :  { %v3311_v33 = vpop.eup %3310 }
 0x64f   :  { %v3313_v63 = vpop.eup %3312  ;;  %v2649_v61 = vmul.f32 %v3311_v33, %v6300_v3 }
 0x650   :  { %v3315_v36 = vpop.eup %3314  ;;  %v2650_v8 = vmul.f32 %v3313_v63, %v6302_v38 }
 0x651   :  { %2659 = vst [vmem:[#allocation10 + $0x38] sm:$0xff] %v2649_v61  ;;  %v2651_v20 = vmul.f32 %v3315_v36, %v6304_v42 }
 0x652   :  { %2667 = vst [vmem:[#allocation10 + $0x70] sm:$0xff] %v2650_v8 }
 0x653   :  { %2668 = vst [vmem:[#allocation10 + $0x78] sm:$0xff] %v2651_v20 }
 0x654   :  { %3419 = shalt.err (!%p3416_p8)
}
 0x655   :  { %s3420_s0 = scalar_lea.hbm %s6348_s8, 2048 }
 0x656   :  { %p3421_p9 = scmp.ne.s32.totalorder %s6348_s8, %s3420_s0  ;;  %p3424_p10 = scmp.lt.u32.totalorder %s3420_s0, %s6348_s8 }
 0x658   :  { %p3426_p11 = pnand %p3424_p10, %p3421_p9 }
 0x65a   :  { %3429 = shalt.err (!%p3426_p11)
}
 0x65b   :  { %2680 = dma.vmem_to_hbm [thread:$0]  %s2675_s26, 2048, %s6348_s8, [#allocation4], %s3442_s1, %s3442_s1, %s3443_s28  }
 0x65c   :  { %3436 = dma.done.wait [#allocation4], 2048  }
 0x65d   :  { %3437 = vsyncadd [#allocation4], 4294965248 }
 0x65e   :  { %2684 = vsyncpa [#allocation3], 1 }
 0x65f   :  { %2685 = vsyncpa [#allocation6], 1 }
 0x660   :  { %2686 = vsyncpa [#allocation9], 1 }
 0x661   :  { %2687 = vsyncpa [#allocation4], 1 }

</bundles_post_ra>
